<compile_context>
chip_gen: v6e
topology: v6e:2x2x1
jax: 0.10.0
libtpu: 0.0.40
codegen_flags: <defaults>
</compile_context>

<pallas_src>
import jax
import jax.numpy as jnp
from jax.experimental import pallas as pl
from jax.experimental.pallas import tpu as pltpu

# ----------------------------- configuration --------------------------------
EMB_LC = 5          # cfg['embedding_landcover_size']
PATCH = 8           # cfg['patch_size']
NUM_LAYERS = 2      # cfg['num_layers']
NUM_HEADS = 4       # cfg['num_heads']
HIDDEN = 32         # cfg['hidden_dim']
MLP_DIM = 64        # cfg['mlp_dim']
IMG_C = 4           # input_img_size[0]  (includes the landcover channel)
IMG_S = 16          # input_img_size[1] == input_img_size[2]
TAB = 6             # input_tab_size[0]
NUM_CLASSES = 10
BATCH = 2

VIT_C = IMG_C - 1 + EMB_LC              # channels into conv_proj = 8
NPATCH = (IMG_S // PATCH) ** 2          # 4
SEQ = NPATCH + 1                        # 5 (class token prepended)
ROWS = BATCH * SEQ                      # folded batch*seq rows = 10
PATCH_K = VIT_C * PATCH * PATCH         # 512
HEAD_DIM = HIDDEN // NUM_HEADS          # 8
LN_EPS = 1e-6
BN_EPS = 1e-5
NEG_INF = -1e30


# ----------------------------- in-kernel helpers -----------------------------
def _layernorm(x, g, b, eps):
    mu = jnp.mean(x, axis=-1, keepdims=True)
    xc = x - mu
    var = jnp.mean(xc * xc, axis=-1, keepdims=True)
    return xc * jax.lax.rsqrt(var + eps) * g + b


def _batchnorm(x, g, b, eps):
    # training-mode BatchNorm1d: batch statistics over axis 0, biased variance
    mu = jnp.mean(x, axis=0, keepdims=True)
    xc = x - mu
    var = jnp.mean(xc * xc, axis=0, keepdims=True)
    return xc * jax.lax.rsqrt(var + eps) * g + b


def _erf(x):
    # TODO(synk): exact nn.GELU uses erf; no erf primitive lowering in
    # Pallas/Mosaic, so use Abramowitz-Stegun 7.1.26 (~1.5e-7 max abs error).
    a1, a2, a3, a4, a5 = 0.254829592, -0.284496736, 1.421413741, -1.453152027, 1.061405429
    p = 0.3275911
    sgn = jnp.where(x >= 0.0, 1.0, -1.0)
    ax = jnp.abs(x)
    t = 1.0 / (1.0 + p * ax)
    poly = ((((a5 * t + a4) * t + a3) * t + a2) * t + a1) * t
    return sgn * (1.0 - poly * jnp.exp(-ax * ax))


def _gelu(x):
    return 0.5 * x * (1.0 + _erf(x * 0.7071067811865476))


# ----------------------------- fused forward kernel --------------------------
def _vit_fused_kernel(patches_ref, tab_ref, conv_w_ref, seq_bias_ref, attn_bias_ref,
                      qkvo_ref, vecs_ref, w1_ref, w2_ref,
                      hw1_ref, hw2_ref, hvec_ref, o_ref):
    # ---- patch projection; class-token/pos-emb folded into seq_bias ----------
    # class-token rows of `patches` are zero, so the matmul contributes 0 there
    # and seq_bias supplies class_token + pos_emb[0]; token rows get
    # conv bias + pos_emb[1:].
    x = (jnp.dot(patches_ref[...], conv_w_ref[...],
                 preferred_element_type=jnp.float32)
         + seq_bias_ref[...])                                   # (ROWS, HIDDEN)
    attn_bias = attn_bias_ref[...]                              # (ROWS, ROWS) block-diag mask
    scale = 1.0 / (HEAD_DIM ** 0.5)

    # ---- NUM_LAYERS encoder blocks, statically unrolled ----------------------
    for l in range(NUM_LAYERS):
        qkvo = qkvo_ref[l]                  # (HIDDEN, 4*HIDDEN): [Wq | Wk | Wv | Wo]
        vecs = vecs_ref[l]                  # (8, 128) packed 1-D params
        w1 = w1_ref[l]                      # (HIDDEN, MLP_DIM)
        w2 = w2_ref[l]                      # (MLP_DIM, HIDDEN)
        ln1_g = vecs[0:1, 0:HIDDEN]
        ln1_b = vecs[1:2, 0:HIDDEN]
        ln2_g = vecs[2:3, 0:HIDDEN]
        ln2_b = vecs[3:4, 0:HIDDEN]
        b_qkv = vecs[4:5, 0:3 * HIDDEN]
        b_o = vecs[5:6, 0:HIDDEN]
        b1 = vecs[6:7, 0:MLP_DIM]
        b2 = vecs[7:8, 0:HIDDEN]

        xn = _layernorm(x, ln1_g, ln1_b, LN_EPS)
        # fused QKV projection: one (ROWS, H) @ (H, 3H) matmul
        qkv = jnp.dot(xn, qkvo[:, 0:3 * HIDDEN],
                      preferred_element_type=jnp.float32) + b_qkv
        wo = qkvo[:, 3 * HIDDEN:4 * HIDDEN]                     # out_proj.weight.T

        attn = jnp.zeros((ROWS, HIDDEN), jnp.float32)
        for h in range(NUM_HEADS):                              # static unroll
            qh = qkv[:, h * HEAD_DIM:(h + 1) * HEAD_DIM]
            kh = qkv[:, HIDDEN + h * HEAD_DIM:HIDDEN + (h + 1) * HEAD_DIM]
            vh = qkv[:, 2 * HIDDEN + h * HEAD_DIM:2 * HIDDEN + (h + 1) * HEAD_DIM]
            s = jax.lax.dot_general(qh, kh, (((1,), (1,)), ((), ())),
                                    preferred_element_type=jnp.float32) * scale
            s = s + attn_bias                                   # block-diagonal masking
            s = s - jnp.max(s, axis=-1, keepdims=True)
            p = jnp.exp(s)
            p = p / jnp.sum(p, axis=-1, keepdims=True)
            oh = jnp.dot(p, vh, preferred_element_type=jnp.float32)
            # concat-of-heads @ Wo  ==  sum_h oh @ Wo[h*hd:(h+1)*hd, :]  (exact)
            attn = attn + jnp.dot(oh, wo[h * HEAD_DIM:(h + 1) * HEAD_DIM, :],
                                  preferred_element_type=jnp.float32)

        x = x + attn + b_o                                      # residual 1
        yn = _layernorm(x, ln2_g, ln2_b, LN_EPS)
        h1 = _gelu(jnp.dot(yn, w1, preferred_element_type=jnp.float32) + b1)
        x = x + jnp.dot(h1, w2, preferred_element_type=jnp.float32) + b2  # residual 2

    # ---- head -----------------------------------------------------------------
    hv = hvec_ref[...]                                          # (8, HIDDEN)
    lnf_g = hv[0:1, 0:HIDDEN]
    lnf_b = hv[1:2, 0:HIDDEN]
    bnt_g = hv[2:3, 0:TAB]
    bnt_b = hv[3:4, 0:TAB]
    b1h = hv[4:5, 0:NUM_CLASSES]
    bnl_g = hv[5:6, 0:NUM_CLASSES]
    bnl_b = hv[6:7, 0:NUM_CLASSES]
    b2h = hv[7:8, 0:NUM_CLASSES]

    # Encoder's final LayerNorm is row-wise, so applying it only to the
    # class-token rows (rows 0..BATCH-1) is exactly self.encoder.ln(...)[:, 0].
    xc = _layernorm(x[0:BATCH, :], lnf_g, lnf_b, LN_EPS)        # (BATCH, HIDDEN)
    t = _batchnorm(tab_ref[...], bnt_g, bnt_b, BN_EPS)          # (BATCH, TAB)
    hw1 = hw1_ref[...]                                          # (HIDDEN+TAB, NUM_CLASSES)
    # concat([xc, t]) @ W1^T == xc @ W1a + t @ W1b  (avoids in-kernel lane concat)
    y = (jnp.dot(xc, hw1[0:HIDDEN, :], preferred_element_type=jnp.float32)
         + jnp.dot(t, hw1[HIDDEN:HIDDEN + TAB, :], preferred_element_type=jnp.float32)
         + b1h)
    y = jnp.maximum(y, 0.0)                                     # ReLU
    y = _batchnorm(y, bnl_g, bnl_b, BN_EPS)
    o_ref[...] = (jnp.dot(y, hw2_ref[...], preferred_element_type=jnp.float32)
                  + b2h).astype(o_ref.dtype)


def vit_fused(patches_full, tab, p):
    full = lambda shape: pl.BlockSpec(shape, lambda i: (0,) * len(shape))
    return pl.pallas_call(
        _vit_fused_kernel,
        out_shape=jax.ShapeDtypeStruct((BATCH, NUM_CLASSES), jnp.float32),
        grid=(1,),
        in_specs=[
            full((ROWS, PATCH_K)),                   # patches (zero class-token rows)
            full((BATCH, TAB)),                      # tabular input
            full((PATCH_K, HIDDEN)),                 # conv_proj weight (flattened)
            full((ROWS, HIDDEN)),                    # seq bias (cls+pos / conv_b+pos)
            full((ROWS, ROWS)),                      # block-diagonal attention bias
            full((NUM_LAYERS, HIDDEN, 4 * HIDDEN)),  # packed [Wq|Wk|Wv|Wo] per layer
            full((NUM_LAYERS, 8, 128)),              # packed per-layer 1-D params
            full((NUM_LAYERS, HIDDEN, MLP_DIM)),     # MLP W1
            full((NUM_LAYERS, MLP_DIM, HIDDEN)),     # MLP W2
            full((HIDDEN + TAB, NUM_CLASSES)),       # head lin1 weight
            full((NUM_CLASSES, NUM_CLASSES)),        # head lin2 weight
            full((8, HIDDEN)),                       # packed head 1-D params
        ],
        out_specs=full((BATCH, NUM_CLASSES)),
        compiler_params=pltpu.CompilerParams(dimension_semantics=("arbitrary",)),
    )(patches_full, tab, p['conv_w_t'], p['seq_bias'], p['attn_bias'],
      p['qkvo_w'], p['layer_vecs'], p['w1'], p['w2'],
      p['head_w1'], p['head_w2'], p['head_vecs'])


# ----------------------------- parameters ------------------------------------
def init_params(key):
    keys = iter(jax.random.split(key, 64))
    nrm = lambda shape, std=0.02: (std * jax.random.normal(next(keys), shape)).astype(jnp.float32)

    def pad_row(v, width):
        return jnp.pad(v, (0, width - v.shape[0])).reshape(1, width).astype(jnp.float32)

    embed = nrm((34, EMB_LC), 1.0)                       # nn.Embedding(34, E)
    conv_w = nrm((HIDDEN, VIT_C, PATCH, PATCH))          # Conv2d OIHW
    conv_b = nrm((HIDDEN,))
    class_token = jnp.zeros((1, 1, HIDDEN), jnp.float32)
    pos_emb = nrm((1, SEQ, HIDDEN))

    qkvo_l, vecs_l, w1_l, w2_l = [], [], [], []
    for _ in range(NUM_LAYERS):
        ln1_g = 1.0 + nrm((HIDDEN,), 0.1); ln1_b = nrm((HIDDEN,), 0.1)
        in_w = nrm((3 * HIDDEN, HIDDEN))                 # MHA in_proj_weight [Wq;Wk;Wv]
        in_b = nrm((3 * HIDDEN,))
        out_w = nrm((HIDDEN, HIDDEN))                    # MHA out_proj.weight
        out_b = nrm((HIDDEN,))
        ln2_g = 1.0 + nrm((HIDDEN,), 0.1); ln2_b = nrm((HIDDEN,), 0.1)
        w1 = nrm((MLP_DIM, HIDDEN)); b1 = nrm((MLP_DIM,))
        w2 = nrm((HIDDEN, MLP_DIM)); b2 = nrm((HIDDEN,))

        qkvo_l.append(jnp.concatenate([in_w.T, out_w.T], axis=1))   # (H, 4H)
        vecs_l.append(jnp.concatenate([
            pad_row(ln1_g, 128), pad_row(ln1_b, 128),
            pad_row(ln2_g, 128), pad_row(ln2_b, 128),
            pad_row(in_b, 128), pad_row(out_b, 128),
            pad_row(b1, 128), pad_row(b2, 128)], axis=0))            # (8, 128)
        w1_l.append(w1.T)                                            # (H, MLP)
        w2_l.append(w2.T)                                            # (MLP, H)

    lnf_g = 1.0 + nrm((HIDDEN,), 0.1); lnf_b = nrm((HIDDEN,), 0.1)   # encoder.ln
    bnt_g = 1.0 + nrm((TAB,), 0.1); bnt_b = nrm((TAB,), 0.1)         # batchnorm_tab
    lin1_w = nrm((NUM_CLASSES, HIDDEN + TAB)); lin1_b = nrm((NUM_CLASSES,))
    bnl_g = 1.0 + nrm((NUM_CLASSES,), 0.1); bnl_b = nrm((NUM_CLASSES,), 0.1)
    lin2_w = nrm((NUM_CLASSES, NUM_CLASSES)); lin2_b = nrm((NUM_CLASSES,))

    head_vecs = jnp.concatenate([
        pad_row(lnf_g, HIDDEN), pad_row(lnf_b, HIDDEN),
        pad_row(bnt_g, HIDDEN), pad_row(bnt_b, HIDDEN),
        pad_row(lin1_b, HIDDEN), pad_row(bnl_g, HIDDEN),
        pad_row(bnl_b, HIDDEN), pad_row(lin2_b, HIDDEN)], axis=0)    # (8, HIDDEN)

    # seq bias for the folded (batch*seq) row layout:
    #   rows 0..BATCH-1         -> class_token + pos_emb[0]   (cls rows)
    #   rows BATCH + b*NP + p   -> conv bias + pos_emb[1 + p] (token rows)
    cls_rows = jnp.broadcast_to(class_token[0] + pos_emb[0, 0:1, :], (BATCH, HIDDEN))
    tok_rows = jnp.tile(pos_emb[0, 1:, :], (BATCH, 1)) + conv_b.reshape(1, HIDDEN)
    seq_bias = jnp.concatenate([cls_rows, tok_rows], axis=0)          # (ROWS, HIDDEN)

    # block-diagonal additive attention bias (0 same batch / -1e30 cross batch)
    bid = jnp.concatenate([jnp.arange(BATCH), jnp.repeat(jnp.arange(BATCH), NPATCH)])
    attn_bias = jnp.where(bid[:, None] == bid[None, :], 0.0, NEG_INF).astype(jnp.float32)

    return dict(
        embed=embed,
        conv_w_t=conv_w.reshape(HIDDEN, PATCH_K).T,     # (K, H)
        seq_bias=seq_bias,
        attn_bias=attn_bias,
        qkvo_w=jnp.stack(qkvo_l),                       # (L, H, 4H)
        layer_vecs=jnp.stack(vecs_l),                   # (L, 8, 128)
        w1=jnp.stack(w1_l),                             # (L, H, MLP)
        w2=jnp.stack(w2_l),                             # (L, MLP, H)
        head_w1=lin1_w.T,                               # (H+TAB, C)
        head_w2=lin2_w.T,                               # (C, C)
        head_vecs=head_vecs,                            # (8, H)
    )


# ----------------------------- full forward ----------------------------------
@jax.jit
def vit_forward(input_imgs, input_tab, params):
    # glue: channel split / landcover embedding gather (data-dependent gather
    # stays in XLA) / concat / patch im2col flatten
    imgs = input_imgs[:, :-1, :, :]
    landcover = input_imgs[:, -1, :, :].astype(jnp.int32)
    lc_emb = jnp.take(params['embed'], landcover, axis=0)        # (N, H, W, E)
    lc_emb = jnp.transpose(lc_emb, (0, 3, 1, 2))                 # NCHW
    x = jnp.concatenate([imgs, lc_emb], axis=1)                  # (N, VIT_C, H, W)

    N = x.shape[0]
    nh = nw = IMG_S // PATCH
    patches = x.reshape(N, VIT_C, nh, PATCH, nw, PATCH)
    patches = patches.transpose(0, 2, 4, 1, 3, 5).reshape(N * nh * nw, PATCH_K)
    # prepend one zero row per batch element (class-token rows): the fused
    # kernel's patch matmul yields 0 there and seq_bias supplies cls + pos_emb.
    patches_full = jnp.concatenate(
        [jnp.zeros((BATCH, PATCH_K), jnp.float32), patches], axis=0)  # (ROWS, K)

    # dropout p=0.0 everywhere -> identity
    return vit_fused(patches_full, input_tab, params)            # (N, NUM_CLASSES)


# ----------------------------- main -------------------------------------------
if __name__ == "__main__":
    key = jax.random.PRNGKey(0)
    kp, ki, kt, kl = jax.random.split(key, 4)
    params = init_params(kp)

    img_f = jax.random.normal(ki, (BATCH, IMG_C - 1, IMG_S, IMG_S), jnp.float32)
    lc = jax.random.randint(kl, (BATCH, 1, IMG_S, IMG_S), 0, 34).astype(jnp.float32)
    input_imgs = jnp.concatenate([img_f, lc], axis=1)             # (2, 4, 16, 16)
    input_tab = jax.random.normal(kt, (BATCH, TAB), jnp.float32)  # (2, 6)

    out = vit_forward(input_imgs, input_tab, params)
    out = jax.block_until_ready(out)
    assert out.shape == (BATCH, NUM_CLASSES)
    assert bool(jnp.all(jnp.isfinite(out)))
    print("KERNEL_OK")
</pallas_src>

<mosaic_0001>
module attributes {stable_mosaic.version = 11 : i64} {
  func.func @_vit_fused_kernel(%arg0: i32, %arg1: memref<10x512xf32, #tpu.memory_space<vmem>>, %arg2: memref<2x6xf32, #tpu.memory_space<vmem>>, %arg3: memref<512x32xf32, #tpu.memory_space<vmem>>, %arg4: memref<10x32xf32, #tpu.memory_space<vmem>>, %arg5: memref<10x10xf32, #tpu.memory_space<vmem>>, %arg6: memref<2x32x128xf32, #tpu.memory_space<vmem>>, %arg7: memref<2x8x128xf32, #tpu.memory_space<vmem>>, %arg8: memref<2x32x64xf32, #tpu.memory_space<vmem>>, %arg9: memref<2x64x32xf32, #tpu.memory_space<vmem>>, %arg10: memref<38x10xf32, #tpu.memory_space<vmem>>, %arg11: memref<10x10xf32, #tpu.memory_space<vmem>>, %arg12: memref<8x32xf32, #tpu.memory_space<vmem>>, %arg13: memref<2x10xf32, #tpu.memory_space<vmem>>) attributes {dimension_semantics = [#tpu.dimension_semantics<arbitrary>], iteration_bounds = array<i64: 1>, scalar_prefetch = 0 : i64, scratch_operands = 0 : i64, tpu.core_type = #tpu.core_type<tc>, window_params = [{pipeline_mode = #tpu.pipeline_mode<synchronous>, transform_indices = @transform_0, window_bounds = array<i64: 10, 512>}, {pipeline_mode = #tpu.pipeline_mode<synchronous>, transform_indices = @transform_1, window_bounds = array<i64: 2, 6>}, {pipeline_mode = #tpu.pipeline_mode<synchronous>, transform_indices = @transform_2, window_bounds = array<i64: 512, 32>}, {pipeline_mode = #tpu.pipeline_mode<synchronous>, transform_indices = @transform_3, window_bounds = array<i64: 10, 32>}, {pipeline_mode = #tpu.pipeline_mode<synchronous>, transform_indices = @transform_4, window_bounds = array<i64: 10, 10>}, {pipeline_mode = #tpu.pipeline_mode<synchronous>, transform_indices = @transform_5, window_bounds = array<i64: 2, 32, 128>}, {pipeline_mode = #tpu.pipeline_mode<synchronous>, transform_indices = @transform_6, window_bounds = array<i64: 2, 8, 128>}, {pipeline_mode = #tpu.pipeline_mode<synchronous>, transform_indices = @transform_7, window_bounds = array<i64: 2, 32, 64>}, {pipeline_mode = #tpu.pipeline_mode<synchronous>, transform_indices = @transform_8, window_bounds = array<i64: 2, 64, 32>}, {pipeline_mode = #tpu.pipeline_mode<synchronous>, transform_indices = @transform_9, window_bounds = array<i64: 38, 10>}, {pipeline_mode = #tpu.pipeline_mode<synchronous>, transform_indices = @transform_10, window_bounds = array<i64: 10, 10>}, {pipeline_mode = #tpu.pipeline_mode<synchronous>, transform_indices = @transform_11, window_bounds = array<i64: 8, 32>}, {pipeline_mode = #tpu.pipeline_mode<synchronous>, transform_indices = @transform_12, window_bounds = array<i64: 2, 10>}]} {
    %c0 = arith.constant 0 : index
    %c0_0 = arith.constant 0 : index
    %0 = vector.load %arg1[%c0, %c0_0] : memref<10x512xf32, #tpu.memory_space<vmem>>, vector<10x512xf32>
    %c0_1 = arith.constant 0 : index
    %c0_2 = arith.constant 0 : index
    %1 = vector.load %arg3[%c0_1, %c0_2] : memref<512x32xf32, #tpu.memory_space<vmem>>, vector<512x32xf32>
    %cst = arith.constant dense<0.000000e+00> : vector<10x32xf32>
    %2 = tpu.matmul %0, %1, %cst {dimension_numbers = #tpu.dot_dimension_numbers<[1], [0], [0], [1], [0, 0, 1, 1], [], []>} : vector<10x512xf32>, vector<512x32xf32>, vector<10x32xf32> -> vector<10x32xf32>
    %c0_3 = arith.constant 0 : index
    %c0_4 = arith.constant 0 : index
    %3 = vector.load %arg4[%c0_3, %c0_4] : memref<10x32xf32, #tpu.memory_space<vmem>>, vector<10x32xf32>
    %4 = arith.addf %2, %3 : vector<10x32xf32>
    %c0_5 = arith.constant 0 : index
    %c0_6 = arith.constant 0 : index
    %5 = vector.load %arg5[%c0_5, %c0_6] : memref<10x10xf32, #tpu.memory_space<vmem>>, vector<10x10xf32>
    %c0_7 = arith.constant 0 : index
    %c0_8 = arith.constant 0 : index
    %c0_9 = arith.constant 0 : index
    %6 = vector.load %arg6[%c0_7, %c0_8, %c0_9] : memref<2x32x128xf32, #tpu.memory_space<vmem>>, vector<1x32x128xf32>
    %7 = vector.shape_cast %6 : vector<1x32x128xf32> to vector<32x128xf32>
    %c0_10 = arith.constant 0 : index
    %c0_11 = arith.constant 0 : index
    %c0_12 = arith.constant 0 : index
    %8 = vector.load %arg7[%c0_10, %c0_11, %c0_12] : memref<2x8x128xf32, #tpu.memory_space<vmem>>, vector<1x8x128xf32>
    %9 = vector.shape_cast %8 : vector<1x8x128xf32> to vector<8x128xf32>
    %c0_13 = arith.constant 0 : index
    %c0_14 = arith.constant 0 : index
    %c0_15 = arith.constant 0 : index
    %10 = vector.load %arg8[%c0_13, %c0_14, %c0_15] : memref<2x32x64xf32, #tpu.memory_space<vmem>>, vector<1x32x64xf32>
    %11 = vector.shape_cast %10 : vector<1x32x64xf32> to vector<32x64xf32>
    %c0_16 = arith.constant 0 : index
    %c0_17 = arith.constant 0 : index
    %c0_18 = arith.constant 0 : index
    %12 = vector.load %arg9[%c0_16, %c0_17, %c0_18] : memref<2x64x32xf32, #tpu.memory_space<vmem>>, vector<1x64x32xf32>
    %13 = vector.shape_cast %12 : vector<1x64x32xf32> to vector<64x32xf32>
    %14 = vector.extract_strided_slice %9 {offsets = [0, 0], sizes = [1, 32], strides = [1, 1]} : vector<8x128xf32> to vector<1x32xf32>
    %15 = vector.extract_strided_slice %9 {offsets = [1, 0], sizes = [1, 32], strides = [1, 1]} : vector<8x128xf32> to vector<1x32xf32>
    %16 = vector.extract_strided_slice %9 {offsets = [2, 0], sizes = [1, 32], strides = [1, 1]} : vector<8x128xf32> to vector<1x32xf32>
    %17 = vector.extract_strided_slice %9 {offsets = [3, 0], sizes = [1, 32], strides = [1, 1]} : vector<8x128xf32> to vector<1x32xf32>
    %18 = vector.extract_strided_slice %9 {offsets = [4, 0], sizes = [1, 96], strides = [1, 1]} : vector<8x128xf32> to vector<1x96xf32>
    %19 = vector.extract_strided_slice %9 {offsets = [5, 0], sizes = [1, 32], strides = [1, 1]} : vector<8x128xf32> to vector<1x32xf32>
    %20 = vector.extract_strided_slice %9 {offsets = [6, 0], sizes = [1, 64], strides = [1, 1]} : vector<8x128xf32> to vector<1x64xf32>
    %21 = vector.extract_strided_slice %9 {offsets = [7, 0], sizes = [1, 32], strides = [1, 1]} : vector<8x128xf32> to vector<1x32xf32>
    %cst_19 = arith.constant dense<0.000000e+00> : vector<10xf32>
    %22 = vector.multi_reduction <add>, %4, %cst_19 [1] : vector<10x32xf32> to vector<10xf32>
    %23 = vector.shape_cast %22 : vector<10xf32> to vector<10x1xf32>
    %cst_20 = arith.constant 3.200000e+01 : f32
    %24 = vector.broadcast %cst_20 : f32 to vector<10x1xf32>
    %25 = arith.divf %23, %24 : vector<10x1xf32>
    %26 = vector.broadcast %25 : vector<10x1xf32> to vector<10x32xf32>
    %27 = arith.subf %4, %26 : vector<10x32xf32>
    %28 = arith.mulf %27, %27 : vector<10x32xf32>
    %cst_21 = arith.constant dense<0.000000e+00> : vector<10xf32>
    %29 = vector.multi_reduction <add>, %28, %cst_21 [1] : vector<10x32xf32> to vector<10xf32>
    %30 = vector.shape_cast %29 : vector<10xf32> to vector<10x1xf32>
    %cst_22 = arith.constant 3.200000e+01 : f32
    %31 = vector.broadcast %cst_22 : f32 to vector<10x1xf32>
    %32 = arith.divf %30, %31 : vector<10x1xf32>
    %cst_23 = arith.constant 9.99999997E-7 : f32
    %33 = vector.broadcast %cst_23 : f32 to vector<10x1xf32>
    %34 = arith.addf %32, %33 : vector<10x1xf32>
    %35 = math.rsqrt %34 : vector<10x1xf32>
    %36 = vector.broadcast %35 : vector<10x1xf32> to vector<10x32xf32>
    %37 = arith.mulf %27, %36 : vector<10x32xf32>
    %38 = vector.broadcast %14 : vector<1x32xf32> to vector<10x32xf32>
    %39 = arith.mulf %37, %38 : vector<10x32xf32>
    %40 = vector.broadcast %15 : vector<1x32xf32> to vector<10x32xf32>
    %41 = arith.addf %39, %40 : vector<10x32xf32>
    %42 = vector.extract_strided_slice %7 {offsets = [0, 0], sizes = [32, 96], strides = [1, 1]} : vector<32x128xf32> to vector<32x96xf32>
    %cst_24 = arith.constant dense<0.000000e+00> : vector<10x96xf32>
    %43 = tpu.matmul %41, %42, %cst_24 {dimension_numbers = #tpu.dot_dimension_numbers<[1], [0], [0], [1], [0, 0, 1, 1], [], []>} : vector<10x32xf32>, vector<32x96xf32>, vector<10x96xf32> -> vector<10x96xf32>
    %44 = vector.broadcast %18 : vector<1x96xf32> to vector<10x96xf32>
    %45 = arith.addf %43, %44 : vector<10x96xf32>
    %46 = vector.extract_strided_slice %7 {offsets = [0, 96], sizes = [32, 32], strides = [1, 1]} : vector<32x128xf32> to vector<32x32xf32>
    %cst_25 = arith.constant 0.000000e+00 : f32
    %47 = vector.broadcast %cst_25 : f32 to vector<10x32xf32>
    %48 = vector.extract_strided_slice %45 {offsets = [0, 0], sizes = [10, 8], strides = [1, 1]} : vector<10x96xf32> to vector<10x8xf32>
    %49 = vector.extract_strided_slice %45 {offsets = [0, 32], sizes = [10, 8], strides = [1, 1]} : vector<10x96xf32> to vector<10x8xf32>
    %50 = vector.extract_strided_slice %45 {offsets = [0, 64], sizes = [10, 8], strides = [1, 1]} : vector<10x96xf32> to vector<10x8xf32>
    %cst_26 = arith.constant dense<0.000000e+00> : vector<10x10xf32>
    %51 = tpu.matmul %48, %49, %cst_26 {dimension_numbers = #tpu.dot_dimension_numbers<[1], [1], [0], [0], [0, 0, 1, 0], [], []>} : vector<10x8xf32>, vector<10x8xf32>, vector<10x10xf32> -> vector<10x10xf32>
    %cst_27 = arith.constant 0.353553385 : f32
    %52 = vector.broadcast %cst_27 : f32 to vector<10x10xf32>
    %53 = arith.mulf %51, %52 : vector<10x10xf32>
    %54 = arith.addf %53, %5 : vector<10x10xf32>
    %cst_28 = arith.constant dense<0xFF800000> : vector<10xf32>
    %55 = vector.multi_reduction <maximumf>, %54, %cst_28 [1] : vector<10x10xf32> to vector<10xf32>
    %56 = vector.shape_cast %55 : vector<10xf32> to vector<10x1xf32>
    %57 = vector.broadcast %56 : vector<10x1xf32> to vector<10x10xf32>
    %58 = arith.subf %54, %57 : vector<10x10xf32>
    %59 = math.exp %58 : vector<10x10xf32>
    %cst_29 = arith.constant dense<0.000000e+00> : vector<10xf32>
    %60 = vector.multi_reduction <add>, %59, %cst_29 [1] : vector<10x10xf32> to vector<10xf32>
    %61 = vector.shape_cast %60 : vector<10xf32> to vector<10x1xf32>
    %62 = vector.broadcast %61 : vector<10x1xf32> to vector<10x10xf32>
    %63 = arith.divf %59, %62 : vector<10x10xf32>
    %cst_30 = arith.constant dense<0.000000e+00> : vector<10x8xf32>
    %64 = tpu.matmul %63, %50, %cst_30 {dimension_numbers = #tpu.dot_dimension_numbers<[1], [0], [0], [1], [0, 0, 1, 1], [], []>} : vector<10x10xf32>, vector<10x8xf32>, vector<10x8xf32> -> vector<10x8xf32>
    %65 = vector.extract_strided_slice %46 {offsets = [0, 0], sizes = [8, 32], strides = [1, 1]} : vector<32x32xf32> to vector<8x32xf32>
    %cst_31 = arith.constant dense<0.000000e+00> : vector<10x32xf32>
    %66 = tpu.matmul %64, %65, %cst_31 {dimension_numbers = #tpu.dot_dimension_numbers<[1], [0], [0], [1], [0, 0, 1, 1], [], []>} : vector<10x8xf32>, vector<8x32xf32>, vector<10x32xf32> -> vector<10x32xf32>
    %67 = arith.addf %47, %66 : vector<10x32xf32>
    %68 = vector.extract_strided_slice %45 {offsets = [0, 8], sizes = [10, 8], strides = [1, 1]} : vector<10x96xf32> to vector<10x8xf32>
    %69 = vector.extract_strided_slice %45 {offsets = [0, 40], sizes = [10, 8], strides = [1, 1]} : vector<10x96xf32> to vector<10x8xf32>
    %70 = vector.extract_strided_slice %45 {offsets = [0, 72], sizes = [10, 8], strides = [1, 1]} : vector<10x96xf32> to vector<10x8xf32>
    %cst_32 = arith.constant dense<0.000000e+00> : vector<10x10xf32>
    %71 = tpu.matmul %68, %69, %cst_32 {dimension_numbers = #tpu.dot_dimension_numbers<[1], [1], [0], [0], [0, 0, 1, 0], [], []>} : vector<10x8xf32>, vector<10x8xf32>, vector<10x10xf32> -> vector<10x10xf32>
    %cst_33 = arith.constant 0.353553385 : f32
    %72 = vector.broadcast %cst_33 : f32 to vector<10x10xf32>
    %73 = arith.mulf %71, %72 : vector<10x10xf32>
    %74 = arith.addf %73, %5 : vector<10x10xf32>
    %cst_34 = arith.constant dense<0xFF800000> : vector<10xf32>
    %75 = vector.multi_reduction <maximumf>, %74, %cst_34 [1] : vector<10x10xf32> to vector<10xf32>
    %76 = vector.shape_cast %75 : vector<10xf32> to vector<10x1xf32>
    %77 = vector.broadcast %76 : vector<10x1xf32> to vector<10x10xf32>
    %78 = arith.subf %74, %77 : vector<10x10xf32>
    %79 = math.exp %78 : vector<10x10xf32>
    %cst_35 = arith.constant dense<0.000000e+00> : vector<10xf32>
    %80 = vector.multi_reduction <add>, %79, %cst_35 [1] : vector<10x10xf32> to vector<10xf32>
    %81 = vector.shape_cast %80 : vector<10xf32> to vector<10x1xf32>
    %82 = vector.broadcast %81 : vector<10x1xf32> to vector<10x10xf32>
    %83 = arith.divf %79, %82 : vector<10x10xf32>
    %cst_36 = arith.constant dense<0.000000e+00> : vector<10x8xf32>
    %84 = tpu.matmul %83, %70, %cst_36 {dimension_numbers = #tpu.dot_dimension_numbers<[1], [0], [0], [1], [0, 0, 1, 1], [], []>} : vector<10x10xf32>, vector<10x8xf32>, vector<10x8xf32> -> vector<10x8xf32>
    %85 = vector.extract_strided_slice %46 {offsets = [8, 0], sizes = [8, 32], strides = [1, 1]} : vector<32x32xf32> to vector<8x32xf32>
    %cst_37 = arith.constant dense<0.000000e+00> : vector<10x32xf32>
    %86 = tpu.matmul %84, %85, %cst_37 {dimension_numbers = #tpu.dot_dimension_numbers<[1], [0], [0], [1], [0, 0, 1, 1], [], []>} : vector<10x8xf32>, vector<8x32xf32>, vector<10x32xf32> -> vector<10x32xf32>
    %87 = arith.addf %67, %86 : vector<10x32xf32>
    %88 = vector.extract_strided_slice %45 {offsets = [0, 16], sizes = [10, 8], strides = [1, 1]} : vector<10x96xf32> to vector<10x8xf32>
    %89 = vector.extract_strided_slice %45 {offsets = [0, 48], sizes = [10, 8], strides = [1, 1]} : vector<10x96xf32> to vector<10x8xf32>
    %90 = vector.extract_strided_slice %45 {offsets = [0, 80], sizes = [10, 8], strides = [1, 1]} : vector<10x96xf32> to vector<10x8xf32>
    %cst_38 = arith.constant dense<0.000000e+00> : vector<10x10xf32>
    %91 = tpu.matmul %88, %89, %cst_38 {dimension_numbers = #tpu.dot_dimension_numbers<[1], [1], [0], [0], [0, 0, 1, 0], [], []>} : vector<10x8xf32>, vector<10x8xf32>, vector<10x10xf32> -> vector<10x10xf32>
    %cst_39 = arith.constant 0.353553385 : f32
    %92 = vector.broadcast %cst_39 : f32 to vector<10x10xf32>
    %93 = arith.mulf %91, %92 : vector<10x10xf32>
    %94 = arith.addf %93, %5 : vector<10x10xf32>
    %cst_40 = arith.constant dense<0xFF800000> : vector<10xf32>
    %95 = vector.multi_reduction <maximumf>, %94, %cst_40 [1] : vector<10x10xf32> to vector<10xf32>
    %96 = vector.shape_cast %95 : vector<10xf32> to vector<10x1xf32>
    %97 = vector.broadcast %96 : vector<10x1xf32> to vector<10x10xf32>
    %98 = arith.subf %94, %97 : vector<10x10xf32>
    %99 = math.exp %98 : vector<10x10xf32>
    %cst_41 = arith.constant dense<0.000000e+00> : vector<10xf32>
    %100 = vector.multi_reduction <add>, %99, %cst_41 [1] : vector<10x10xf32> to vector<10xf32>
    %101 = vector.shape_cast %100 : vector<10xf32> to vector<10x1xf32>
    %102 = vector.broadcast %101 : vector<10x1xf32> to vector<10x10xf32>
    %103 = arith.divf %99, %102 : vector<10x10xf32>
    %cst_42 = arith.constant dense<0.000000e+00> : vector<10x8xf32>
    %104 = tpu.matmul %103, %90, %cst_42 {dimension_numbers = #tpu.dot_dimension_numbers<[1], [0], [0], [1], [0, 0, 1, 1], [], []>} : vector<10x10xf32>, vector<10x8xf32>, vector<10x8xf32> -> vector<10x8xf32>
    %105 = vector.extract_strided_slice %46 {offsets = [16, 0], sizes = [8, 32], strides = [1, 1]} : vector<32x32xf32> to vector<8x32xf32>
    %cst_43 = arith.constant dense<0.000000e+00> : vector<10x32xf32>
    %106 = tpu.matmul %104, %105, %cst_43 {dimension_numbers = #tpu.dot_dimension_numbers<[1], [0], [0], [1], [0, 0, 1, 1], [], []>} : vector<10x8xf32>, vector<8x32xf32>, vector<10x32xf32> -> vector<10x32xf32>
    %107 = arith.addf %87, %106 : vector<10x32xf32>
    %108 = vector.extract_strided_slice %45 {offsets = [0, 24], sizes = [10, 8], strides = [1, 1]} : vector<10x96xf32> to vector<10x8xf32>
    %109 = vector.extract_strided_slice %45 {offsets = [0, 56], sizes = [10, 8], strides = [1, 1]} : vector<10x96xf32> to vector<10x8xf32>
    %110 = vector.extract_strided_slice %45 {offsets = [0, 88], sizes = [10, 8], strides = [1, 1]} : vector<10x96xf32> to vector<10x8xf32>
    %cst_44 = arith.constant dense<0.000000e+00> : vector<10x10xf32>
    %111 = tpu.matmul %108, %109, %cst_44 {dimension_numbers = #tpu.dot_dimension_numbers<[1], [1], [0], [0], [0, 0, 1, 0], [], []>} : vector<10x8xf32>, vector<10x8xf32>, vector<10x10xf32> -> vector<10x10xf32>
    %cst_45 = arith.constant 0.353553385 : f32
    %112 = vector.broadcast %cst_45 : f32 to vector<10x10xf32>
    %113 = arith.mulf %111, %112 : vector<10x10xf32>
    %114 = arith.addf %113, %5 : vector<10x10xf32>
    %cst_46 = arith.constant dense<0xFF800000> : vector<10xf32>
    %115 = vector.multi_reduction <maximumf>, %114, %cst_46 [1] : vector<10x10xf32> to vector<10xf32>
    %116 = vector.shape_cast %115 : vector<10xf32> to vector<10x1xf32>
    %117 = vector.broadcast %116 : vector<10x1xf32> to vector<10x10xf32>
    %118 = arith.subf %114, %117 : vector<10x10xf32>
    %119 = math.exp %118 : vector<10x10xf32>
    %cst_47 = arith.constant dense<0.000000e+00> : vector<10xf32>
    %120 = vector.multi_reduction <add>, %119, %cst_47 [1] : vector<10x10xf32> to vector<10xf32>
    %121 = vector.shape_cast %120 : vector<10xf32> to vector<10x1xf32>
    %122 = vector.broadcast %121 : vector<10x1xf32> to vector<10x10xf32>
    %123 = arith.divf %119, %122 : vector<10x10xf32>
    %cst_48 = arith.constant dense<0.000000e+00> : vector<10x8xf32>
    %124 = tpu.matmul %123, %110, %cst_48 {dimension_numbers = #tpu.dot_dimension_numbers<[1], [0], [0], [1], [0, 0, 1, 1], [], []>} : vector<10x10xf32>, vector<10x8xf32>, vector<10x8xf32> -> vector<10x8xf32>
    %125 = vector.extract_strided_slice %46 {offsets = [24, 0], sizes = [8, 32], strides = [1, 1]} : vector<32x32xf32> to vector<8x32xf32>
    %cst_49 = arith.constant dense<0.000000e+00> : vector<10x32xf32>
    %126 = tpu.matmul %124, %125, %cst_49 {dimension_numbers = #tpu.dot_dimension_numbers<[1], [0], [0], [1], [0, 0, 1, 1], [], []>} : vector<10x8xf32>, vector<8x32xf32>, vector<10x32xf32> -> vector<10x32xf32>
    %127 = arith.addf %107, %126 : vector<10x32xf32>
    %128 = arith.addf %4, %127 : vector<10x32xf32>
    %129 = vector.broadcast %19 : vector<1x32xf32> to vector<10x32xf32>
    %130 = arith.addf %128, %129 : vector<10x32xf32>
    %cst_50 = arith.constant dense<0.000000e+00> : vector<10xf32>
    %131 = vector.multi_reduction <add>, %130, %cst_50 [1] : vector<10x32xf32> to vector<10xf32>
    %132 = vector.shape_cast %131 : vector<10xf32> to vector<10x1xf32>
    %cst_51 = arith.constant 3.200000e+01 : f32
    %133 = vector.broadcast %cst_51 : f32 to vector<10x1xf32>
    %134 = arith.divf %132, %133 : vector<10x1xf32>
    %135 = vector.broadcast %134 : vector<10x1xf32> to vector<10x32xf32>
    %136 = arith.subf %130, %135 : vector<10x32xf32>
    %137 = arith.mulf %136, %136 : vector<10x32xf32>
    %cst_52 = arith.constant dense<0.000000e+00> : vector<10xf32>
    %138 = vector.multi_reduction <add>, %137, %cst_52 [1] : vector<10x32xf32> to vector<10xf32>
    %139 = vector.shape_cast %138 : vector<10xf32> to vector<10x1xf32>
    %cst_53 = arith.constant 3.200000e+01 : f32
    %140 = vector.broadcast %cst_53 : f32 to vector<10x1xf32>
    %141 = arith.divf %139, %140 : vector<10x1xf32>
    %cst_54 = arith.constant 9.99999997E-7 : f32
    %142 = vector.broadcast %cst_54 : f32 to vector<10x1xf32>
    %143 = arith.addf %141, %142 : vector<10x1xf32>
    %144 = math.rsqrt %143 : vector<10x1xf32>
    %145 = vector.broadcast %144 : vector<10x1xf32> to vector<10x32xf32>
    %146 = arith.mulf %136, %145 : vector<10x32xf32>
    %147 = vector.broadcast %16 : vector<1x32xf32> to vector<10x32xf32>
    %148 = arith.mulf %146, %147 : vector<10x32xf32>
    %149 = vector.broadcast %17 : vector<1x32xf32> to vector<10x32xf32>
    %150 = arith.addf %148, %149 : vector<10x32xf32>
    %cst_55 = arith.constant dense<0.000000e+00> : vector<10x64xf32>
    %151 = tpu.matmul %150, %11, %cst_55 {dimension_numbers = #tpu.dot_dimension_numbers<[1], [0], [0], [1], [0, 0, 1, 1], [], []>} : vector<10x32xf32>, vector<32x64xf32>, vector<10x64xf32> -> vector<10x64xf32>
    %152 = vector.broadcast %20 : vector<1x64xf32> to vector<10x64xf32>
    %153 = arith.addf %151, %152 : vector<10x64xf32>
    %cst_56 = arith.constant 5.000000e-01 : f32
    %154 = vector.broadcast %cst_56 : f32 to vector<10x64xf32>
    %155 = arith.mulf %154, %153 : vector<10x64xf32>
    %cst_57 = arith.constant 0.707106769 : f32
    %156 = vector.broadcast %cst_57 : f32 to vector<10x64xf32>
    %157 = arith.mulf %153, %156 : vector<10x64xf32>
    %cst_58 = arith.constant 0.000000e+00 : f32
    %158 = vector.broadcast %cst_58 : f32 to vector<10x64xf32>
    %159 = arith.cmpf oge, %157, %158 : vector<10x64xf32>
    %cst_59 = arith.constant 1.000000e+00 : f32
    %cst_60 = arith.constant -1.000000e+00 : f32
    %160 = vector.broadcast %cst_59 : f32 to vector<10x64xf32>
    %161 = vector.broadcast %cst_60 : f32 to vector<10x64xf32>
    %162 = arith.select %159, %160, %161 : vector<10x64xi1>, vector<10x64xf32>
    %163 = math.absf %157 : vector<10x64xf32>
    %cst_61 = arith.constant 0.327591091 : f32
    %164 = vector.broadcast %cst_61 : f32 to vector<10x64xf32>
    %165 = arith.mulf %164, %163 : vector<10x64xf32>
    %cst_62 = arith.constant 1.000000e+00 : f32
    %166 = vector.broadcast %cst_62 : f32 to vector<10x64xf32>
    %167 = arith.addf %166, %165 : vector<10x64xf32>
    %cst_63 = arith.constant 1.000000e+00 : f32
    %168 = vector.broadcast %cst_63 : f32 to vector<10x64xf32>
    %169 = arith.divf %168, %167 : vector<10x64xf32>
    %cst_64 = arith.constant 1.06140542 : f32
    %170 = vector.broadcast %cst_64 : f32 to vector<10x64xf32>
    %171 = arith.mulf %170, %169 : vector<10x64xf32>
    %cst_65 = arith.constant -1.45315206 : f32
    %172 = vector.broadcast %cst_65 : f32 to vector<10x64xf32>
    %173 = arith.addf %171, %172 : vector<10x64xf32>
    %174 = arith.mulf %173, %169 : vector<10x64xf32>
    %cst_66 = arith.constant 1.42141378 : f32
    %175 = vector.broadcast %cst_66 : f32 to vector<10x64xf32>
    %176 = arith.addf %174, %175 : vector<10x64xf32>
    %177 = arith.mulf %176, %169 : vector<10x64xf32>
    %cst_67 = arith.constant -0.284496725 : f32
    %178 = vector.broadcast %cst_67 : f32 to vector<10x64xf32>
    %179 = arith.addf %177, %178 : vector<10x64xf32>
    %180 = arith.mulf %179, %169 : vector<10x64xf32>
    %cst_68 = arith.constant 0.254829586 : f32
    %181 = vector.broadcast %cst_68 : f32 to vector<10x64xf32>
    %182 = arith.addf %180, %181 : vector<10x64xf32>
    %183 = arith.mulf %182, %169 : vector<10x64xf32>
    %cst_69 = arith.constant 0.000000e+00 : f32
    %184 = vector.broadcast %cst_69 : f32 to vector<10x64xf32>
    %185 = arith.subf %184, %163 : vector<10x64xf32>
    %186 = arith.mulf %185, %163 : vector<10x64xf32>
    %187 = math.exp %186 : vector<10x64xf32>
    %188 = arith.mulf %183, %187 : vector<10x64xf32>
    %cst_70 = arith.constant 1.000000e+00 : f32
    %189 = vector.broadcast %cst_70 : f32 to vector<10x64xf32>
    %190 = arith.subf %189, %188 : vector<10x64xf32>
    %191 = arith.mulf %162, %190 : vector<10x64xf32>
    %cst_71 = arith.constant 1.000000e+00 : f32
    %192 = vector.broadcast %cst_71 : f32 to vector<10x64xf32>
    %193 = arith.addf %192, %191 : vector<10x64xf32>
    %194 = arith.mulf %155, %193 : vector<10x64xf32>
    %cst_72 = arith.constant dense<0.000000e+00> : vector<10x32xf32>
    %195 = tpu.matmul %194, %13, %cst_72 {dimension_numbers = #tpu.dot_dimension_numbers<[1], [0], [0], [1], [0, 0, 1, 1], [], []>} : vector<10x64xf32>, vector<64x32xf32>, vector<10x32xf32> -> vector<10x32xf32>
    %196 = arith.addf %130, %195 : vector<10x32xf32>
    %197 = vector.broadcast %21 : vector<1x32xf32> to vector<10x32xf32>
    %198 = arith.addf %196, %197 : vector<10x32xf32>
    %c1 = arith.constant 1 : index
    %c0_73 = arith.constant 0 : index
    %c0_74 = arith.constant 0 : index
    %199 = vector.load %arg6[%c1, %c0_73, %c0_74] : memref<2x32x128xf32, #tpu.memory_space<vmem>>, vector<1x32x128xf32>
    %200 = vector.shape_cast %199 : vector<1x32x128xf32> to vector<32x128xf32>
    %c1_75 = arith.constant 1 : index
    %c0_76 = arith.constant 0 : index
    %c0_77 = arith.constant 0 : index
    %201 = vector.load %arg7[%c1_75, %c0_76, %c0_77] : memref<2x8x128xf32, #tpu.memory_space<vmem>>, vector<1x8x128xf32>
    %202 = vector.shape_cast %201 : vector<1x8x128xf32> to vector<8x128xf32>
    %c1_78 = arith.constant 1 : index
    %c0_79 = arith.constant 0 : index
    %c0_80 = arith.constant 0 : index
    %203 = vector.load %arg8[%c1_78, %c0_79, %c0_80] : memref<2x32x64xf32, #tpu.memory_space<vmem>>, vector<1x32x64xf32>
    %204 = vector.shape_cast %203 : vector<1x32x64xf32> to vector<32x64xf32>
    %c1_81 = arith.constant 1 : index
    %c0_82 = arith.constant 0 : index
    %c0_83 = arith.constant 0 : index
    %205 = vector.load %arg9[%c1_81, %c0_82, %c0_83] : memref<2x64x32xf32, #tpu.memory_space<vmem>>, vector<1x64x32xf32>
    %206 = vector.shape_cast %205 : vector<1x64x32xf32> to vector<64x32xf32>
    %207 = vector.extract_strided_slice %202 {offsets = [0, 0], sizes = [1, 32], strides = [1, 1]} : vector<8x128xf32> to vector<1x32xf32>
    %208 = vector.extract_strided_slice %202 {offsets = [1, 0], sizes = [1, 32], strides = [1, 1]} : vector<8x128xf32> to vector<1x32xf32>
    %209 = vector.extract_strided_slice %202 {offsets = [2, 0], sizes = [1, 32], strides = [1, 1]} : vector<8x128xf32> to vector<1x32xf32>
    %210 = vector.extract_strided_slice %202 {offsets = [3, 0], sizes = [1, 32], strides = [1, 1]} : vector<8x128xf32> to vector<1x32xf32>
    %211 = vector.extract_strided_slice %202 {offsets = [4, 0], sizes = [1, 96], strides = [1, 1]} : vector<8x128xf32> to vector<1x96xf32>
    %212 = vector.extract_strided_slice %202 {offsets = [5, 0], sizes = [1, 32], strides = [1, 1]} : vector<8x128xf32> to vector<1x32xf32>
    %213 = vector.extract_strided_slice %202 {offsets = [6, 0], sizes = [1, 64], strides = [1, 1]} : vector<8x128xf32> to vector<1x64xf32>
    %214 = vector.extract_strided_slice %202 {offsets = [7, 0], sizes = [1, 32], strides = [1, 1]} : vector<8x128xf32> to vector<1x32xf32>
    %cst_84 = arith.constant dense<0.000000e+00> : vector<10xf32>
    %215 = vector.multi_reduction <add>, %198, %cst_84 [1] : vector<10x32xf32> to vector<10xf32>
    %216 = vector.shape_cast %215 : vector<10xf32> to vector<10x1xf32>
    %cst_85 = arith.constant 3.200000e+01 : f32
    %217 = vector.broadcast %cst_85 : f32 to vector<10x1xf32>
    %218 = arith.divf %216, %217 : vector<10x1xf32>
    %219 = vector.broadcast %218 : vector<10x1xf32> to vector<10x32xf32>
    %220 = arith.subf %198, %219 : vector<10x32xf32>
    %221 = arith.mulf %220, %220 : vector<10x32xf32>
    %cst_86 = arith.constant dense<0.000000e+00> : vector<10xf32>
    %222 = vector.multi_reduction <add>, %221, %cst_86 [1] : vector<10x32xf32> to vector<10xf32>
    %223 = vector.shape_cast %222 : vector<10xf32> to vector<10x1xf32>
    %cst_87 = arith.constant 3.200000e+01 : f32
    %224 = vector.broadcast %cst_87 : f32 to vector<10x1xf32>
    %225 = arith.divf %223, %224 : vector<10x1xf32>
    %cst_88 = arith.constant 9.99999997E-7 : f32
    %226 = vector.broadcast %cst_88 : f32 to vector<10x1xf32>
    %227 = arith.addf %225, %226 : vector<10x1xf32>
    %228 = math.rsqrt %227 : vector<10x1xf32>
    %229 = vector.broadcast %228 : vector<10x1xf32> to vector<10x32xf32>
    %230 = arith.mulf %220, %229 : vector<10x32xf32>
    %231 = vector.broadcast %207 : vector<1x32xf32> to vector<10x32xf32>
    %232 = arith.mulf %230, %231 : vector<10x32xf32>
    %233 = vector.broadcast %208 : vector<1x32xf32> to vector<10x32xf32>
    %234 = arith.addf %232, %233 : vector<10x32xf32>
    %235 = vector.extract_strided_slice %200 {offsets = [0, 0], sizes = [32, 96], strides = [1, 1]} : vector<32x128xf32> to vector<32x96xf32>
    %cst_89 = arith.constant dense<0.000000e+00> : vector<10x96xf32>
    %236 = tpu.matmul %234, %235, %cst_89 {dimension_numbers = #tpu.dot_dimension_numbers<[1], [0], [0], [1], [0, 0, 1, 1], [], []>} : vector<10x32xf32>, vector<32x96xf32>, vector<10x96xf32> -> vector<10x96xf32>
    %237 = vector.broadcast %211 : vector<1x96xf32> to vector<10x96xf32>
    %238 = arith.addf %236, %237 : vector<10x96xf32>
    %239 = vector.extract_strided_slice %200 {offsets = [0, 96], sizes = [32, 32], strides = [1, 1]} : vector<32x128xf32> to vector<32x32xf32>
    %cst_90 = arith.constant 0.000000e+00 : f32
    %240 = vector.broadcast %cst_90 : f32 to vector<10x32xf32>
    %241 = vector.extract_strided_slice %238 {offsets = [0, 0], sizes = [10, 8], strides = [1, 1]} : vector<10x96xf32> to vector<10x8xf32>
    %242 = vector.extract_strided_slice %238 {offsets = [0, 32], sizes = [10, 8], strides = [1, 1]} : vector<10x96xf32> to vector<10x8xf32>
    %243 = vector.extract_strided_slice %238 {offsets = [0, 64], sizes = [10, 8], strides = [1, 1]} : vector<10x96xf32> to vector<10x8xf32>
    %cst_91 = arith.constant dense<0.000000e+00> : vector<10x10xf32>
    %244 = tpu.matmul %241, %242, %cst_91 {dimension_numbers = #tpu.dot_dimension_numbers<[1], [1], [0], [0], [0, 0, 1, 0], [], []>} : vector<10x8xf32>, vector<10x8xf32>, vector<10x10xf32> -> vector<10x10xf32>
    %cst_92 = arith.constant 0.353553385 : f32
    %245 = vector.broadcast %cst_92 : f32 to vector<10x10xf32>
    %246 = arith.mulf %244, %245 : vector<10x10xf32>
    %247 = arith.addf %246, %5 : vector<10x10xf32>
    %cst_93 = arith.constant dense<0xFF800000> : vector<10xf32>
    %248 = vector.multi_reduction <maximumf>, %247, %cst_93 [1] : vector<10x10xf32> to vector<10xf32>
    %249 = vector.shape_cast %248 : vector<10xf32> to vector<10x1xf32>
    %250 = vector.broadcast %249 : vector<10x1xf32> to vector<10x10xf32>
    %251 = arith.subf %247, %250 : vector<10x10xf32>
    %252 = math.exp %251 : vector<10x10xf32>
    %cst_94 = arith.constant dense<0.000000e+00> : vector<10xf32>
    %253 = vector.multi_reduction <add>, %252, %cst_94 [1] : vector<10x10xf32> to vector<10xf32>
    %254 = vector.shape_cast %253 : vector<10xf32> to vector<10x1xf32>
    %255 = vector.broadcast %254 : vector<10x1xf32> to vector<10x10xf32>
    %256 = arith.divf %252, %255 : vector<10x10xf32>
    %cst_95 = arith.constant dense<0.000000e+00> : vector<10x8xf32>
    %257 = tpu.matmul %256, %243, %cst_95 {dimension_numbers = #tpu.dot_dimension_numbers<[1], [0], [0], [1], [0, 0, 1, 1], [], []>} : vector<10x10xf32>, vector<10x8xf32>, vector<10x8xf32> -> vector<10x8xf32>
    %258 = vector.extract_strided_slice %239 {offsets = [0, 0], sizes = [8, 32], strides = [1, 1]} : vector<32x32xf32> to vector<8x32xf32>
    %cst_96 = arith.constant dense<0.000000e+00> : vector<10x32xf32>
    %259 = tpu.matmul %257, %258, %cst_96 {dimension_numbers = #tpu.dot_dimension_numbers<[1], [0], [0], [1], [0, 0, 1, 1], [], []>} : vector<10x8xf32>, vector<8x32xf32>, vector<10x32xf32> -> vector<10x32xf32>
    %260 = arith.addf %240, %259 : vector<10x32xf32>
    %261 = vector.extract_strided_slice %238 {offsets = [0, 8], sizes = [10, 8], strides = [1, 1]} : vector<10x96xf32> to vector<10x8xf32>
    %262 = vector.extract_strided_slice %238 {offsets = [0, 40], sizes = [10, 8], strides = [1, 1]} : vector<10x96xf32> to vector<10x8xf32>
    %263 = vector.extract_strided_slice %238 {offsets = [0, 72], sizes = [10, 8], strides = [1, 1]} : vector<10x96xf32> to vector<10x8xf32>
    %cst_97 = arith.constant dense<0.000000e+00> : vector<10x10xf32>
    %264 = tpu.matmul %261, %262, %cst_97 {dimension_numbers = #tpu.dot_dimension_numbers<[1], [1], [0], [0], [0, 0, 1, 0], [], []>} : vector<10x8xf32>, vector<10x8xf32>, vector<10x10xf32> -> vector<10x10xf32>
    %cst_98 = arith.constant 0.353553385 : f32
    %265 = vector.broadcast %cst_98 : f32 to vector<10x10xf32>
    %266 = arith.mulf %264, %265 : vector<10x10xf32>
    %267 = arith.addf %266, %5 : vector<10x10xf32>
    %cst_99 = arith.constant dense<0xFF800000> : vector<10xf32>
    %268 = vector.multi_reduction <maximumf>, %267, %cst_99 [1] : vector<10x10xf32> to vector<10xf32>
    %269 = vector.shape_cast %268 : vector<10xf32> to vector<10x1xf32>
    %270 = vector.broadcast %269 : vector<10x1xf32> to vector<10x10xf32>
    %271 = arith.subf %267, %270 : vector<10x10xf32>
    %272 = math.exp %271 : vector<10x10xf32>
    %cst_100 = arith.constant dense<0.000000e+00> : vector<10xf32>
    %273 = vector.multi_reduction <add>, %272, %cst_100 [1] : vector<10x10xf32> to vector<10xf32>
    %274 = vector.shape_cast %273 : vector<10xf32> to vector<10x1xf32>
    %275 = vector.broadcast %274 : vector<10x1xf32> to vector<10x10xf32>
    %276 = arith.divf %272, %275 : vector<10x10xf32>
    %cst_101 = arith.constant dense<0.000000e+00> : vector<10x8xf32>
    %277 = tpu.matmul %276, %263, %cst_101 {dimension_numbers = #tpu.dot_dimension_numbers<[1], [0], [0], [1], [0, 0, 1, 1], [], []>} : vector<10x10xf32>, vector<10x8xf32>, vector<10x8xf32> -> vector<10x8xf32>
    %278 = vector.extract_strided_slice %239 {offsets = [8, 0], sizes = [8, 32], strides = [1, 1]} : vector<32x32xf32> to vector<8x32xf32>
    %cst_102 = arith.constant dense<0.000000e+00> : vector<10x32xf32>
    %279 = tpu.matmul %277, %278, %cst_102 {dimension_numbers = #tpu.dot_dimension_numbers<[1], [0], [0], [1], [0, 0, 1, 1], [], []>} : vector<10x8xf32>, vector<8x32xf32>, vector<10x32xf32> -> vector<10x32xf32>
    %280 = arith.addf %260, %279 : vector<10x32xf32>
    %281 = vector.extract_strided_slice %238 {offsets = [0, 16], sizes = [10, 8], strides = [1, 1]} : vector<10x96xf32> to vector<10x8xf32>
    %282 = vector.extract_strided_slice %238 {offsets = [0, 48], sizes = [10, 8], strides = [1, 1]} : vector<10x96xf32> to vector<10x8xf32>
    %283 = vector.extract_strided_slice %238 {offsets = [0, 80], sizes = [10, 8], strides = [1, 1]} : vector<10x96xf32> to vector<10x8xf32>
    %cst_103 = arith.constant dense<0.000000e+00> : vector<10x10xf32>
    %284 = tpu.matmul %281, %282, %cst_103 {dimension_numbers = #tpu.dot_dimension_numbers<[1], [1], [0], [0], [0, 0, 1, 0], [], []>} : vector<10x8xf32>, vector<10x8xf32>, vector<10x10xf32> -> vector<10x10xf32>
    %cst_104 = arith.constant 0.353553385 : f32
    %285 = vector.broadcast %cst_104 : f32 to vector<10x10xf32>
    %286 = arith.mulf %284, %285 : vector<10x10xf32>
    %287 = arith.addf %286, %5 : vector<10x10xf32>
    %cst_105 = arith.constant dense<0xFF800000> : vector<10xf32>
    %288 = vector.multi_reduction <maximumf>, %287, %cst_105 [1] : vector<10x10xf32> to vector<10xf32>
    %289 = vector.shape_cast %288 : vector<10xf32> to vector<10x1xf32>
    %290 = vector.broadcast %289 : vector<10x1xf32> to vector<10x10xf32>
    %291 = arith.subf %287, %290 : vector<10x10xf32>
    %292 = math.exp %291 : vector<10x10xf32>
    %cst_106 = arith.constant dense<0.000000e+00> : vector<10xf32>
    %293 = vector.multi_reduction <add>, %292, %cst_106 [1] : vector<10x10xf32> to vector<10xf32>
    %294 = vector.shape_cast %293 : vector<10xf32> to vector<10x1xf32>
    %295 = vector.broadcast %294 : vector<10x1xf32> to vector<10x10xf32>
    %296 = arith.divf %292, %295 : vector<10x10xf32>
    %cst_107 = arith.constant dense<0.000000e+00> : vector<10x8xf32>
    %297 = tpu.matmul %296, %283, %cst_107 {dimension_numbers = #tpu.dot_dimension_numbers<[1], [0], [0], [1], [0, 0, 1, 1], [], []>} : vector<10x10xf32>, vector<10x8xf32>, vector<10x8xf32> -> vector<10x8xf32>
    %298 = vector.extract_strided_slice %239 {offsets = [16, 0], sizes = [8, 32], strides = [1, 1]} : vector<32x32xf32> to vector<8x32xf32>
    %cst_108 = arith.constant dense<0.000000e+00> : vector<10x32xf32>
    %299 = tpu.matmul %297, %298, %cst_108 {dimension_numbers = #tpu.dot_dimension_numbers<[1], [0], [0], [1], [0, 0, 1, 1], [], []>} : vector<10x8xf32>, vector<8x32xf32>, vector<10x32xf32> -> vector<10x32xf32>
    %300 = arith.addf %280, %299 : vector<10x32xf32>
    %301 = vector.extract_strided_slice %238 {offsets = [0, 24], sizes = [10, 8], strides = [1, 1]} : vector<10x96xf32> to vector<10x8xf32>
    %302 = vector.extract_strided_slice %238 {offsets = [0, 56], sizes = [10, 8], strides = [1, 1]} : vector<10x96xf32> to vector<10x8xf32>
    %303 = vector.extract_strided_slice %238 {offsets = [0, 88], sizes = [10, 8], strides = [1, 1]} : vector<10x96xf32> to vector<10x8xf32>
    %cst_109 = arith.constant dense<0.000000e+00> : vector<10x10xf32>
    %304 = tpu.matmul %301, %302, %cst_109 {dimension_numbers = #tpu.dot_dimension_numbers<[1], [1], [0], [0], [0, 0, 1, 0], [], []>} : vector<10x8xf32>, vector<10x8xf32>, vector<10x10xf32> -> vector<10x10xf32>
    %cst_110 = arith.constant 0.353553385 : f32
    %305 = vector.broadcast %cst_110 : f32 to vector<10x10xf32>
    %306 = arith.mulf %304, %305 : vector<10x10xf32>
    %307 = arith.addf %306, %5 : vector<10x10xf32>
    %cst_111 = arith.constant dense<0xFF800000> : vector<10xf32>
    %308 = vector.multi_reduction <maximumf>, %307, %cst_111 [1] : vector<10x10xf32> to vector<10xf32>
    %309 = vector.shape_cast %308 : vector<10xf32> to vector<10x1xf32>
    %310 = vector.broadcast %309 : vector<10x1xf32> to vector<10x10xf32>
    %311 = arith.subf %307, %310 : vector<10x10xf32>
    %312 = math.exp %311 : vector<10x10xf32>
    %cst_112 = arith.constant dense<0.000000e+00> : vector<10xf32>
    %313 = vector.multi_reduction <add>, %312, %cst_112 [1] : vector<10x10xf32> to vector<10xf32>
    %314 = vector.shape_cast %313 : vector<10xf32> to vector<10x1xf32>
    %315 = vector.broadcast %314 : vector<10x1xf32> to vector<10x10xf32>
    %316 = arith.divf %312, %315 : vector<10x10xf32>
    %cst_113 = arith.constant dense<0.000000e+00> : vector<10x8xf32>
    %317 = tpu.matmul %316, %303, %cst_113 {dimension_numbers = #tpu.dot_dimension_numbers<[1], [0], [0], [1], [0, 0, 1, 1], [], []>} : vector<10x10xf32>, vector<10x8xf32>, vector<10x8xf32> -> vector<10x8xf32>
    %318 = vector.extract_strided_slice %239 {offsets = [24, 0], sizes = [8, 32], strides = [1, 1]} : vector<32x32xf32> to vector<8x32xf32>
    %cst_114 = arith.constant dense<0.000000e+00> : vector<10x32xf32>
    %319 = tpu.matmul %317, %318, %cst_114 {dimension_numbers = #tpu.dot_dimension_numbers<[1], [0], [0], [1], [0, 0, 1, 1], [], []>} : vector<10x8xf32>, vector<8x32xf32>, vector<10x32xf32> -> vector<10x32xf32>
    %320 = arith.addf %300, %319 : vector<10x32xf32>
    %321 = arith.addf %198, %320 : vector<10x32xf32>
    %322 = vector.broadcast %212 : vector<1x32xf32> to vector<10x32xf32>
    %323 = arith.addf %321, %322 : vector<10x32xf32>
    %cst_115 = arith.constant dense<0.000000e+00> : vector<10xf32>
    %324 = vector.multi_reduction <add>, %323, %cst_115 [1] : vector<10x32xf32> to vector<10xf32>
    %325 = vector.shape_cast %324 : vector<10xf32> to vector<10x1xf32>
    %cst_116 = arith.constant 3.200000e+01 : f32
    %326 = vector.broadcast %cst_116 : f32 to vector<10x1xf32>
    %327 = arith.divf %325, %326 : vector<10x1xf32>
    %328 = vector.broadcast %327 : vector<10x1xf32> to vector<10x32xf32>
    %329 = arith.subf %323, %328 : vector<10x32xf32>
    %330 = arith.mulf %329, %329 : vector<10x32xf32>
    %cst_117 = arith.constant dense<0.000000e+00> : vector<10xf32>
    %331 = vector.multi_reduction <add>, %330, %cst_117 [1] : vector<10x32xf32> to vector<10xf32>
    %332 = vector.shape_cast %331 : vector<10xf32> to vector<10x1xf32>
    %cst_118 = arith.constant 3.200000e+01 : f32
    %333 = vector.broadcast %cst_118 : f32 to vector<10x1xf32>
    %334 = arith.divf %332, %333 : vector<10x1xf32>
    %cst_119 = arith.constant 9.99999997E-7 : f32
    %335 = vector.broadcast %cst_119 : f32 to vector<10x1xf32>
    %336 = arith.addf %334, %335 : vector<10x1xf32>
    %337 = math.rsqrt %336 : vector<10x1xf32>
    %338 = vector.broadcast %337 : vector<10x1xf32> to vector<10x32xf32>
    %339 = arith.mulf %329, %338 : vector<10x32xf32>
    %340 = vector.broadcast %209 : vector<1x32xf32> to vector<10x32xf32>
    %341 = arith.mulf %339, %340 : vector<10x32xf32>
    %342 = vector.broadcast %210 : vector<1x32xf32> to vector<10x32xf32>
    %343 = arith.addf %341, %342 : vector<10x32xf32>
    %cst_120 = arith.constant dense<0.000000e+00> : vector<10x64xf32>
    %344 = tpu.matmul %343, %204, %cst_120 {dimension_numbers = #tpu.dot_dimension_numbers<[1], [0], [0], [1], [0, 0, 1, 1], [], []>} : vector<10x32xf32>, vector<32x64xf32>, vector<10x64xf32> -> vector<10x64xf32>
    %345 = vector.broadcast %213 : vector<1x64xf32> to vector<10x64xf32>
    %346 = arith.addf %344, %345 : vector<10x64xf32>
    %cst_121 = arith.constant 5.000000e-01 : f32
    %347 = vector.broadcast %cst_121 : f32 to vector<10x64xf32>
    %348 = arith.mulf %347, %346 : vector<10x64xf32>
    %cst_122 = arith.constant 0.707106769 : f32
    %349 = vector.broadcast %cst_122 : f32 to vector<10x64xf32>
    %350 = arith.mulf %346, %349 : vector<10x64xf32>
    %cst_123 = arith.constant 0.000000e+00 : f32
    %351 = vector.broadcast %cst_123 : f32 to vector<10x64xf32>
    %352 = arith.cmpf oge, %350, %351 : vector<10x64xf32>
    %cst_124 = arith.constant 1.000000e+00 : f32
    %cst_125 = arith.constant -1.000000e+00 : f32
    %353 = vector.broadcast %cst_124 : f32 to vector<10x64xf32>
    %354 = vector.broadcast %cst_125 : f32 to vector<10x64xf32>
    %355 = arith.select %352, %353, %354 : vector<10x64xi1>, vector<10x64xf32>
    %356 = math.absf %350 : vector<10x64xf32>
    %cst_126 = arith.constant 0.327591091 : f32
    %357 = vector.broadcast %cst_126 : f32 to vector<10x64xf32>
    %358 = arith.mulf %357, %356 : vector<10x64xf32>
    %cst_127 = arith.constant 1.000000e+00 : f32
    %359 = vector.broadcast %cst_127 : f32 to vector<10x64xf32>
    %360 = arith.addf %359, %358 : vector<10x64xf32>
    %cst_128 = arith.constant 1.000000e+00 : f32
    %361 = vector.broadcast %cst_128 : f32 to vector<10x64xf32>
    %362 = arith.divf %361, %360 : vector<10x64xf32>
    %cst_129 = arith.constant 1.06140542 : f32
    %363 = vector.broadcast %cst_129 : f32 to vector<10x64xf32>
    %364 = arith.mulf %363, %362 : vector<10x64xf32>
    %cst_130 = arith.constant -1.45315206 : f32
    %365 = vector.broadcast %cst_130 : f32 to vector<10x64xf32>
    %366 = arith.addf %364, %365 : vector<10x64xf32>
    %367 = arith.mulf %366, %362 : vector<10x64xf32>
    %cst_131 = arith.constant 1.42141378 : f32
    %368 = vector.broadcast %cst_131 : f32 to vector<10x64xf32>
    %369 = arith.addf %367, %368 : vector<10x64xf32>
    %370 = arith.mulf %369, %362 : vector<10x64xf32>
    %cst_132 = arith.constant -0.284496725 : f32
    %371 = vector.broadcast %cst_132 : f32 to vector<10x64xf32>
    %372 = arith.addf %370, %371 : vector<10x64xf32>
    %373 = arith.mulf %372, %362 : vector<10x64xf32>
    %cst_133 = arith.constant 0.254829586 : f32
    %374 = vector.broadcast %cst_133 : f32 to vector<10x64xf32>
    %375 = arith.addf %373, %374 : vector<10x64xf32>
    %376 = arith.mulf %375, %362 : vector<10x64xf32>
    %cst_134 = arith.constant 0.000000e+00 : f32
    %377 = vector.broadcast %cst_134 : f32 to vector<10x64xf32>
    %378 = arith.subf %377, %356 : vector<10x64xf32>
    %379 = arith.mulf %378, %356 : vector<10x64xf32>
    %380 = math.exp %379 : vector<10x64xf32>
    %381 = arith.mulf %376, %380 : vector<10x64xf32>
    %cst_135 = arith.constant 1.000000e+00 : f32
    %382 = vector.broadcast %cst_135 : f32 to vector<10x64xf32>
    %383 = arith.subf %382, %381 : vector<10x64xf32>
    %384 = arith.mulf %355, %383 : vector<10x64xf32>
    %cst_136 = arith.constant 1.000000e+00 : f32
    %385 = vector.broadcast %cst_136 : f32 to vector<10x64xf32>
    %386 = arith.addf %385, %384 : vector<10x64xf32>
    %387 = arith.mulf %348, %386 : vector<10x64xf32>
    %cst_137 = arith.constant dense<0.000000e+00> : vector<10x32xf32>
    %388 = tpu.matmul %387, %206, %cst_137 {dimension_numbers = #tpu.dot_dimension_numbers<[1], [0], [0], [1], [0, 0, 1, 1], [], []>} : vector<10x64xf32>, vector<64x32xf32>, vector<10x32xf32> -> vector<10x32xf32>
    %389 = arith.addf %323, %388 : vector<10x32xf32>
    %390 = vector.broadcast %214 : vector<1x32xf32> to vector<10x32xf32>
    %391 = arith.addf %389, %390 : vector<10x32xf32>
    %c0_138 = arith.constant 0 : index
    %c0_139 = arith.constant 0 : index
    %392 = vector.load %arg12[%c0_138, %c0_139] : memref<8x32xf32, #tpu.memory_space<vmem>>, vector<8x32xf32>
    %393 = vector.extract_strided_slice %392 {offsets = [0, 0], sizes = [1, 32], strides = [1, 1]} : vector<8x32xf32> to vector<1x32xf32>
    %394 = vector.extract_strided_slice %392 {offsets = [1, 0], sizes = [1, 32], strides = [1, 1]} : vector<8x32xf32> to vector<1x32xf32>
    %395 = vector.extract_strided_slice %392 {offsets = [2, 0], sizes = [1, 6], strides = [1, 1]} : vector<8x32xf32> to vector<1x6xf32>
    %396 = vector.extract_strided_slice %392 {offsets = [3, 0], sizes = [1, 6], strides = [1, 1]} : vector<8x32xf32> to vector<1x6xf32>
    %397 = vector.extract_strided_slice %392 {offsets = [4, 0], sizes = [1, 10], strides = [1, 1]} : vector<8x32xf32> to vector<1x10xf32>
    %398 = vector.extract_strided_slice %392 {offsets = [5, 0], sizes = [1, 10], strides = [1, 1]} : vector<8x32xf32> to vector<1x10xf32>
    %399 = vector.extract_strided_slice %392 {offsets = [6, 0], sizes = [1, 10], strides = [1, 1]} : vector<8x32xf32> to vector<1x10xf32>
    %400 = vector.extract_strided_slice %392 {offsets = [7, 0], sizes = [1, 10], strides = [1, 1]} : vector<8x32xf32> to vector<1x10xf32>
    %401 = vector.extract_strided_slice %391 {offsets = [0, 0], sizes = [2, 32], strides = [1, 1]} : vector<10x32xf32> to vector<2x32xf32>
    %cst_140 = arith.constant dense<0.000000e+00> : vector<2xf32>
    %402 = vector.multi_reduction <add>, %401, %cst_140 [1] : vector<2x32xf32> to vector<2xf32>
    %403 = vector.shape_cast %402 : vector<2xf32> to vector<2x1xf32>
    %cst_141 = arith.constant 3.200000e+01 : f32
    %404 = vector.broadcast %cst_141 : f32 to vector<2x1xf32>
    %405 = arith.divf %403, %404 : vector<2x1xf32>
    %406 = vector.broadcast %405 : vector<2x1xf32> to vector<2x32xf32>
    %407 = arith.subf %401, %406 : vector<2x32xf32>
    %408 = arith.mulf %407, %407 : vector<2x32xf32>
    %cst_142 = arith.constant dense<0.000000e+00> : vector<2xf32>
    %409 = vector.multi_reduction <add>, %408, %cst_142 [1] : vector<2x32xf32> to vector<2xf32>
    %410 = vector.shape_cast %409 : vector<2xf32> to vector<2x1xf32>
    %cst_143 = arith.constant 3.200000e+01 : f32
    %411 = vector.broadcast %cst_143 : f32 to vector<2x1xf32>
    %412 = arith.divf %410, %411 : vector<2x1xf32>
    %cst_144 = arith.constant 9.99999997E-7 : f32
    %413 = vector.broadcast %cst_144 : f32 to vector<2x1xf32>
    %414 = arith.addf %412, %413 : vector<2x1xf32>
    %415 = math.rsqrt %414 : vector<2x1xf32>
    %416 = vector.broadcast %415 : vector<2x1xf32> to vector<2x32xf32>
    %417 = arith.mulf %407, %416 : vector<2x32xf32>
    %418 = vector.broadcast %393 : vector<1x32xf32> to vector<2x32xf32>
    %419 = arith.mulf %417, %418 : vector<2x32xf32>
    %420 = vector.broadcast %394 : vector<1x32xf32> to vector<2x32xf32>
    %421 = arith.addf %419, %420 : vector<2x32xf32>
    %c0_145 = arith.constant 0 : index
    %c0_146 = arith.constant 0 : index
    %422 = vector.load %arg2[%c0_145, %c0_146] : memref<2x6xf32, #tpu.memory_space<vmem>>, vector<2x6xf32>
    %cst_147 = arith.constant dense<0.000000e+00> : vector<6xf32>
    %423 = vector.multi_reduction <add>, %422, %cst_147 [0] : vector<2x6xf32> to vector<6xf32>
    %424 = vector.shape_cast %423 : vector<6xf32> to vector<1x6xf32>
    %cst_148 = arith.constant 2.000000e+00 : f32
    %425 = vector.broadcast %cst_148 : f32 to vector<1x6xf32>
    %426 = arith.divf %424, %425 : vector<1x6xf32>
    %427 = vector.broadcast %426 : vector<1x6xf32> to vector<2x6xf32>
    %428 = arith.subf %422, %427 : vector<2x6xf32>
    %429 = arith.mulf %428, %428 : vector<2x6xf32>
    %cst_149 = arith.constant dense<0.000000e+00> : vector<6xf32>
    %430 = vector.multi_reduction <add>, %429, %cst_149 [0] : vector<2x6xf32> to vector<6xf32>
    %431 = vector.shape_cast %430 : vector<6xf32> to vector<1x6xf32>
    %cst_150 = arith.constant 2.000000e+00 : f32
    %432 = vector.broadcast %cst_150 : f32 to vector<1x6xf32>
    %433 = arith.divf %431, %432 : vector<1x6xf32>
    %cst_151 = arith.constant 9.99999974E-6 : f32
    %434 = vector.broadcast %cst_151 : f32 to vector<1x6xf32>
    %435 = arith.addf %433, %434 : vector<1x6xf32>
    %436 = math.rsqrt %435 : vector<1x6xf32>
    %437 = vector.broadcast %436 : vector<1x6xf32> to vector<2x6xf32>
    %438 = arith.mulf %428, %437 : vector<2x6xf32>
    %439 = vector.broadcast %395 : vector<1x6xf32> to vector<2x6xf32>
    %440 = arith.mulf %438, %439 : vector<2x6xf32>
    %441 = vector.broadcast %396 : vector<1x6xf32> to vector<2x6xf32>
    %442 = arith.addf %440, %441 : vector<2x6xf32>
    %c0_152 = arith.constant 0 : index
    %c0_153 = arith.constant 0 : index
    %443 = vector.load %arg10[%c0_152, %c0_153] : memref<38x10xf32, #tpu.memory_space<vmem>>, vector<38x10xf32>
    %444 = vector.extract_strided_slice %443 {offsets = [0, 0], sizes = [32, 10], strides = [1, 1]} : vector<38x10xf32> to vector<32x10xf32>
    %cst_154 = arith.constant dense<0.000000e+00> : vector<2x10xf32>
    %445 = tpu.matmul %421, %444, %cst_154 {dimension_numbers = #tpu.dot_dimension_numbers<[1], [0], [0], [1], [0, 0, 1, 1], [], []>} : vector<2x32xf32>, vector<32x10xf32>, vector<2x10xf32> -> vector<2x10xf32>
    %446 = vector.extract_strided_slice %443 {offsets = [32, 0], sizes = [6, 10], strides = [1, 1]} : vector<38x10xf32> to vector<6x10xf32>
    %cst_155 = arith.constant dense<0.000000e+00> : vector<2x10xf32>
    %447 = tpu.matmul %442, %446, %cst_155 {dimension_numbers = #tpu.dot_dimension_numbers<[1], [0], [0], [1], [0, 0, 1, 1], [], []>} : vector<2x6xf32>, vector<6x10xf32>, vector<2x10xf32> -> vector<2x10xf32>
    %448 = arith.addf %445, %447 : vector<2x10xf32>
    %449 = vector.broadcast %397 : vector<1x10xf32> to vector<2x10xf32>
    %450 = arith.addf %448, %449 : vector<2x10xf32>
    %cst_156 = arith.constant 0.000000e+00 : f32
    %451 = vector.broadcast %cst_156 : f32 to vector<2x10xf32>
    %452 = arith.maximumf %450, %451 : vector<2x10xf32>
    %cst_157 = arith.constant dense<0.000000e+00> : vector<10xf32>
    %453 = vector.multi_reduction <add>, %452, %cst_157 [0] : vector<2x10xf32> to vector<10xf32>
    %454 = vector.shape_cast %453 : vector<10xf32> to vector<1x10xf32>
    %cst_158 = arith.constant 2.000000e+00 : f32
    %455 = vector.broadcast %cst_158 : f32 to vector<1x10xf32>
    %456 = arith.divf %454, %455 : vector<1x10xf32>
    %457 = vector.broadcast %456 : vector<1x10xf32> to vector<2x10xf32>
    %458 = arith.subf %452, %457 : vector<2x10xf32>
    %459 = arith.mulf %458, %458 : vector<2x10xf32>
    %cst_159 = arith.constant dense<0.000000e+00> : vector<10xf32>
    %460 = vector.multi_reduction <add>, %459, %cst_159 [0] : vector<2x10xf32> to vector<10xf32>
    %461 = vector.shape_cast %460 : vector<10xf32> to vector<1x10xf32>
    %cst_160 = arith.constant 2.000000e+00 : f32
    %462 = vector.broadcast %cst_160 : f32 to vector<1x10xf32>
    %463 = arith.divf %461, %462 : vector<1x10xf32>
    %cst_161 = arith.constant 9.99999974E-6 : f32
    %464 = vector.broadcast %cst_161 : f32 to vector<1x10xf32>
    %465 = arith.addf %463, %464 : vector<1x10xf32>
    %466 = math.rsqrt %465 : vector<1x10xf32>
    %467 = vector.broadcast %466 : vector<1x10xf32> to vector<2x10xf32>
    %468 = arith.mulf %458, %467 : vector<2x10xf32>
    %469 = vector.broadcast %398 : vector<1x10xf32> to vector<2x10xf32>
    %470 = arith.mulf %468, %469 : vector<2x10xf32>
    %471 = vector.broadcast %399 : vector<1x10xf32> to vector<2x10xf32>
    %472 = arith.addf %470, %471 : vector<2x10xf32>
    %c0_162 = arith.constant 0 : index
    %c0_163 = arith.constant 0 : index
    %473 = vector.load %arg11[%c0_162, %c0_163] : memref<10x10xf32, #tpu.memory_space<vmem>>, vector<10x10xf32>
    %cst_164 = arith.constant dense<0.000000e+00> : vector<2x10xf32>
    %474 = tpu.matmul %472, %473, %cst_164 {dimension_numbers = #tpu.dot_dimension_numbers<[1], [0], [0], [1], [0, 0, 1, 1], [], []>} : vector<2x10xf32>, vector<10x10xf32>, vector<2x10xf32> -> vector<2x10xf32>
    %475 = vector.broadcast %400 : vector<1x10xf32> to vector<2x10xf32>
    %476 = arith.addf %474, %475 : vector<2x10xf32>
    %c0_165 = arith.constant 0 : index
    %c0_166 = arith.constant 0 : index
    %477 = vector.load %arg13[%c0_165, %c0_166] : memref<2x10xf32, #tpu.memory_space<vmem>>, vector<2x10xf32>
    tpu.vector_store %arg13[%c0_165, %c0_166], %476 {strides = array<i32>} : memref<2x10xf32, #tpu.memory_space<vmem>>, vector<2x10xf32>,
    return
  }
  func.func @transform_0(%arg0: i32) -> (i32, i32) {
    %c0_i32 = arith.constant 0 : i32
    %c0_i32_0 = arith.constant 0 : i32
    %c0_i32_1 = arith.constant 0 : i32
    return %c0_i32, %c0_i32_0 : i32, i32
  }
  func.func @transform_1(%arg0: i32) -> (i32, i32) {
    %c0_i32 = arith.constant 0 : i32
    %c0_i32_0 = arith.constant 0 : i32
    %c0_i32_1 = arith.constant 0 : i32
    return %c0_i32, %c0_i32_0 : i32, i32
  }
  func.func @transform_2(%arg0: i32) -> (i32, i32) {
    %c0_i32 = arith.constant 0 : i32
    %c0_i32_0 = arith.constant 0 : i32
    %c0_i32_1 = arith.constant 0 : i32
    return %c0_i32, %c0_i32_0 : i32, i32
  }
  func.func @transform_3(%arg0: i32) -> (i32, i32) {
    %c0_i32 = arith.constant 0 : i32
    %c0_i32_0 = arith.constant 0 : i32
    %c0_i32_1 = arith.constant 0 : i32
    return %c0_i32, %c0_i32_0 : i32, i32
  }
  func.func @transform_4(%arg0: i32) -> (i32, i32) {
    %c0_i32 = arith.constant 0 : i32
    %c0_i32_0 = arith.constant 0 : i32
    %c0_i32_1 = arith.constant 0 : i32
    return %c0_i32, %c0_i32_0 : i32, i32
  }
  func.func @transform_5(%arg0: i32) -> (i32, i32, i32) {
    %c0_i32 = arith.constant 0 : i32
    %c0_i32_0 = arith.constant 0 : i32
    %c0_i32_1 = arith.constant 0 : i32
    %c0_i32_2 = arith.constant 0 : i32
    return %c0_i32, %c0_i32_0, %c0_i32_1 : i32, i32, i32
  }
  func.func @transform_6(%arg0: i32) -> (i32, i32, i32) {
    %c0_i32 = arith.constant 0 : i32
    %c0_i32_0 = arith.constant 0 : i32
    %c0_i32_1 = arith.constant 0 : i32
    %c0_i32_2 = arith.constant 0 : i32
    return %c0_i32, %c0_i32_0, %c0_i32_1 : i32, i32, i32
  }
  func.func @transform_7(%arg0: i32) -> (i32, i32, i32) {
    %c0_i32 = arith.constant 0 : i32
    %c0_i32_0 = arith.constant 0 : i32
    %c0_i32_1 = arith.constant 0 : i32
    %c0_i32_2 = arith.constant 0 : i32
    return %c0_i32, %c0_i32_0, %c0_i32_1 : i32, i32, i32
  }
  func.func @transform_8(%arg0: i32) -> (i32, i32, i32) {
    %c0_i32 = arith.constant 0 : i32
    %c0_i32_0 = arith.constant 0 : i32
    %c0_i32_1 = arith.constant 0 : i32
    %c0_i32_2 = arith.constant 0 : i32
    return %c0_i32, %c0_i32_0, %c0_i32_1 : i32, i32, i32
  }
  func.func @transform_9(%arg0: i32) -> (i32, i32) {
    %c0_i32 = arith.constant 0 : i32
    %c0_i32_0 = arith.constant 0 : i32
    %c0_i32_1 = arith.constant 0 : i32
    return %c0_i32, %c0_i32_0 : i32, i32
  }
  func.func @transform_10(%arg0: i32) -> (i32, i32) {
    %c0_i32 = arith.constant 0 : i32
    %c0_i32_0 = arith.constant 0 : i32
    %c0_i32_1 = arith.constant 0 : i32
    return %c0_i32, %c0_i32_0 : i32, i32
  }
  func.func @transform_11(%arg0: i32) -> (i32, i32) {
    %c0_i32 = arith.constant 0 : i32
    %c0_i32_0 = arith.constant 0 : i32
    %c0_i32_1 = arith.constant 0 : i32
    return %c0_i32, %c0_i32_0 : i32, i32
  }
  func.func @transform_12(%arg0: i32) -> (i32, i32) {
    %c0_i32 = arith.constant 0 : i32
    %c0_i32_0 = arith.constant 0 : i32
    %c0_i32_1 = arith.constant 0 : i32
    return %c0_i32, %c0_i32_0 : i32, i32
  }
}

</mosaic_0001>

<bundles_post_ra>
// kernel: vit_forward.1
= control target key start
LH: loop header
LB: loop body
LE: loop exit
PB: predicated region body
PF: predicated region fallthrough
CT: control target
= control target key end

     0   :  { %s5417_s0 = inlined_call_operand.vmem [shape: f32[10,512], index: 0, kind: input, shape index: {}]   ;;  %s5418_s1 = inlined_call_operand.vmem [shape: f32[2,6], index: 1, kind: input, shape index: {}]   ;;  %s5419_s2 = inlined_call_operand.vmem [shape: f32[512,32], index: 2, kind: input, shape index: {}]   ;;  %s5420_s3 = inlined_call_operand.vmem [shape: f32[10,32], index: 3, kind: input, shape index: {}]   ;;  %s5421_s4 = inlined_call_operand.vmem [shape: f32[10,10], index: 4, kind: input, shape index: {}]   ;;  %s5422_s5 = inlined_call_operand.vmem [shape: f32[2,32,128], index: 5, kind: input, shape index: {}]   ;;  %s5423_s6 = inlined_call_operand.vmem [shape: f32[2,8,128], index: 6, kind: input, shape index: {}]   ;;  %s5424_s7 = inlined_call_operand.vmem [shape: f32[2,32,64], index: 7, kind: input, shape index: {}]   ;;  %s5425_s8 = inlined_call_operand.vmem [shape: f32[2,64,32], index: 8, kind: input, shape index: {}]   ;;  %s5426_s9 = inlined_call_operand.vmem [shape: f32[38,10], index: 9, kind: input, shape index: {}]   ;;  %s5427_s10 = inlined_call_operand.vmem [shape: f32[10,10], index: 10, kind: input, shape index: {}]   ;;  %s5428_s11 = inlined_call_operand.vmem [shape: f32[8,32], index: 11, kind: input, shape index: {}]   ;;  %s5429_s12 = inlined_call_operand.hbm [shape: f32[2,10], index: 12, kind: output, shape index: {}]  }
   0x1   :  { %v81_v0 = vld [vmem:[%s5419_s2 + $0xf8] sm:$0xff]  ;;  %v80_v4 = vld [vmem:[%s5419_s2 + $0xf0] sm:$0xff]  ;;  %v79_v8 = vld [vmem:[%s5419_s2 + $0xe8] sm:$0xff] }
   0x2   :  { %v113_v1 = vld [vmem:[%s5419_s2 + $0x1f8] sm:$0xff]  ;;  %3883 = vmatprep.subr.mxu0 %v81_v0  ;;  %v112_v5 = vld [vmem:[%s5419_s2 + $0x1f0] sm:$0xff]  ;;  %v111_v9 = vld [vmem:[%s5419_s2 + $0x1e8] sm:$0xff] }
   0x3   :  { %v65_v2 = vld [vmem:[%s5419_s2 + $0x78] sm:$0xff]  ;;  %3921 = vmatprep.subr.mxu1 %v113_v1  ;;  %v64_v6 = vld [vmem:[%s5419_s2 + $0x70] sm:$0xff]  ;;  %v63_v10 = vld [vmem:[%s5419_s2 + $0x68] sm:$0xff] }
   0x4   :  { %v97_v3 = vld [vmem:[%s5419_s2 + $0x178] sm:$0xff]  ;;  %3884 = vmatpush3.msra.mxu0 %v65_v2  ;;  %v96_v7 = vld [vmem:[%s5419_s2 + $0x170] sm:$0xff]  ;;  %v95_v11 = vld [vmem:[%s5419_s2 + $0x168] sm:$0xff] }
   0x5   :  { %3922 = vmatpush3.msra.mxu1 %v97_v3  ;;  %3885 = vmatprep.subr.mxu0 %v80_v4  ;;  %v78_v12 = vld [vmem:[%s5419_s2 + $0xe0] sm:$0xff]  ;;  %v77_v16 = vld [vmem:[%s5419_s2 + $0xd8] sm:$0xff]  ;;  %v76_v20 = vld [vmem:[%s5419_s2 + $0xd0] sm:$0xff] }
   0x6   :  { %3923 = vmatprep.subr.mxu1 %v112_v5  ;;  %3886 = vmatpush3.msra.mxu0 %v64_v6  ;;  %v110_v13 = vld [vmem:[%s5419_s2 + $0x1e0] sm:$0xff]  ;;  %v109_v17 = vld [vmem:[%s5419_s2 + $0x1d8] sm:$0xff]  ;;  %v108_v21 = vld [vmem:[%s5419_s2 + $0x1d0] sm:$0xff] }
   0x7   :  { %3924 = vmatpush3.msra.mxu1 %v96_v7  ;;  %3887 = vmatprep.subr.mxu0 %v79_v8  ;;  %v62_v14 = vld [vmem:[%s5419_s2 + $0x60] sm:$0xff]  ;;  %v61_v18 = vld [vmem:[%s5419_s2 + $0x58] sm:$0xff]  ;;  %v60_v22 = vld [vmem:[%s5419_s2 + $0x50] sm:$0xff] }
   0x8   :  { %3925 = vmatprep.subr.mxu1 %v111_v9  ;;  %v94_v15 = vld [vmem:[%s5419_s2 + $0x160] sm:$0xff]  ;;  %3888 = vmatpush3.msra.mxu0 %v63_v10  ;;  %v93_v19 = vld [vmem:[%s5419_s2 + $0x158] sm:$0xff]  ;;  %v92_v23 = vld [vmem:[%s5419_s2 + $0x150] sm:$0xff] }
   0x9   :  { %3926 = vmatpush3.msra.mxu1 %v95_v11  ;;  %3889 = vmatprep.subr.mxu0 %v78_v12  ;;  %v75_v24 = vld [vmem:[%s5419_s2 + $0xc8] sm:$0xff]  ;;  %v74_v28 = vld [vmem:[%s5419_s2 + $0xc0] sm:$0xff]  ;;  %v73_v32 = vld [vmem:[%s5419_s2 + $0xb8] sm:$0xff] }
   0xa   :  { %3927 = vmatprep.subr.mxu1 %v110_v13  ;;  %3890 = vmatpush3.msra.mxu0 %v62_v14  ;;  %v107_v25 = vld [vmem:[%s5419_s2 + $0x1c8] sm:$0xff]  ;;  %v106_v29 = vld [vmem:[%s5419_s2 + $0x1c0] sm:$0xff]  ;;  %v105_v33 = vld [vmem:[%s5419_s2 + $0x1b8] sm:$0xff] }
   0xb   :  { %3928 = vmatpush3.msra.mxu1 %v94_v15  ;;  %3891 = vmatprep.subr.mxu0 %v77_v16  ;;  %v59_v26 = vld [vmem:[%s5419_s2 + $0x48] sm:$0xff]  ;;  %v58_v30 = vld [vmem:[%s5419_s2 + $0x40] sm:$0xff]  ;;  %v57_v34 = vld [vmem:[%s5419_s2 + $0x38] sm:$0xff] }
   0xc   :  { %3929 = vmatprep.subr.mxu1 %v109_v17  ;;  %3892 = vmatpush3.msra.mxu0 %v61_v18  ;;  %v91_v27 = vld [vmem:[%s5419_s2 + $0x148] sm:$0xff]  ;;  %v90_v31 = vld [vmem:[%s5419_s2 + $0x140] sm:$0xff]  ;;  %v89_v35 = vld [vmem:[%s5419_s2 + $0x138] sm:$0xff] }
   0xd   :  { %3930 = vmatpush3.msra.mxu1 %v93_v19  ;;  %3893 = vmatprep.subr.mxu0 %v76_v20  ;;  %v72_v36 = vld [vmem:[%s5419_s2 + $0xb0] sm:$0xff]  ;;  %v71_v40 = vld [vmem:[%s5419_s2 + $0xa8] sm:$0xff]  ;;  %v70_v44 = vld [vmem:[%s5419_s2 + $0xa0] sm:$0xff] }
   0xe   :  { %3931 = vmatprep.subr.mxu1 %v108_v21  ;;  %3894 = vmatpush3.msra.mxu0 %v60_v22  ;;  %v104_v37 = vld [vmem:[%s5419_s2 + $0x1b0] sm:$0xff]  ;;  %v103_v41 = vld [vmem:[%s5419_s2 + $0x1a8] sm:$0xff]  ;;  %v102_v45 = vld [vmem:[%s5419_s2 + $0x1a0] sm:$0xff] }
   0xf   :  { %3932 = vmatpush3.msra.mxu1 %v92_v23  ;;  %3895 = vmatprep.subr.mxu0 %v75_v24  ;;  %v56_v38 = vld [vmem:[%s5419_s2 + $0x30] sm:$0xff]  ;;  %v55_v42 = vld [vmem:[%s5419_s2 + $0x28] sm:$0xff]  ;;  %v54_v46 = vld [vmem:[%s5419_s2 + $0x20] sm:$0xff] }
  0x10   :  { %3933 = vmatprep.subr.mxu1 %v107_v25  ;;  %3896 = vmatpush3.msra.mxu0 %v59_v26  ;;  %v88_v39 = vld [vmem:[%s5419_s2 + $0x130] sm:$0xff]  ;;  %v87_v43 = vld [vmem:[%s5419_s2 + $0x128] sm:$0xff]  ;;  %v86_v47 = vld [vmem:[%s5419_s2 + $0x120] sm:$0xff] }
  0x11   :  { %3934 = vmatpush3.msra.mxu1 %v91_v27  ;;  %3897 = vmatprep.subr.mxu0 %v74_v28  ;;  %v69_v48 = vld [vmem:[%s5419_s2 + $0x98] sm:$0xff]  ;;  %v68_v52 = vld [vmem:[%s5419_s2 + $0x90] sm:$0xff] }
  0x12   :  { %3935 = vmatprep.subr.mxu1 %v106_v29  ;;  %3898 = vmatpush3.msra.mxu0 %v58_v30  ;;  %v101_v49 = vld [vmem:[%s5419_s2 + $0x198] sm:$0xff]  ;;  %v100_v53 = vld [vmem:[%s5419_s2 + $0x190] sm:$0xff] }
  0x13   :  { %3936 = vmatpush3.msra.mxu1 %v90_v31  ;;  %3899 = vmatprep.subr.mxu0 %v73_v32  ;;  %v53_v50 = vld [vmem:[%s5419_s2 + $0x18] sm:$0xff] }
  0x14   :  { %3937 = vmatprep.subr.mxu1 %v105_v33  ;;  %3900 = vmatpush3.msra.mxu0 %v57_v34  ;;  %v85_v51 = vld [vmem:[%s5419_s2 + $0x118] sm:$0xff] }
  0x15   :  { %3938 = vmatpush3.msra.mxu1 %v89_v35  ;;  %3901 = vmatprep.subr.mxu0 %v72_v36 }
  0x16   :  { %3939 = vmatprep.subr.mxu1 %v104_v37  ;;  %3902 = vmatpush3.msra.mxu0 %v56_v38 }
  0x17   :  { %3940 = vmatpush3.msra.mxu1 %v88_v39  ;;  %3903 = vmatprep.subr.mxu0 %v71_v40 }
  0x18   :  { %3941 = vmatprep.subr.mxu1 %v103_v41  ;;  %3904 = vmatpush3.msra.mxu0 %v55_v42 }
  0x19   :  { %3942 = vmatpush3.msra.mxu1 %v87_v43  ;;  %3905 = vmatprep.subr.mxu0 %v70_v44 }
  0x1a   :  { %3943 = vmatprep.subr.mxu1 %v102_v45  ;;  %3906 = vmatpush3.msra.mxu0 %v54_v46 }
  0x1b   :  { %3944 = vmatpush3.msra.mxu1 %v86_v47 }
  0x1c   :  { %17 = vsyncpa [#allocation3], 0  ;;  %3907 = vmatprep.subr.mxu0 %v69_v48  ;;  %3945 = vmatprep.subr.mxu1 %v101_v49  ;;  %v52_v54 = vld [vmem:[%s5419_s2 + $0x10] sm:$0xff]  ;;  %v67_v56 = vld [vmem:[%s5419_s2 + $0x88] sm:$0xff]  ;;  %vm285_vm0 = vcmask 261120   ;;  %vm289_vm1 = vcmask 254976   ;;  %v314_v47 = vlaneseq }
  0x1d   :  { %v84_v55 = vld [vmem:[%s5419_s2 + $0x110] sm:$0xff]  ;;  %3908 = vmatpush3.msra.mxu0 %v53_v50  ;;  %3946 = vmatpush3.msra.mxu1 %v85_v51  ;;  %v99_v57 = vld [vmem:[%s5419_s2 + $0x188] sm:$0xff]  ;;  %v66_v60 = vld [vmem:[%s5419_s2 + $0x80] sm:$0xff]  ;;  %vm417_vm2 = vcmask 64512   ;;  %s4500_s14 = smov 96   ;;  %s4502_s15 = smov 88  }
  0x1e   :  { %3909 = vmatprep.subr.mxu0 %v68_v52  ;;  %3947 = vmatprep.subr.mxu1 %v100_v53  ;;  %v51_v58 = vld [vmem:[%s5419_s2 + $0x8] sm:$0xff]  ;;  %v98_v61 = vld [vmem:[%s5419_s2 + $0x180] sm:$0xff]  ;;  %v45_v1 = vld [vmem:[%s5417_s0 + $0x18] sm:$0xff]  ;;  %v4843_v49 = vshrl.u32 %v314_v47, 7  ;;  %vm509_vm3 = vcmask 74752   ;;  %vm505_vm4 = vcmask 80896  }
  0x1f   :  { %v83_v59 = vld [vmem:[%s5419_s2 + $0x108] sm:$0xff]  ;;  %3910 = vmatpush3.msra.mxu0 %v52_v54  ;;  %3948 = vmatpush3.msra.mxu1 %v84_v55  ;;  %v50_v62 = vld [vmem:[%s5419_s2] sm:$0xff]  ;;  %v44_v3 = vld [vmem:[%s5417_s0 + $0x10] sm:$0xff]  ;;  %s4503_s20 = smov 64   ;;  %s4504_s21 = smov 56   ;;  %vm540_vm5 = vcmask 1041408  }
  0x20   :  { %3911 = vmatprep.subr.mxu0 %v67_v56  ;;  %3949 = vmatprep.subr.mxu1 %v99_v57  ;;  %v43_v63 = vld [vmem:[%s5417_s0 + $0x8] sm:$0xff]  ;;  %v82_v0 = vld [vmem:[%s5419_s2 + $0x100] sm:$0xff]  ;;  %v49_v5 = vld [vmem:[%s5417_s0 + $0x38] sm:$0x3]  ;;  %v4846_v50 = vsub.s32 0, %v4843_v49  ;;  %v4854_v52 = vsub.s32 1, %v4843_v49 }
  0x21   :  { %3912 = vmatpush3.msra.mxu0 %v51_v58  ;;  %3950 = vmatpush3.msra.mxu1 %v83_v59  ;;  %v42_v2 = vld [vmem:[%s5417_s0] sm:$0xff]  ;;  %v47_v4 = vld [vmem:[%s5417_s0 + $0x28] sm:$0x3]  ;;  %v48_v7 = vld [vmem:[%s5417_s0 + $0x30] sm:$0x3]  ;;  %s4501_s2 = smov 120  }
  0x22   :  { %3913 = vmatprep.subr.mxu0 %v66_v60  ;;  %3951 = vmatprep.subr.mxu1 %v98_v61  ;;  %v46_v6 = vld [vmem:[%s5417_s0 + $0x20] sm:$0x3]  ;;  %v115_v18 = vld [vmem:[%s5420_s3 + $0x8] sm:$0x3]  ;;  %v4818_v38 = vld [vmem:[%s5422_s5 + $0x18] sm:$0xff]  ;;  %s4505_s22 = smov 32  }
  0x23   :  { %3914 = vmatpush3.msra.mxu0 %v50_v62  ;;  %180 = vmatprep.mubr.f32.mxu0 %v43_v63  ;;  %v114_v10 = vld [vmem:[%s5420_s3] sm:$0xff]  ;;  %v4823_v39 = vld [vmem:[%s5422_s5 + $0x10] sm:$0xff]  ;;  %v4830_v40 = vld [vmem:[%s5422_s5 + $0x8] sm:$0xff]  ;;  %v4863_v63 = vsub.s32 4, %v4843_v49  ;;  %s4506_s23 = smov 80   ;;  %s4507_s0 = smov 112  }
  0x24   :  { %3952 = vmatpush3.msra.mxu1 %v82_v0  ;;  %255 = vmatprep.mubr.f32.mxu1 %v45_v1  ;;  %v4839_v41 = vld [vmem:[%s5422_s5] sm:$0xff]  ;;  %s4508_s3 = smov 72   ;;  %s4509_s24 = smov 104   ;;  %vm1762_vm8 = vcmask 523264   ;;  %vm3454_vm11 = vcmask 41984   ;;  %vm3496_vm12 = vcmask 1045504  }
  0x25   :  { %181 = vmatmul.mubr.f32.vlgmr.msra.gmra.mxu0 %v42_v2  ;;  %256 = vmatmul.mubr.f32.vlgmr.msra.gmra.mxu1 %v44_v3  ;;  %v4851_v51 = vld [vmem:[%s5423_s6] sm:$0xff]  ;;  %s4510_s25 = smov 48   ;;  %s4511_s26 = smov 40   ;;  %vm4514_vm13 = vmmov 0   ;;  %vm3492_vm14 = vcmask 48128  }
  0x26   :  { %185 = vmatprep.mubr.f32.mxu0 %v47_v4  ;;  %260 = vmatprep.mubr.f32.mxu1 %v49_v5  ;;  %v317_v53 = vrot.slane %v4851_v51, %v4846_v50  ;;  %v323_v56 = vrot.slane %v4851_v51, %v4854_v52  ;;  %v329_v0 = vrot.slane %v4851_v51, %v4863_v63 }
  0x27   :  { %4101 = vmatprep.subr.mxu0 %v4818_v38 }
  0x28   :  { %4102 = vmatpush3.msra.mxu0 %v4818_v38 }
  0x29   :  { %186 = vmatmul.mubr.f32.gmra.mxu0 %v46_v6  ;;  %261 = vmatmul.mubr.f32.gmra.mxu1 %v48_v7 }
  0x2a   :  { %4103 = vmatprep.subr.mxu0 %v4823_v39 }
  0x2b   :  { %4104 = vmatpush3.msra.mxu0 %v4823_v39 }
  0x2c   :  { %4105 = vmatprep.subr.mxu0 %v4830_v40 }
  0x2d   :  { %4106 = vmatpush3.msra.mxu0 %v4830_v40 }
  0x2e   :  { %4107 = vmatprep.subr.mxu0 %v4839_v41 }
  0x2f   :  { %4108 = vmatpush3.msra.mxu0 %v4839_v41 }
  0xe5   :  { %v3915_v8 = vpop.f32.mrf.mxu0  ;;  %v3953_v9 = vpop.f32.mrf.mxu1 }
  0xe7   :  { %v3916_v11 = vpop.f32.mrf.mxu0  ;;  %v3954_v12 = vpop.f32.mrf.mxu1 }
  0xe8   :  { %v3917_v13 = vadd.f32 %v3916_v11, %v3915_v8  ;;  %v3955_v17 = vadd.f32 %v3954_v12, %v3953_v9  ;;  %v4900_v12 = vld [vmem:[%s5421_s4 + $0x8] sm:$0x3] }
  0xe9   :  { %v3918_v14 = vpop.f32.mrf.mxu0  ;;  %v3956_v15 = vpop.f32.mrf.mxu1 }
  0xea   :  { %v183_v16 = vadd.f32 %v3917_v13, %v114_v10 }
  0xeb   :  { %v3919_v19 = vpop.f32.mrf.mxu0  ;;  %v3957_v20 = vpop.f32.mrf.mxu1 }
  0xec   :  { %v4803_v21 = vadd.f32 %v3955_v17, %v183_v16  ;;  %v3920_v22 = vadd.f32 %v3919_v19, %v3918_v14  ;;  %v3958_v24 = vadd.f32 %v3957_v20, %v3956_v15  ;;  %v4905_v15 = vld [vmem:[%s5421_s4] sm:$0xff] }
  0xee   :  { %v188_v23 = vadd.f32 %v3920_v22, %v115_v18  ;;  %v286_v25 = vsel %vm285_vm0, %v4803_v21, 0.0 }
  0xef   :  { %287 = vadd.xlane.f32.xlu0 %v286_v25 }
  0xf0   :  { %v4807_v26 = vadd.f32 %v3958_v24, %v188_v23 }
  0xf2   :  { %v290_v27 = vsel %vm289_vm1, %v4807_v26, 0.0 }
  0xf3   :  { %291 = vadd.xlane.f32.xlu0 %v290_v27 }
 0x178   :  { %v288_v28 = vpop.xlane.xlu0 %287 }
 0x179   :  { %v294_v29 = vmul.f32 0.03125, %v288_v28 }
 0x17b   :  { %v296_v30 = vsub.f32 %v4803_v21, %v294_v29 }
 0x17c   :  { %v292_v31 = vpop.xlane.xlu0 %291 }
 0x17d   :  { %v295_v32 = vmul.f32 0.03125, %v292_v31  ;;  %v298_v33 = vmul.f32 %v296_v30, %v296_v30 }
 0x17f   :  { %v297_v34 = vsub.f32 %v4807_v26, %v295_v32  ;;  %v300_v35 = vsel %vm285_vm0, %v298_v33, 0.0 }
 0x180   :  { %301 = vadd.xlane.f32.xlu1 %v300_v35 }
 0x181   :  { %v299_v36 = vmul.f32 %v297_v34, %v297_v34 }
 0x183   :  { %v303_v37 = vsel %vm289_vm1, %v299_v36, 0.0 }
 0x184   :  { %304 = vadd.xlane.f32.xlu1 %v303_v37 }
 0x209   :  { %v302_v42 = vpop.xlane.xlu1 %301 }
 0x20a   :  { %v306_v43 = vmul.f32 0.03125, %v302_v42 }
 0x20c   :  { %v308_v44 = vadd.f32 1e-06, %v306_v43 }
 0x20d   :  { %v305_v45 = vpop.xlane.xlu1 %304 }
 0x20e   :  { %4374 = vrsqrt.f32 %v308_v44  ;;  %v307_v46 = vmul.f32 0.03125, %v305_v45 }
 0x210   :  { %v309_v48 = vadd.f32 1e-06, %v307_v46 }
 0x212   :  { %4376 = vrsqrt.f32 %v309_v48 }
 0x21b   :  { %v4375_v54 = vpop.eup %4374 }
 0x21c   :  { %v312_v55 = vmul.f32 %v4375_v54, %v296_v30 }
 0x21e   :  { %v318_v57 = vmul.f32 %v317_v53, %v312_v55 }
 0x21f   :  { %v4377_v58 = vpop.eup %4376 }
 0x220   :  { %v313_v59 = vmul.f32 %v4377_v58, %v297_v34  ;;  %v324_v60 = vadd.f32 %v323_v56, %v318_v57 }
 0x222   :  { %v319_v61 = vmul.f32 %v317_v53, %v313_v59  ;;  %4109 = vmatprep.mubr.msk.f32.mxu0 %vm285_vm0, %v324_v60 }
 0x224   :  { %v325_v62 = vadd.f32 %v323_v56, %v319_v61 }
 0x226   :  { %4110 = vmatmul.mubr.msk.f32.vlgmr.msra.gmra.mxu0 %vm285_vm0, %v325_v62 }
 0x2e6   :  { %v4111_v1 = vpop.f32.mrf.mxu0 }
 0x2e7   :  { %v4867_v2 = vadd.f32 %v4111_v1, %v329_v0 }
 0x2e8   :  { %v402_v3 = vpop.f32.mrf.mxu0 }
 0x2e9   :  { %v4869_v4 = vadd.f32 %v402_v3, %v329_v0  ;;  %415 = vrot.lane.b32.xlu0 %v4867_v2, %s4500_s14 }
 0x2eb   :  { %413 = vrot.lane.b32.xlu1 %v4869_v4, %s4500_s14  ;;  %4116 = vmatprep.mubr.msk.f32.mxu1 %vm417_vm2, %v4869_v4 }
 0x2ed   :  { %618 = vrot.lane.b32.xlu0 %v4869_v4, %s4501_s2 }
 0x2ef   :  { %624 = vrot.lane.b32.xlu1 %v4867_v2, %s4502_s15 }
 0x2f3   :  { %622 = vrot.lane.b32.xlu1 %v4869_v4, %s4502_s15 }
 0x2f7   :  { %620 = vrot.lane.b32.xlu1 %v4867_v2, %s4501_s2 }
 0x35b   :  { %v416_v5 = vpop.permute.xlu0 %415 }
 0x35c   :  { %4112 = vmatprep.subr.msk.mxu1 %vm417_vm2, %v416_v5 }
 0x35d   :  { %4113 = vmatpush3.xpose.msk.msra.mxu1 %vm417_vm2, %v416_v5  ;;  %v414_v6 = vpop.permute.xlu1 %413 }
 0x35e   :  { %4114 = vmatprep.subr.msk.mxu1 %vm417_vm2, %v414_v6 }
 0x35f   :  { %v619_v8 = vpop.permute.xlu0 %618 }
 0x361   :  { %4115 = vmatpush3.xpose.msk.msra.mxu1 %vm417_vm2, %v414_v6  ;;  %v625_v7 = vpop.permute.xlu1 %624 }
 0x362   :  { %4126 = vmatprep.subr.msk.mxu1 %vm417_vm2, %v625_v7 }
 0x364   :  { %4117 = vmatmul.mubr.msk.f32.vlgmr.msra.gmra.mxu1 %vm417_vm2, %v4867_v2 }
 0x365   :  { %v623_v9 = vpop.permute.xlu1 %622  ;;  %4127 = vmatpush3.xpose.msk.msra.mxu1 %vm417_vm2, %v625_v7  ;;  %4130 = vmatprep.mubr.msk.f32.mxu1 %vm417_vm2, %v619_v8 }
 0x366   :  { %4128 = vmatprep.subr.msk.mxu1 %vm417_vm2, %v623_v9 }
 0x369   :  { %4129 = vmatpush3.xpose.msk.msra.mxu1 %vm417_vm2, %v623_v9  ;;  %v621_v10 = vpop.permute.xlu1 %620 }
 0x36c   :  { %4131 = vmatmul.mubr.msk.f32.vlgmr.msra.gmra.mxu1 %vm417_vm2, %v621_v10 }
 0x424   :  { %v4118_v11 = vpop.f32.mrf.mxu1 }
 0x425   :  { %v502_v13 = vmul.f32 0.35355338, %v4118_v11 }
 0x426   :  { %v492_v14 = vpop.f32.mrf.mxu1 }
 0x427   :  { %v501_v16 = vmul.f32 0.35355338, %v492_v14  ;;  %v504_v17 = vadd.f32 %v502_v13, %v4900_v12 }
 0x429   :  { %v510_v18 = vsel %vm509_vm3, %v504_v17, -inf  ;;  %v503_v19 = vadd.f32 %v501_v16, %v4905_v15 }
 0x42a   :  { %511 = vmax.xlane.f32.xlu1 %v510_v18 }
 0x42b   :  { %v506_v20 = vsel %vm505_vm4, %v503_v19, -inf }
 0x42c   :  { %v4132_v22 = vpop.f32.mrf.mxu1  ;;  %507 = vmax.xlane.f32.xlu0 %v506_v20 }
 0x42d   :  { %v710_v24 = vmul.f32 0.35355338, %v4132_v22 }
 0x42e   :  { %v700_v23 = vpop.f32.mrf.mxu1 }
 0x42f   :  { %v709_v25 = vmul.f32 0.35355338, %v700_v23  ;;  %v712_v29 = vadd.f32 %v710_v24, %v4900_v12 }
 0x431   :  { %v711_v27 = vadd.f32 %v709_v25, %v4905_v15  ;;  %v716_v30 = vsel %vm509_vm3, %v712_v29, -inf }
 0x433   :  { %v713_v28 = vsel %vm505_vm4, %v711_v27, -inf }
 0x434   :  { %714 = vmax.xlane.f32.xlu0 %v713_v28 }
 0x438   :  { %717 = vmax.xlane.f32.xlu0 %v716_v30 }
 0x4b3   :  { %v512_v31 = vpop.xlane.xlu1 %511 }
 0x4b4   :  { %v514_v32 = vsub.f32 %v504_v17, %v512_v31 }
 0x4b5   :  { %v508_v33 = vpop.xlane.xlu0 %507 }
 0x4b6   :  { %v517_v34 = vmul.f32 1.442695, %v514_v32  ;;  %v513_v35 = vsub.f32 %v503_v19, %v508_v33 }
 0x4b8   :  { %4378 = vpow2.f32 %v517_v34  ;;  %v515_v36 = vmul.f32 1.442695, %v513_v35 }
 0x4ba   :  { %4380 = vpow2.f32 %v515_v36 }
 0x4bd   :  { %v715_v37 = vpop.xlane.xlu0 %714 }
 0x4be   :  { %v719_v42 = vsub.f32 %v711_v27, %v715_v37 }
 0x4c0   :  { %v721_v43 = vmul.f32 1.442695, %v719_v42 }
 0x4c1   :  { %v718_v44 = vpop.xlane.xlu0 %717 }
 0x4c2   :  { %4382 = vpow2.f32 %v721_v43  ;;  %v720_v45 = vsub.f32 %v712_v29, %v718_v44 }
 0x4c4   :  { %v723_v46 = vmul.f32 1.442695, %v720_v45 }
 0x4c5   :  { %v4379_v47 = vpop.eup %4378 }
 0x4c6   :  { %4384 = vpow2.f32 %v723_v46  ;;  %v522_v48 = vsel %vm509_vm3, %v4379_v47, 0.0 }
 0x4c7   :  { %v4381_v53 = vpop.eup %4380  ;;  %523 = vadd.xlane.f32.xlu1 %v522_v48 }
 0x4c8   :  { %v519_v54 = vsel %vm505_vm4, %v4381_v53, 0.0 }
 0x4c9   :  { %520 = vadd.xlane.f32.xlu0 %v519_v54 }
 0x4cf   :  { %v4383_v55 = vpop.eup %4382 }
 0x4d0   :  { %v725_v56 = vsel %vm505_vm4, %v4383_v55, 0.0 }
 0x4d1   :  { %726 = vadd.xlane.f32.xlu0 %v725_v56 }
 0x4d3   :  { %v4385_v57 = vpop.eup %4384 }
 0x4d4   :  { %v728_v58 = vsel %vm509_vm3, %v4385_v57, 0.0 }
 0x4d5   :  { %729 = vadd.xlane.f32.xlu1 %v728_v58 }
 0x4e6   :  { %529 = vrot.lane.b32.xlu1 %v4869_v4, %s4503_s20 }
 0x4e7   :  { %531 = vrot.lane.b32.xlu0 %v4867_v2, %s4503_s20 }
 0x4ea   :  { %737 = vrot.lane.b32.xlu1 %v4867_v2, %s4504_s21 }
 0x4eb   :  { %824 = vrot.lane.b32.xlu0 %v4830_v40, %s4505_s22 }
 0x4ee   :  { %735 = vrot.lane.b32.xlu1 %v4869_v4, %s4504_s21 }
 0x4ef   :  { %997 = vrot.lane.b32.xlu0 %v4869_v4, %s4506_s23 }
 0x4f2   :  { %999 = vrot.lane.b32.xlu1 %v4867_v2, %s4506_s23 }
 0x4f3   :  { %995 = vrot.lane.b32.xlu0 %v4867_v2, %s4507_s0 }
 0x4f6   :  { %993 = vrot.lane.b32.xlu1 %v4869_v4, %s4507_s0 }
 0x4f7   :  { %1289 = vrot.lane.b32.xlu0 %v4869_v4, %s4508_s3 }
 0x4fa   :  { %1291 = vrot.lane.b32.xlu1 %v4867_v2, %s4508_s3 }
 0x4fb   :  { %1287 = vrot.lane.b32.xlu0 %v4867_v2, %s4509_s24 }
 0x4fe   :  { %1285 = vrot.lane.b32.xlu1 %v4869_v4, %s4509_s24 }
 0x550   :  { %v524_v40 = vpop.xlane.xlu1 %523 }
 0x551   :  { %4386 = vrcp.f32 %v524_v40 }
 0x552   :  { %v521_v59 = vpop.xlane.xlu0 %520 }
 0x553   :  { %4388 = vrcp.f32 %v521_v59 }
 0x55a   :  { %v727_v60 = vpop.xlane.xlu0 %726 }
 0x55b   :  { %4390 = vrcp.f32 %v727_v60 }
 0x55e   :  { %v730_v61 = vpop.xlane.xlu1 %729  ;;  %v532_v62 = vpop.permute.xlu0 %531 }
 0x55f   :  { %v4387_v0 = vpop.eup %4386  ;;  %4392 = vrcp.f32 %v730_v61  ;;  %4119 = vmatprep.subr.msk.mxu0 %vm540_vm5, %v532_v62 }
 0x560   :  { %v4389_v1 = vpop.eup %4388  ;;  %4120 = vmatpush3.msk.msra.mxu0 %vm540_vm5, %v532_v62  ;;  %v528_v6 = vmul.f32 %v4387_v0, %v4379_v47 }
 0x561   :  { %v526_v3 = vmul.f32 %v4389_v1, %v4381_v53 }
 0x562   :  { %v530_v5 = vpop.permute.xlu1 %529  ;;  %v825_v13 = vpop.permute.xlu0 %824 }
 0x563   :  { %4121 = vmatprep.subr.mxu0 %v530_v5  ;;  %4123 = vmatprep.mubr.msk.f32.mxu0 %vm505_vm4, %v526_v3 }
 0x564   :  { %4122 = vmatpush3.msra.mxu0 %v530_v5 }
 0x565   :  { %4124 = vmatmul.mubr.msk.f32.vlgmr.msra.gmra.mxu0 %vm505_vm4, %v528_v6 }
 0x566   :  { %v738_v7 = vpop.permute.xlu1 %737  ;;  %v998_v22 = vpop.permute.xlu0 %997 }
 0x567   :  { %4133 = vmatprep.subr.msk.mxu0 %vm540_vm5, %v738_v7 }
 0x568   :  { %v4391_v8 = vpop.eup %4390  ;;  %4134 = vmatpush3.msk.msra.mxu0 %vm540_vm5, %v738_v7 }
 0x569   :  { %v732_v9 = vmul.f32 %v4391_v8, %v4383_v55 }
 0x56a   :  { %v736_v10 = vpop.permute.xlu1 %735  ;;  %v996_v25 = vpop.permute.xlu0 %995 }
 0x56b   :  { %4135 = vmatprep.subr.mxu0 %v736_v10  ;;  %4137 = vmatprep.mubr.msk.f32.mxu0 %vm505_vm4, %v732_v9 }
 0x56c   :  { %v4393_v11 = vpop.eup %4392  ;;  %4136 = vmatpush3.msra.mxu0 %v736_v10 }
 0x56d   :  { %4140 = vmatprep.subr.mxu0 %v825_v13  ;;  %v734_v14 = vmul.f32 %v4393_v11, %v4385_v57 }
 0x56e   :  { %v1000_v16 = vpop.permute.xlu1 %999  ;;  %v1290_v28 = vpop.permute.xlu0 %1289 }
 0x56f   :  { %4138 = vmatmul.mubr.msk.f32.vlgmr.msra.gmra.mxu0 %vm505_vm4, %v734_v14 }
 0x570   :  { %4141 = vmatpush3.msra.mxu0 %v825_v13 }
 0x571   :  { %4150 = vmatprep.subr.msk.mxu0 %vm417_vm2, %v1000_v16 }
 0x572   :  { %v994_v19 = vpop.permute.xlu1 %993  ;;  %v1288_v29 = vpop.permute.xlu0 %1287 }
 0x576   :  { %v1292_v24 = vpop.permute.xlu1 %1291 }
 0x57a   :  { %v1286_v27 = vpop.permute.xlu1 %1285 }
 0x625   :  { %v4125_v17 = vpop.f32.mrf.mxu0 }
 0x627   :  { %v609_v18 = vpop.f32.mrf.mxu0 }
 0x628   :  { %4147 = vmatprep.mubr.msk.f32.mxu1 %vm417_vm2, %v609_v18 }
 0x62f   :  { %v4139_v20 = vpop.f32.mrf.mxu0 }
 0x631   :  { %v814_v23 = vpop.f32.mrf.mxu0 }
 0x632   :  { %4142 = vmatprep.mubr.msk.f32.mxu0 %vm417_vm2, %v814_v23 }
 0x633   :  { %4143 = vmatmul.mubr.msk.f32.vlgmr.msra.gmra.mxu0 %vm417_vm2, %v4139_v20 }
 0x634   :  { %4151 = vmatpush3.xpose.msk.msra.mxu0 %vm417_vm2, %v1000_v16  ;;  %4154 = vmatprep.mubr.msk.f32.mxu0 %vm417_vm2, %v994_v19 }
 0x635   :  { %4152 = vmatprep.subr.msk.mxu0 %vm417_vm2, %v998_v22 }
 0x638   :  { %4153 = vmatpush3.xpose.msk.msra.mxu0 %vm417_vm2, %v998_v22 }
 0x639   :  { %4169 = vmatprep.subr.msk.mxu0 %vm417_vm2, %v1292_v24 }
 0x63b   :  { %4155 = vmatmul.mubr.msk.f32.vlgmr.msra.gmra.mxu0 %vm417_vm2, %v996_v25 }
 0x63c   :  { %4170 = vmatpush3.xpose.msk.msra.mxu0 %vm417_vm2, %v1292_v24  ;;  %4173 = vmatprep.mubr.msk.f32.mxu0 %vm417_vm2, %v1286_v27 }
 0x63d   :  { %4171 = vmatprep.subr.msk.mxu0 %vm417_vm2, %v1290_v28 }
 0x640   :  { %4172 = vmatpush3.xpose.msk.msra.mxu0 %vm417_vm2, %v1290_v28 }
 0x643   :  { %4174 = vmatmul.mubr.msk.f32.vlgmr.msra.gmra.mxu0 %vm417_vm2, %v1288_v29 }
 0x6f3   :  { %v4968_v30 = vpop.f32.mrf.mxu0 }
 0x6f5   :  { %v4970_v31 = vpop.f32.mrf.mxu0 }
 0x6fb   :  { %v4156_v32 = vpop.f32.mrf.mxu0 }
 0x6fc   :  { %v1085_v33 = vmul.f32 0.35355338, %v4156_v32 }
 0x6fd   :  { %v1075_v34 = vpop.f32.mrf.mxu0 }
 0x6fe   :  { %v1084_v35 = vmul.f32 0.35355338, %v1075_v34  ;;  %v1087_v36 = vadd.f32 %v1085_v33, %v4900_v12 }
 0x700   :  { %v1091_v37 = vsel %vm509_vm3, %v1087_v36, -inf  ;;  %v1086_v42 = vadd.f32 %v1084_v35, %v4905_v15 }
 0x701   :  { %1092 = vmax.xlane.f32.xlu0 %v1091_v37 }
 0x702   :  { %v1088_v43 = vsel %vm505_vm4, %v1086_v42, -inf }
 0x703   :  { %1089 = vmax.xlane.f32.xlu1 %v1088_v43  ;;  %v4175_v44 = vpop.f32.mrf.mxu0 }
 0x704   :  { %v1377_v5 = vmul.f32 0.35355338, %v4175_v44 }
 0x705   :  { %v1367_v45 = vpop.f32.mrf.mxu0 }
 0x706   :  { %v1376_v46 = vmul.f32 0.35355338, %v1367_v45  ;;  %v1379_v6 = vadd.f32 %v1377_v5, %v4900_v12 }
 0x708   :  { %v1378_v47 = vadd.f32 %v1376_v46, %v4905_v15  ;;  %v1383_v7 = vsel %vm509_vm3, %v1379_v6, -inf }
 0x70a   :  { %v1380_v48 = vsel %vm505_vm4, %v1378_v47, -inf }
 0x714   :  { %909 = vrot.lane.b32.xlu1 %v4839_v41, %s4505_s22 }
 0x718   :  { %1110 = vrot.lane.b32.xlu1 %v4869_v4, %s4510_s25 }
 0x73c   :  { %1381 = vmax.xlane.f32.xlu1 %v1380_v48  ;;  %v5013_v48 = vsub.s32 5, %v4843_v49 }
 0x78a   :  { %v1093_v53 = vpop.xlane.xlu0 %1092 }
 0x78b   :  { %v1095_v54 = vsub.f32 %v1087_v36, %v1093_v53 }
 0x78c   :  { %v1090_v55 = vpop.xlane.xlu1 %1089 }
 0x78d   :  { %v1098_v56 = vmul.f32 1.442695, %v1095_v54  ;;  %v1094_v57 = vsub.f32 %v1086_v42, %v1090_v55 }
 0x78f   :  { %4394 = vpow2.f32 %v1098_v56  ;;  %v1096_v58 = vmul.f32 1.442695, %v1094_v57 }
 0x790   :  { %v910_v41 = vpop.permute.xlu1 %909 }
 0x791   :  { %4396 = vpow2.f32 %v1096_v58  ;;  %4145 = vmatprep.subr.mxu1 %v910_v41 }
 0x792   :  { %4146 = vmatpush3.msra.mxu1 %v910_v41 }
 0x793   :  { %4148 = vmatmul.mubr.msk.f32.vlgmr.msra.gmra.mxu1 %vm417_vm2, %v4125_v17 }
 0x794   :  { %v1111_v62 = vpop.permute.xlu1 %1110 }
 0x79c   :  { %v4395_v40 = vpop.eup %4394 }
 0x79d   :  { %v1103_v59 = vsel %vm509_vm3, %v4395_v40, 0.0 }
 0x79e   :  { %v4397_v60 = vpop.eup %4396  ;;  %1104 = vadd.xlane.f32.xlu0 %v1103_v59 }
 0x79f   :  { %v1100_v61 = vsel %vm505_vm4, %v4397_v60, 0.0 }
 0x7a2   :  { %1101 = vadd.xlane.f32.xlu0 %v1100_v61 }
 0x7b8   :  { %1112 = vrot.lane.b32.xlu0 %v4867_v2, %s4510_s25 }
 0x7c5   :  { %v1382_v0 = vpop.xlane.xlu1 %1381 }
 0x7c6   :  { %v1386_v1 = vsub.f32 %v1378_v47, %v1382_v0 }
 0x7c8   :  { %v1388_v3 = vmul.f32 1.442695, %v1386_v1 }
 0x7ca   :  { %4398 = vpow2.f32 %v1388_v3 }
 0x7d7   :  { %v4399_v8 = vpop.eup %4398  ;;  %1384 = vmax.xlane.f32.xlu0 %v1383_v7 }
 0x7d8   :  { %v1392_v9 = vsel %vm505_vm4, %v4399_v8, 0.0 }
 0x7db   :  { %1393 = vadd.xlane.f32.xlu0 %v1392_v9  ;;  %v276_v9 = vld [vmem:[%s5424_s7 + $0x18] sm:$0xff] }
 0x7dc   :  { %4188 = vmatprep.subr.mxu0 %v276_v9 }
 0x7dd   :  { %4189 = vmatpush3.msra.mxu0 %v276_v9 }
 0x7f1   :  { %1199 = vrot.lane.b32.xlu0 %v4823_v39, %s4505_s22 }
 0x827   :  { %v1105_v10 = vpop.xlane.xlu0 %1104 }
 0x828   :  { %4400 = vrcp.f32 %v1105_v10  ;;  %v275_v10 = vld [vmem:[%s5424_s7 + $0x10] sm:$0xff] }
 0x829   :  { %4190 = vmatprep.subr.mxu0 %v275_v10 }
 0x82a   :  { %4191 = vmatpush3.msra.mxu0 %v275_v10 }
 0x82b   :  { %v1102_v11 = vpop.xlane.xlu0 %1101 }
 0x82c   :  { %4402 = vrcp.f32 %v1102_v11  ;;  %v274_v11 = vld [vmem:[%s5424_s7 + $0x8] sm:$0xff] }
 0x82d   :  { %4192 = vmatprep.subr.mxu0 %v274_v11 }
 0x82e   :  { %4193 = vmatpush3.msra.mxu0 %v274_v11 }
 0x82f   :  { %v1113_v13 = vpop.permute.xlu0 %1112 }
 0x830   :  { %4157 = vmatprep.subr.msk.mxu1 %vm540_vm5, %v1113_v13 }
 0x831   :  { %4158 = vmatpush3.msk.msra.mxu1 %vm540_vm5, %v1113_v13  ;;  %v273_v13 = vld [vmem:[%s5424_s7] sm:$0xff] }
 0x832   :  { %4159 = vmatprep.subr.mxu1 %v1111_v62  ;;  %4194 = vmatprep.subr.mxu0 %v273_v13 }
 0x833   :  { %4160 = vmatpush3.msra.mxu1 %v1111_v62  ;;  %4195 = vmatpush3.msra.mxu0 %v273_v13 }
 0x835   :  { %v4401_v14 = vpop.eup %4400 }
 0x836   :  { %v1109_v18 = vmul.f32 %v4401_v14, %v4395_v40 }
 0x839   :  { %v4403_v16 = vpop.eup %4402 }
 0x83a   :  { %v1107_v17 = vmul.f32 %v4403_v16, %v4397_v60 }
 0x83c   :  { %4161 = vmatprep.mubr.msk.f32.mxu1 %vm505_vm4, %v1107_v17 }
 0x83d   :  { %4162 = vmatmul.mubr.msk.f32.vlgmr.msra.gmra.mxu1 %vm505_vm4, %v1109_v18 }
 0x853   :  { %v4149_v27 = vpop.f32.mrf.mxu1 }
 0x854   :  { %v990_v42 = vadd.f32 %v4149_v27, %v4968_v30  ;;  %v1582_v30 = vrot.slane %v4851_v51, %v5013_v48 }
 0x855   :  { %v984_v28 = vpop.f32.mrf.mxu1 }
 0x856   :  { %v985_v53 = vadd.f32 %v984_v28, %v4970_v31 }
 0x860   :  { %v1385_v39 = vpop.xlane.xlu0 %1384 }
 0x861   :  { %v1387_v19 = vsub.f32 %v1379_v6, %v1385_v39 }
 0x863   :  { %v1390_v20 = vmul.f32 1.442695, %v1387_v19 }
 0x864   :  { %v1394_v24 = vpop.xlane.xlu0 %1393 }
 0x865   :  { %4404 = vpow2.f32 %v1390_v20  ;;  %v5045_v20 = vsub.s32 2, %v4843_v49 }
 0x866   :  { %4406 = vrcp.f32 %v1394_v24 }
 0x868   :  { %v1200_v25 = vpop.permute.xlu0 %1199 }
 0x869   :  { %4164 = vmatprep.subr.mxu1 %v1200_v25 }
 0x86a   :  { %4165 = vmatpush3.msra.mxu1 %v1200_v25 }
 0x872   :  { %v4405_v22 = vpop.eup %4404 }
 0x873   :  { %v1395_v23 = vsel %vm509_vm3, %v4405_v22, 0.0  ;;  %v4407_v29 = vpop.eup %4406 }
 0x874   :  { %1396 = vadd.xlane.f32.xlu1 %v1395_v23  ;;  %v1399_v35 = vmul.f32 %v4407_v29, %v4399_v8  ;;  %v1614_v23 = vrot.slane %v4851_v51, %v5045_v20 }
 0x885   :  { %1404 = vrot.lane.b32.xlu1 %v4867_v2, %s4511_s26 }
 0x889   :  { %1402 = vrot.lane.b32.xlu1 %v4869_v4, %s4511_s26 }
 0x88d   :  { %1491 = vrot.lane.b32.xlu1 %v4818_v38, %s4505_s22 }
 0x8fd   :  { %v4163_v32 = vpop.f32.mrf.mxu1  ;;  %v1397_v33 = vpop.xlane.xlu1 %1396 }
 0x8fe   :  { %4408 = vrcp.f32 %v1397_v33 }
 0x8ff   :  { %v1189_v34 = vpop.f32.mrf.mxu1 }
 0x900   :  { %4166 = vmatprep.mubr.msk.f32.mxu1 %vm417_vm2, %v1189_v34 }
 0x901   :  { %v1405_v36 = vpop.permute.xlu1 %1404  ;;  %4167 = vmatmul.mubr.msk.f32.vlgmr.msra.gmra.mxu1 %vm417_vm2, %v4163_v32 }
 0x902   :  { %4176 = vmatprep.subr.msk.mxu1 %vm540_vm5, %v1405_v36  ;;  %4180 = vmatprep.mubr.msk.f32.mxu1 %vm505_vm4, %v1399_v35 }
 0x903   :  { %4177 = vmatpush3.msk.msra.mxu1 %vm540_vm5, %v1405_v36  ;;  %v284_v36 = vld [vmem:[%s5425_s8 + $0x38] sm:$0xff] }
 0x905   :  { %v1403_v38 = vpop.permute.xlu1 %1402 }
 0x906   :  { %4178 = vmatprep.subr.mxu1 %v1403_v38 }
 0x907   :  { %4179 = vmatpush3.msra.mxu1 %v1403_v38  ;;  %v283_v38 = vld [vmem:[%s5425_s8 + $0x30] sm:$0xff] }
 0x909   :  { %v1492_v37 = vpop.permute.xlu1 %1491 }
 0x90a   :  { %4183 = vmatprep.subr.mxu1 %v1492_v37 }
 0x90b   :  { %v4409_v2 = vpop.eup %4408 }
 0x90c   :  { %v1401_v4 = vmul.f32 %v4409_v2, %v4405_v22  ;;  %v5048_v22 = vsub.s32 3, %v4843_v49  ;;  %v282_v2 = vld [vmem:[%s5425_s8 + $0x28] sm:$0xff] }
 0x90e   :  { %4181 = vmatmul.mubr.msk.f32.vlgmr.msra.gmra.mxu1 %vm505_vm4, %v1401_v4  ;;  %v1620_v27 = vrot.slane %v4851_v51, %v5048_v22  ;;  %v281_v4 = vld [vmem:[%s5425_s8 + $0x20] sm:$0xff] }
 0x90f   :  { %4184 = vmatpush3.msra.mxu1 %v1492_v37  ;;  %v280_v37 = vld [vmem:[%s5425_s8 + $0x18] sm:$0xff] }
 0x910   :  { %4199 = vmatprep.subr.mxu1 %v284_v36 }
 0x9c1   :  { %v4168_v43 = vpop.f32.mrf.mxu1 }
 0x9c2   :  { %v1284_v44 = vadd.f32 %v4168_v43, %v990_v42  ;;  %v279_v42 = vld [vmem:[%s5425_s8 + $0x10] sm:$0xff]  ;;  %v278_v43 = vld [vmem:[%s5425_s8 + $0x8] sm:$0xff] }
 0x9c3   :  { %v1274_v45 = vpop.f32.mrf.mxu1 }
 0x9c4   :  { %v1283_v55 = vadd.f32 %v1274_v45, %v985_v53  ;;  %v5081_v45 = vsub.s32 6, %v4843_v49 }
 0x9ce   :  { %v4182_v46 = vpop.f32.mrf.mxu1 }
 0x9d0   :  { %v1481_v47 = vpop.f32.mrf.mxu1 }
 0x9d1   :  { %4185 = vmatprep.mubr.msk.f32.mxu1 %vm417_vm2, %v1481_v47 }
 0x9d2   :  { %4186 = vmatmul.mubr.msk.f32.vlgmr.msra.gmra.mxu1 %vm417_vm2, %v4182_v46  ;;  %v1626_v46 = vrot.slane %v4851_v51, %v5081_v45 }
 0x9d3   :  { %4200 = vmatpush3.msra.mxu1 %v284_v36  ;;  %v4512_v36 = vmov -1.0  }
 0x9d4   :  { %4201 = vmatprep.subr.mxu1 %v283_v38 }
 0x9d5   :  { %4202 = vmatpush3.msra.mxu1 %v283_v38 }
 0x9d6   :  { %4203 = vmatprep.subr.mxu1 %v282_v2 }
 0x9d7   :  { %4204 = vmatpush3.msra.mxu1 %v282_v2 }
 0x9d8   :  { %4205 = vmatprep.subr.mxu1 %v281_v4 }
 0x9d9   :  { %4206 = vmatpush3.msra.mxu1 %v281_v4 }
 0x9da   :  { %4207 = vmatprep.subr.mxu1 %v280_v37 }
 0x9db   :  { %4208 = vmatpush3.msra.mxu1 %v280_v37 }
 0x9dc   :  { %4209 = vmatprep.subr.mxu1 %v279_v42 }
 0x9dd   :  { %4210 = vmatpush3.msra.mxu1 %v279_v42 }
 0x9de   :  { %4211 = vmatprep.subr.mxu1 %v278_v43 }
 0x9df   :  { %4212 = vmatpush3.msra.mxu1 %v278_v43 }
 0xa92   :  { %v4187_v54 = vpop.f32.mrf.mxu1 }
 0xa93   :  { %v1576_v56 = vadd.f32 %v4187_v54, %v1284_v44  ;;  %v277_v44 = vld [vmem:[%s5425_s8] sm:$0xff] }
 0xa94   :  { %v1566_v57 = vpop.f32.mrf.mxu1  ;;  %4213 = vmatprep.subr.mxu1 %v277_v44 }
 0xa95   :  { %v1578_v58 = vadd.f32 %v1576_v56, %v4807_v26  ;;  %v1575_v41 = vadd.f32 %v1566_v57, %v1283_v55  ;;  %4214 = vmatpush3.msra.mxu1 %v277_v44 }
 0xa97   :  { %v5019_v40 = vadd.f32 %v1582_v30, %v1578_v58  ;;  %v1577_v59 = vadd.f32 %v1575_v41, %v4803_v21 }
 0xa99   :  { %v5022_v60 = vadd.f32 %v1582_v30, %v1577_v59  ;;  %v1588_v61 = vsel %vm289_vm1, %v5019_v40, 0.0 }
 0xa9a   :  { %1589 = vadd.xlane.f32.xlu1 %v1588_v61 }
 0xa9b   :  { %v1585_v31 = vsel %vm285_vm0, %v5022_v60, 0.0 }
 0xa9c   :  { %1586 = vadd.xlane.f32.xlu0 %v1585_v31 }
 0xb23   :  { %v1590_v62 = vpop.xlane.xlu1 %1589 }
 0xb24   :  { %v1592_v0 = vmul.f32 0.03125, %v1590_v62 }
 0xb25   :  { %v1587_v1 = vpop.xlane.xlu0 %1586 }
 0xb26   :  { %v1591_v3 = vmul.f32 0.03125, %v1587_v1  ;;  %v1594_v26 = vsub.f32 %v5019_v40, %v1592_v0 }
 0xb28   :  { %v1593_v5 = vsub.f32 %v5022_v60, %v1591_v3  ;;  %v1596_v7 = vmul.f32 %v1594_v26, %v1594_v26 }
 0xb2a   :  { %v1595_v6 = vmul.f32 %v1593_v5, %v1593_v5  ;;  %v1600_v8 = vsel %vm289_vm1, %v1596_v7, 0.0 }
 0xb2c   :  { %v1597_v21 = vsel %vm285_vm0, %v1595_v6, 0.0 }
 0xb2d   :  { %1598 = vadd.xlane.f32.xlu0 %v1597_v21 }
 0xb31   :  { %1601 = vadd.xlane.f32.xlu0 %v1600_v8 }
 0xbb6   :  { %v1599_v14 = vpop.xlane.xlu0 %1598 }
 0xbb7   :  { %v1603_v16 = vmul.f32 0.03125, %v1599_v14 }
 0xbb9   :  { %v1605_v17 = vadd.f32 1e-06, %v1603_v16 }
 0xbba   :  { %v1602_v18 = vpop.xlane.xlu0 %1601 }
 0xbbb   :  { %4410 = vrsqrt.f32 %v1605_v17  ;;  %v1604_v39 = vmul.f32 0.03125, %v1602_v18 }
 0xbbd   :  { %v1606_v19 = vadd.f32 1e-06, %v1604_v39 }
 0xbbf   :  { %4412 = vrsqrt.f32 %v1606_v19 }
 0xbc8   :  { %v4411_v24 = vpop.eup %4410 }
 0xbc9   :  { %v1609_v25 = vmul.f32 %v4411_v24, %v1593_v5 }
 0xbcb   :  { %v1615_v28 = vmul.f32 %v1614_v23, %v1609_v25 }
 0xbcc   :  { %v4413_v29 = vpop.eup %4412 }
 0xbcd   :  { %v1610_v32 = vmul.f32 %v4413_v29, %v1594_v26  ;;  %v1621_v33 = vadd.f32 %v1620_v27, %v1615_v28 }
 0xbcf   :  { %v1616_v34 = vmul.f32 %v1614_v23, %v1610_v32  ;;  %4196 = vmatprep.mubr.msk.f32.mxu0 %vm285_vm0, %v1621_v33 }
 0xbd1   :  { %v1622_v35 = vadd.f32 %v1620_v27, %v1616_v34 }
 0xbd3   :  { %4197 = vmatmul.mubr.msk.f32.vlgmr.msra.gmra.mxu0 %vm285_vm0, %v1622_v35 }
 0xc93   :  { %v4198_v47 = vpop.f32.mrf.mxu0 }
 0xc94   :  { %v1705_v53 = vadd.f32 %v4198_v47, %v1626_v46 }
 0xc95   :  { %v1699_v54 = vpop.f32.mrf.mxu0 }
 0xc96   :  { %v1711_v55 = vmul.f32 0.70710677, %v1705_v53  ;;  %v1700_v56 = vadd.f32 %v1699_v54, %v1626_v46  ;;  %v1709_v54 = vmul.f32 0.5, %v1705_v53 }
 0xc98   :  { %v1717_v30 = vand.u32 2147483647, %v1711_v55  ;;  %v1710_v57 = vmul.f32 0.70710677, %v1700_v56  ;;  %vm1713_vm6 = vcmp.ge.f32.partialorder %v1711_v55, 0.0  ;;  %v1708_v46 = vmul.f32 0.5, %v1700_v56 }
 0xc99   :  { %v1715_v38 = vsel %vm1713_vm6, 1.0, %v4512_v36 }
 0xc9a   :  { %v1719_v58 = vmul.f32 0.3275911, %v1717_v30  ;;  %v1716_v41 = vand.u32 2147483647, %v1710_v57  ;;  %v1745_v62 = vsub.f32 0.0, %v1717_v30  ;;  %vm1712_vm7 = vcmp.ge.f32.partialorder %v1710_v57, 0.0 }
 0xc9b   :  { %v1714_v42 = vsel %vm1712_vm7, 1.0, %v4512_v36 }
 0xc9c   :  { %v1721_v59 = vadd.f32 1.0, %v1719_v58  ;;  %v1718_v61 = vmul.f32 0.3275911, %v1716_v41  ;;  %v1744_v0 = vsub.f32 0.0, %v1716_v41  ;;  %v1747_v1 = vmul.f32 %v1745_v62, %v1717_v30 }
 0xc9d   :  { %v5090_v58 = vsub.s32 7, %v4843_v49 }
 0xc9e   :  { %4414 = vrcp.f32 %v1721_v59  ;;  %v1720_v31 = vadd.f32 1.0, %v1718_v61  ;;  %v1746_v26 = vmul.f32 %v1744_v0, %v1716_v41  ;;  %v1750_v6 = vmul.f32 1.442695, %v1747_v1 }
 0xc9f   :  { %v1849_v57 = vrot.slane %v4851_v51, %v5090_v58 }
 0xca0   :  { %4416 = vrcp.f32 %v1720_v31  ;;  %v1748_v9 = vmul.f32 1.442695, %v1746_v26 }
 0xca1   :  { %4418 = vpow2.f32 %v1750_v6 }
 0xca2   :  { %4420 = vpow2.f32 %v1748_v9  ;;  %v5123_v9 = vld [vmem:[%s5422_s5 + $0x28] sm:$0xff] }
 0xcab   :  { %v4415_v3 = vpop.eup %4414 }
 0xcac   :  { %v1727_v5 = vmul.f32 1.0614054, %v4415_v3 }
 0xcad   :  { %v4417_v21 = vpop.eup %4416 }
 0xcae   :  { %v1729_v7 = vadd.f32 -1.4531521, %v1727_v5  ;;  %v1726_v8 = vmul.f32 1.0614054, %v4417_v21  ;;  %v4419_v28 = vpop.eup %4418 }
 0xcaf   :  { %v4421_v34 = vpop.eup %4420 }
 0xcb0   :  { %v1731_v10 = vmul.f32 %v4415_v3, %v1729_v7  ;;  %v1728_v11 = vadd.f32 -1.4531521, %v1726_v8  ;;  %v5111_v7 = vld [vmem:[%s5422_s5 + $0x38] sm:$0xff]  ;;  %v5116_v8 = vld [vmem:[%s5422_s5 + $0x30] sm:$0xff] }
 0xcb1   :  { %4218 = vmatprep.subr.mxu0 %v5111_v7 }
 0xcb2   :  { %v1733_v13 = vadd.f32 1.4214138, %v1731_v10  ;;  %v1730_v14 = vmul.f32 %v4417_v21, %v1728_v11  ;;  %4219 = vmatpush3.msra.mxu0 %v5111_v7  ;;  %v5130_v10 = vld [vmem:[%s5422_s5 + $0x20] sm:$0xff] }
 0xcb3   :  { %4220 = vmatprep.subr.mxu0 %v5116_v8 }
 0xcb4   :  { %v1735_v16 = vmul.f32 %v4415_v3, %v1733_v13  ;;  %v1732_v17 = vadd.f32 1.4214138, %v1730_v14  ;;  %4221 = vmatpush3.msra.mxu0 %v5116_v8 }
 0xcb5   :  { %4222 = vmatprep.subr.mxu0 %v5123_v9 }
 0xcb6   :  { %v1737_v18 = vadd.f32 -0.28449672, %v1735_v16  ;;  %v1734_v39 = vmul.f32 %v4417_v21, %v1732_v17  ;;  %4223 = vmatpush3.msra.mxu0 %v5123_v9 }
 0xcb7   :  { %4224 = vmatprep.subr.mxu0 %v5130_v10 }
 0xcb8   :  { %v1739_v19 = vmul.f32 %v4415_v3, %v1737_v18  ;;  %v1736_v23 = vadd.f32 -0.28449672, %v1734_v39  ;;  %4225 = vmatpush3.msra.mxu0 %v5130_v10  ;;  %v5139_v39 = vld [vmem:[%s5423_s6 + $0x8] sm:$0xff] }
 0xcba   :  { %v1741_v24 = vadd.f32 0.2548296, %v1739_v19  ;;  %v1738_v25 = vmul.f32 %v4417_v21, %v1736_v23  ;;  %v1902_v23 = vrot.slane %v5139_v39, %v4846_v50 }
 0xcbc   :  { %v1743_v27 = vmul.f32 %v4415_v3, %v1741_v24  ;;  %v1740_v29 = vadd.f32 0.2548296, %v1738_v25 }
 0xcbe   :  { %v1753_v32 = vmul.f32 %v4419_v28, %v1743_v27  ;;  %v1742_v33 = vmul.f32 %v4417_v21, %v1740_v29  ;;  %v1908_v29 = vrot.slane %v5139_v39, %v4854_v52 }
 0xcc0   :  { %v1755_v35 = vsub.f32 1.0, %v1753_v32  ;;  %v1752_v2 = vmul.f32 %v4421_v34, %v1742_v33 }
 0xcc2   :  { %v1757_v4 = vmul.f32 %v1755_v35, %v1715_v38  ;;  %v1754_v37 = vsub.f32 1.0, %v1752_v2  ;;  %v1914_v35 = vrot.slane %v5139_v39, %v4863_v63 }
 0xcc4   :  { %v1756_v43 = vmul.f32 %v1754_v37, %v1714_v42  ;;  %v1759_v44 = vadd.f32 1.0, %v1757_v4 }
 0xcc6   :  { %v1758_v47 = vadd.f32 1.0, %v1756_v43  ;;  %v1761_v30 = vmul.f32 %v1759_v44, %v1709_v54 }
 0xcc8   :  { %v1760_v55 = vmul.f32 %v1758_v47, %v1708_v46 }
 0xcca   :  { %4215 = vmatprep.mubr.msk.f32.mxu1 %vm1762_vm8, %v1760_v55 }
 0xccb   :  { %4216 = vmatmul.mubr.msk.f32.vlgmr.msra.gmra.mxu1 %vm1762_vm8, %v1761_v30 }
 0xd8b   :  { %v4217_v41 = vpop.f32.mrf.mxu1 }
 0xd8c   :  { %v1845_v59 = vadd.f32 %v4217_v41, %v5019_v40 }
 0xd8d   :  { %v1835_v61 = vpop.f32.mrf.mxu1 }
 0xd8e   :  { %v5095_v56 = vadd.f32 %v1849_v57, %v1845_v59  ;;  %v1844_v53 = vadd.f32 %v1835_v61, %v5022_v60 }
 0xd90   :  { %v5098_v31 = vadd.f32 %v1849_v57, %v1844_v53  ;;  %v1876_v62 = vsel %vm289_vm1, %v5095_v56, 0.0 }
 0xd91   :  { %1877 = vadd.xlane.f32.xlu1 %v1876_v62 }
 0xd92   :  { %v1873_v49 = vsel %vm285_vm0, %v5098_v31, 0.0 }
 0xd93   :  { %1874 = vadd.xlane.f32.xlu0 %v1873_v49 }
 0xe1a   :  { %v1878_v0 = vpop.xlane.xlu1 %1877 }
 0xe1b   :  { %v1880_v51 = vmul.f32 0.03125, %v1878_v0 }
 0xe1c   :  { %v1875_v1 = vpop.xlane.xlu0 %1874 }
 0xe1d   :  { %v1882_v40 = vsub.f32 %v5095_v56, %v1880_v51  ;;  %v1879_v3 = vmul.f32 0.03125, %v1875_v1 }
 0xe1f   :  { %v1881_v26 = vsub.f32 %v5098_v31, %v1879_v3  ;;  %v1884_v5 = vmul.f32 %v1882_v40, %v1882_v40 }
 0xe21   :  { %v1888_v60 = vsel %vm289_vm1, %v1884_v5, 0.0  ;;  %v1883_v6 = vmul.f32 %v1881_v26, %v1881_v26 }
 0xe22   :  { %1889 = vadd.xlane.f32.xlu1 %v1888_v60 }
 0xe23   :  { %v1885_v21 = vsel %vm285_vm0, %v1883_v6, 0.0 }
 0xe24   :  { %1886 = vadd.xlane.f32.xlu0 %v1885_v21 }
 0xeab   :  { %v1890_v11 = vpop.xlane.xlu1 %1889 }
 0xeac   :  { %v1892_v13 = vmul.f32 0.03125, %v1890_v11 }
 0xead   :  { %v1887_v14 = vpop.xlane.xlu0 %1886 }
 0xeae   :  { %v1894_v16 = vadd.f32 1e-06, %v1892_v13  ;;  %v1891_v17 = vmul.f32 0.03125, %v1887_v14 }
 0xeb0   :  { %4422 = vrsqrt.f32 %v1894_v16  ;;  %v1893_v18 = vadd.f32 1e-06, %v1891_v17 }
 0xeb2   :  { %4424 = vrsqrt.f32 %v1893_v18 }
 0xebd   :  { %v4423_v19 = vpop.eup %4422 }
 0xebe   :  { %v1898_v24 = vmul.f32 %v4423_v19, %v1882_v40 }
 0xebf   :  { %v4425_v25 = vpop.eup %4424 }
 0xec0   :  { %v1897_v27 = vmul.f32 %v4425_v25, %v1881_v26  ;;  %v1904_v28 = vmul.f32 %v1902_v23, %v1898_v24 }
 0xec2   :  { %v1903_v32 = vmul.f32 %v1902_v23, %v1897_v27  ;;  %v1910_v34 = vadd.f32 %v1908_v29, %v1904_v28  ;;  %v5199_v28 = vld [vmem:[%s5421_s4 + $0x8] sm:$0x3] }
 0xec4   :  { %v1909_v33 = vadd.f32 %v1908_v29, %v1903_v32 }
 0xec6   :  { %4226 = vmatprep.mubr.msk.f32.mxu0 %vm285_vm0, %v1909_v33  ;;  %v5206_v33 = vld [vmem:[%s5421_s4] sm:$0xff] }
 0xec7   :  { %4227 = vmatmul.mubr.msk.f32.vlgmr.msra.gmra.mxu0 %vm285_vm0, %v1910_v34 }
 0xf87   :  { %v4228_v38 = vpop.f32.mrf.mxu0 }
 0xf88   :  { %v5149_v2 = vadd.f32 %v4228_v38, %v1914_v35 }
 0xf89   :  { %v1987_v4 = vpop.f32.mrf.mxu0 }
 0xf8a   :  { %v5151_v37 = vadd.f32 %v1987_v4, %v1914_v35  ;;  %2000 = vrot.lane.b32.xlu0 %v5149_v2, %s4500_s14 }
 0xf8c   :  { %1998 = vrot.lane.b32.xlu1 %v5151_v37, %s4500_s14  ;;  %4233 = vmatprep.mubr.msk.f32.mxu0 %vm417_vm2, %v5151_v37 }
 0xffc   :  { %v2001_v42 = vpop.permute.xlu0 %2000 }
 0xffd   :  { %4229 = vmatprep.subr.msk.mxu0 %vm417_vm2, %v2001_v42 }
 0xffe   :  { %4230 = vmatpush3.xpose.msk.msra.mxu0 %vm417_vm2, %v2001_v42  ;;  %v1999_v43 = vpop.permute.xlu1 %1998 }
 0xfff   :  { %4231 = vmatprep.subr.msk.mxu0 %vm417_vm2, %v1999_v43 }
0x1002   :  { %4232 = vmatpush3.xpose.msk.msra.mxu0 %vm417_vm2, %v1999_v43 }
0x1005   :  { %4234 = vmatmul.mubr.msk.f32.vlgmr.msra.gmra.mxu0 %vm417_vm2, %v5149_v2 }
0x10c5   :  { %v4235_v44 = vpop.f32.mrf.mxu0 }
0x10c6   :  { %v2086_v46 = vmul.f32 0.35355338, %v4235_v44 }
0x10c7   :  { %v2076_v47 = vpop.f32.mrf.mxu0 }
0x10c8   :  { %v2085_v54 = vmul.f32 0.35355338, %v2076_v47  ;;  %v2088_v55 = vadd.f32 %v2086_v46, %v4900_v12 }
0x10ca   :  { %v2092_v30 = vsel %vm509_vm3, %v2088_v55, -inf  ;;  %v2087_v57 = vadd.f32 %v2085_v54, %v4905_v15 }
0x10cb   :  { %2093 = vmax.xlane.f32.xlu0 %v2092_v30 }
0x10cc   :  { %v2089_v41 = vsel %vm505_vm4, %v2087_v57, -inf }
0x10cd   :  { %2090 = vmax.xlane.f32.xlu1 %v2089_v41 }
0x1154   :  { %v2094_v59 = vpop.xlane.xlu0 %2093 }
0x1155   :  { %v2096_v61 = vsub.f32 %v2088_v55, %v2094_v59 }
0x1156   :  { %v2091_v53 = vpop.xlane.xlu1 %2090 }
0x1157   :  { %v2099_v62 = vmul.f32 1.442695, %v2096_v61  ;;  %v2095_v49 = vsub.f32 %v2087_v57, %v2091_v53 }
0x1159   :  { %4426 = vpow2.f32 %v2099_v62  ;;  %v2097_v0 = vmul.f32 1.442695, %v2095_v49 }
0x115b   :  { %4428 = vpow2.f32 %v2097_v0 }
0x1166   :  { %v4427_v51 = vpop.eup %4426 }
0x1167   :  { %v2104_v1 = vsel %vm509_vm3, %v4427_v51, 0.0 }
0x1168   :  { %v4429_v12 = vpop.eup %4428  ;;  %2105 = vadd.xlane.f32.xlu1 %v2104_v1 }
0x1169   :  { %v2101_v40 = vsel %vm505_vm4, %v4429_v12, 0.0 }
0x116a   :  { %2102 = vadd.xlane.f32.xlu0 %v2101_v40 }
0x1179   :  { %2111 = vrot.lane.b32.xlu1 %v5151_v37, %s4503_s20 }
0x117d   :  { %2205 = vrot.lane.b32.xlu1 %v5149_v2, %s4502_s15 }
0x1180   :  { %2113 = vrot.lane.b32.xlu0 %v5149_v2, %s4503_s20 }
0x1181   :  { %2203 = vrot.lane.b32.xlu1 %v5151_v37, %s4502_s15 }
0x1184   :  { %2199 = vrot.lane.b32.xlu0 %v5151_v37, %s4501_s2 }
0x1185   :  { %2201 = vrot.lane.b32.xlu1 %v5149_v2, %s4501_s2 }
0x11f1   :  { %v2106_v15 = vpop.xlane.xlu1 %2105 }
0x11f2   :  { %4430 = vrcp.f32 %v2106_v15 }
0x11f3   :  { %v2103_v3 = vpop.xlane.xlu0 %2102 }
0x11f4   :  { %4432 = vrcp.f32 %v2103_v3 }
0x11f5   :  { %v2112_v26 = vpop.permute.xlu1 %2111 }
0x11f7   :  { %v2114_v5 = vpop.permute.xlu0 %2113 }
0x11f8   :  { %4236 = vmatprep.subr.msk.mxu1 %vm540_vm5, %v2114_v5 }
0x11f9   :  { %4237 = vmatpush3.msk.msra.mxu1 %vm540_vm5, %v2114_v5  ;;  %v2206_v60 = vpop.permute.xlu1 %2205 }
0x11fa   :  { %4238 = vmatprep.subr.mxu1 %v2112_v26 }
0x11fb   :  { %4239 = vmatpush3.msra.mxu1 %v2112_v26  ;;  %v2200_v14 = vpop.permute.xlu0 %2199 }
0x11fc   :  { %4243 = vmatprep.subr.msk.mxu1 %vm417_vm2, %v2206_v60 }
0x11fd   :  { %v2204_v16 = vpop.permute.xlu1 %2203 }
0x11ff   :  { %v4431_v6 = vpop.eup %4430 }
0x1200   :  { %v2110_v13 = vmul.f32 %v4431_v6, %v4427_v51 }
0x1201   :  { %v4433_v21 = vpop.eup %4432  ;;  %v2202_v17 = vpop.permute.xlu1 %2201 }
0x1202   :  { %v2108_v11 = vmul.f32 %v4433_v21, %v4429_v12 }
0x1204   :  { %4240 = vmatprep.mubr.msk.f32.mxu1 %vm505_vm4, %v2108_v11 }
0x1205   :  { %4241 = vmatmul.mubr.msk.f32.vlgmr.msra.gmra.mxu1 %vm505_vm4, %v2110_v13 }
0x1206   :  { %4244 = vmatpush3.xpose.msk.msra.mxu1 %vm417_vm2, %v2206_v60  ;;  %4247 = vmatprep.mubr.msk.f32.mxu1 %vm417_vm2, %v2200_v14 }
0x1207   :  { %4245 = vmatprep.subr.msk.mxu1 %vm417_vm2, %v2204_v16 }
0x120a   :  { %4246 = vmatpush3.xpose.msk.msra.mxu1 %vm417_vm2, %v2204_v16 }
0x120d   :  { %4248 = vmatmul.mubr.msk.f32.vlgmr.msra.gmra.mxu1 %vm417_vm2, %v2202_v17 }
0x12c5   :  { %v5193_v18 = vpop.f32.mrf.mxu1 }
0x12c7   :  { %v2190_v19 = vpop.f32.mrf.mxu1 }
0x12c8   :  { %4264 = vmatprep.mubr.msk.f32.mxu1 %vm417_vm2, %v2190_v19 }
0x12cd   :  { %v4249_v23 = vpop.f32.mrf.mxu1 }
0x12ce   :  { %v2291_v24 = vmul.f32 0.35355338, %v4249_v23 }
0x12cf   :  { %v2281_v25 = vpop.f32.mrf.mxu1 }
0x12d0   :  { %v2290_v27 = vmul.f32 0.35355338, %v2281_v25  ;;  %v2293_v29 = vadd.f32 %v5199_v28, %v2291_v24 }
0x12d2   :  { %v2297_v32 = vsel %vm509_vm3, %v2293_v29, -inf  ;;  %v2292_v34 = vadd.f32 %v5206_v33, %v2290_v27 }
0x12d3   :  { %2298 = vmax.xlane.f32.xlu1 %v2297_v32 }
0x12d4   :  { %v2294_v35 = vsel %vm505_vm4, %v2292_v34, -inf }
0x12d5   :  { %2295 = vmax.xlane.f32.xlu0 %v2294_v35 }
0x12e4   :  { %2316 = vrot.lane.b32.xlu1 %v5151_v37, %s4504_s21 }
0x12e8   :  { %2405 = vrot.lane.b32.xlu1 %v5123_v9, %s4505_s22 }
0x12ec   :  { %2580 = vrot.lane.b32.xlu1 %v5149_v2, %s4506_s23 }
0x12f0   :  { %2574 = vrot.lane.b32.xlu1 %v5151_v37, %s4507_s0 }
0x12f4   :  { %2872 = vrot.lane.b32.xlu1 %v5149_v2, %s4508_s3 }
0x12f8   :  { %2866 = vrot.lane.b32.xlu1 %v5151_v37, %s4509_s24 }
0x135c   :  { %v2299_v38 = vpop.xlane.xlu1 %2298 }
0x135d   :  { %v2301_v4 = vsub.f32 %v2293_v29, %v2299_v38 }
0x135e   :  { %v2296_v42 = vpop.xlane.xlu0 %2295 }
0x135f   :  { %v2304_v43 = vmul.f32 1.442695, %v2301_v4  ;;  %v2300_v44 = vsub.f32 %v2292_v34, %v2296_v42 }
0x1360   :  { %v2317_v41 = vpop.permute.xlu1 %2316 }
0x1361   :  { %4434 = vpow2.f32 %v2304_v43  ;;  %v2302_v46 = vmul.f32 1.442695, %v2300_v44 }
0x1363   :  { %4436 = vpow2.f32 %v2302_v46 }
0x1364   :  { %v2406_v61 = vpop.permute.xlu1 %2405 }
0x1368   :  { %v2581_v51 = vpop.permute.xlu1 %2580 }
0x136c   :  { %v2575_v1 = vpop.permute.xlu1 %2574 }
0x136e   :  { %v4435_v9 = vpop.eup %4434 }
0x136f   :  { %v2309_v47 = vsel %vm509_vm3, %v4435_v9, 0.0 }
0x1370   :  { %v4437_v54 = vpop.eup %4436  ;;  %2310 = vadd.xlane.f32.xlu0 %v2309_v47  ;;  %v2873_v3 = vpop.permute.xlu1 %2872 }
0x1371   :  { %v2306_v55 = vsel %vm505_vm4, %v4437_v54, 0.0 }
0x1374   :  { %2307 = vadd.xlane.f32.xlu0 %v2306_v55  ;;  %v2867_v5 = vpop.permute.xlu1 %2866 }
0x138a   :  { %2318 = vrot.lane.b32.xlu0 %v5149_v2, %s4504_s21 }
0x138e   :  { %2578 = vrot.lane.b32.xlu0 %v5151_v37, %s4506_s23 }
0x1392   :  { %2576 = vrot.lane.b32.xlu0 %v5149_v2, %s4507_s0 }
0x1396   :  { %2870 = vrot.lane.b32.xlu0 %v5151_v37, %s4508_s3 }
0x139a   :  { %2868 = vrot.lane.b32.xlu0 %v5149_v2, %s4509_s24 }
0x13f9   :  { %v2311_v30 = vpop.xlane.xlu0 %2310 }
0x13fa   :  { %4438 = vrcp.f32 %v2311_v30 }
0x13fd   :  { %v2308_v57 = vpop.xlane.xlu0 %2307 }
0x13fe   :  { %4440 = vrcp.f32 %v2308_v57 }
0x1401   :  { %v2319_v59 = vpop.permute.xlu0 %2318 }
0x1402   :  { %4250 = vmatprep.subr.msk.mxu0 %vm540_vm5, %v2319_v59 }
0x1403   :  { %4251 = vmatpush3.msk.msra.mxu0 %vm540_vm5, %v2319_v59 }
0x1404   :  { %4252 = vmatprep.subr.mxu0 %v2317_v41 }
0x1405   :  { %4253 = vmatpush3.msra.mxu0 %v2317_v41  ;;  %v2579_v40 = vpop.permute.xlu0 %2578 }
0x1406   :  { %4257 = vmatprep.subr.mxu0 %v2406_v61 }
0x1407   :  { %v4439_v53 = vpop.eup %4438 }
0x1408   :  { %v2315_v0 = vmul.f32 %v4439_v53, %v4435_v9 }
0x1409   :  { %v2577_v26 = vpop.permute.xlu0 %2576 }
0x140b   :  { %v4441_v62 = vpop.eup %4440 }
0x140c   :  { %v2313_v49 = vmul.f32 %v4441_v62, %v4437_v54 }
0x140d   :  { %v2871_v60 = vpop.permute.xlu0 %2870 }
0x140e   :  { %4254 = vmatprep.mubr.msk.f32.mxu0 %vm505_vm4, %v2313_v49 }
0x140f   :  { %4255 = vmatmul.mubr.msk.f32.vlgmr.msra.gmra.mxu0 %vm505_vm4, %v2315_v0 }
0x1410   :  { %4258 = vmatpush3.msra.mxu0 %v2406_v61 }
0x1411   :  { %4267 = vmatprep.subr.msk.mxu0 %vm417_vm2, %v2581_v51  ;;  %v2869_v6 = vpop.permute.xlu0 %2868 }
0x14cf   :  { %v4256_v12 = vpop.f32.mrf.mxu0 }
0x14d1   :  { %v2395_v15 = vpop.f32.mrf.mxu0 }
0x14d2   :  { %4259 = vmatprep.mubr.msk.f32.mxu0 %vm417_vm2, %v2395_v15 }
0x14d3   :  { %4260 = vmatmul.mubr.msk.f32.vlgmr.msra.gmra.mxu0 %vm417_vm2, %v4256_v12 }
0x14d4   :  { %4268 = vmatpush3.xpose.msk.msra.mxu0 %vm417_vm2, %v2581_v51  ;;  %4271 = vmatprep.mubr.msk.f32.mxu0 %vm417_vm2, %v2575_v1 }
0x14d5   :  { %4269 = vmatprep.subr.msk.mxu0 %vm417_vm2, %v2579_v40 }
0x14d8   :  { %4270 = vmatpush3.xpose.msk.msra.mxu0 %vm417_vm2, %v2579_v40 }
0x14d9   :  { %4286 = vmatprep.subr.msk.mxu0 %vm417_vm2, %v2873_v3 }
0x14db   :  { %4272 = vmatmul.mubr.msk.f32.vlgmr.msra.gmra.mxu0 %vm417_vm2, %v2577_v26 }
0x14dc   :  { %4287 = vmatpush3.xpose.msk.msra.mxu0 %vm417_vm2, %v2873_v3  ;;  %4290 = vmatprep.mubr.msk.f32.mxu0 %vm417_vm2, %v2867_v5 }
0x14dd   :  { %4288 = vmatprep.subr.msk.mxu0 %vm417_vm2, %v2871_v60 }
0x14e0   :  { %4289 = vmatpush3.xpose.msk.msra.mxu0 %vm417_vm2, %v2871_v60 }
0x14e3   :  { %4291 = vmatmul.mubr.msk.f32.vlgmr.msra.gmra.mxu0 %vm417_vm2, %v2869_v6 }
0x1593   :  { %v5252_v21 = vpop.f32.mrf.mxu0 }
0x1595   :  { %v5254_v11 = vpop.f32.mrf.mxu0 }
0x159b   :  { %v4273_v13 = vpop.f32.mrf.mxu0 }
0x159c   :  { %v2666_v14 = vmul.f32 0.35355338, %v4273_v13 }
0x159d   :  { %v2656_v16 = vpop.f32.mrf.mxu0 }
0x159e   :  { %v2665_v17 = vmul.f32 0.35355338, %v2656_v16  ;;  %v2668_v19 = vadd.f32 %v5199_v28, %v2666_v14 }
0x15a0   :  { %v2672_v23 = vsel %vm509_vm3, %v2668_v19, -inf  ;;  %v2667_v24 = vadd.f32 %v5206_v33, %v2665_v17 }
0x15a1   :  { %2673 = vmax.xlane.f32.xlu0 %v2672_v23 }
0x15a2   :  { %v2669_v25 = vsel %vm505_vm4, %v2667_v24, -inf }
0x15a3   :  { %2670 = vmax.xlane.f32.xlu1 %v2669_v25  ;;  %v4292_v27 = vpop.f32.mrf.mxu0 }
0x15a4   :  { %v2958_v59 = vmul.f32 0.35355338, %v4292_v27 }
0x15a5   :  { %v2948_v29 = vpop.f32.mrf.mxu0 }
0x15a6   :  { %v2957_v32 = vmul.f32 0.35355338, %v2948_v29  ;;  %v2960_v61 = vadd.f32 %v5199_v28, %v2958_v59 }
0x15a8   :  { %v2959_v34 = vadd.f32 %v5206_v33, %v2957_v32 }
0x15aa   :  { %v2961_v35 = vsel %vm505_vm4, %v2959_v34, -inf }
0x15b4   :  { %2490 = vrot.lane.b32.xlu1 %v5130_v10, %s4505_s22 }
0x15b8   :  { %2691 = vrot.lane.b32.xlu1 %v5151_v37, %s4510_s25 }
0x15dc   :  { %2962 = vmax.xlane.f32.xlu1 %v2961_v35 }
0x162a   :  { %v2674_v38 = vpop.xlane.xlu0 %2673 }
0x162b   :  { %v2676_v4 = vsub.f32 %v2668_v19, %v2674_v38 }
0x162c   :  { %v2671_v42 = vpop.xlane.xlu1 %2670 }
0x162d   :  { %v2679_v43 = vmul.f32 1.442695, %v2676_v4  ;;  %v2675_v44 = vsub.f32 %v2667_v24, %v2671_v42 }
0x162f   :  { %4442 = vpow2.f32 %v2679_v43  ;;  %v2677_v46 = vmul.f32 1.442695, %v2675_v44 }
0x1630   :  { %v2491_v9 = vpop.permute.xlu1 %2490 }
0x1631   :  { %4444 = vpow2.f32 %v2677_v46  ;;  %4262 = vmatprep.subr.mxu1 %v2491_v9 }
0x1632   :  { %4263 = vmatpush3.msra.mxu1 %v2491_v9  ;;  %v3163_v9 = vrot.slane %v5139_v39, %v5013_v48 }
0x1633   :  { %4265 = vmatmul.mubr.msk.f32.vlgmr.msra.gmra.mxu1 %vm417_vm2, %v5193_v18  ;;  %v2964_v18 = vsel %vm509_vm3, %v2960_v61, -inf }
0x1634   :  { %v2692_v55 = vpop.permute.xlu1 %2691 }
0x163c   :  { %v4443_v10 = vpop.eup %4442 }
0x163d   :  { %v2684_v33 = vsel %vm509_vm3, %v4443_v10, 0.0 }
0x163e   :  { %v4445_v47 = vpop.eup %4444  ;;  %2685 = vadd.xlane.f32.xlu0 %v2684_v33 }
0x163f   :  { %v2681_v54 = vsel %vm505_vm4, %v4445_v47, 0.0 }
0x1642   :  { %2682 = vadd.xlane.f32.xlu0 %v2681_v54 }
0x1658   :  { %2693 = vrot.lane.b32.xlu0 %v5149_v2, %s4510_s25 }
0x1665   :  { %v2963_v30 = vpop.xlane.xlu1 %2962 }
0x1666   :  { %v2967_v57 = vsub.f32 %v2959_v34, %v2963_v30 }
0x1668   :  { %v2969_v41 = vmul.f32 1.442695, %v2967_v57 }
0x166a   :  { %4446 = vpow2.f32 %v2969_v41 }
0x1677   :  { %v4447_v53 = vpop.eup %4446  ;;  %2965 = vmax.xlane.f32.xlu0 %v2964_v18 }
0x1678   :  { %v2973_v62 = vsel %vm505_vm4, %v4447_v53, 0.0 }
0x167b   :  { %2974 = vadd.xlane.f32.xlu0 %v2973_v62 }
0x1691   :  { %2780 = vrot.lane.b32.xlu0 %v5116_v8, %s4505_s22 }
0x16c7   :  { %v2686_v49 = vpop.xlane.xlu0 %2685 }
0x16c8   :  { %4448 = vrcp.f32 %v2686_v49 }
0x16cb   :  { %v2683_v0 = vpop.xlane.xlu0 %2682 }
0x16cc   :  { %4450 = vrcp.f32 %v2683_v0  ;;  %v3827_v0 = vld [vmem:[%s5424_s7 + $0x38] sm:$0xff] }
0x16cd   :  { %4305 = vmatprep.subr.mxu0 %v3827_v0 }
0x16ce   :  { %4306 = vmatpush3.msra.mxu0 %v3827_v0 }
0x16cf   :  { %v2694_v51 = vpop.permute.xlu0 %2693 }
0x16d0   :  { %4274 = vmatprep.subr.msk.mxu1 %vm540_vm5, %v2694_v51 }
0x16d1   :  { %4275 = vmatpush3.msk.msra.mxu1 %vm540_vm5, %v2694_v51  ;;  %v3826_v51 = vld [vmem:[%s5424_s7 + $0x30] sm:$0xff] }
0x16d2   :  { %4276 = vmatprep.subr.mxu1 %v2692_v55  ;;  %4307 = vmatprep.subr.mxu0 %v3826_v51 }
0x16d3   :  { %4277 = vmatpush3.msra.mxu1 %v2692_v55  ;;  %4308 = vmatpush3.msra.mxu0 %v3826_v51 }
0x16d5   :  { %v4449_v28 = vpop.eup %4448 }
0x16d6   :  { %v2690_v40 = vmul.f32 %v4449_v28, %v4443_v10  ;;  %v3825_v28 = vld [vmem:[%s5424_s7 + $0x28] sm:$0xff] }
0x16d7   :  { %4309 = vmatprep.subr.mxu0 %v3825_v28 }
0x16d8   :  { %4310 = vmatpush3.msra.mxu0 %v3825_v28 }
0x16d9   :  { %v4451_v1 = vpop.eup %4450 }
0x16da   :  { %v2688_v12 = vmul.f32 %v4451_v1, %v4445_v47  ;;  %v3824_v1 = vld [vmem:[%s5424_s7 + $0x20] sm:$0xff] }
0x16db   :  { %4311 = vmatprep.subr.mxu0 %v3824_v1 }
0x16dc   :  { %4278 = vmatprep.mubr.msk.f32.mxu1 %vm505_vm4, %v2688_v12  ;;  %4312 = vmatpush3.msra.mxu0 %v3824_v1 }
0x16dd   :  { %4279 = vmatmul.mubr.msk.f32.vlgmr.msra.gmra.mxu1 %vm505_vm4, %v2690_v40 }
0x16f3   :  { %v4266_v13 = vpop.f32.mrf.mxu1 }
0x16f4   :  { %v2571_v29 = vadd.f32 %v4266_v13, %v5252_v21  ;;  %v3201_v13 = vrot.slane %v5139_v39, %v5048_v22 }
0x16f5   :  { %v2565_v14 = vpop.f32.mrf.mxu1 }
0x16f6   :  { %v2566_v42 = vadd.f32 %v2565_v14, %v5254_v11 }
0x1700   :  { %v2966_v8 = vpop.xlane.xlu0 %2965 }
0x1701   :  { %v2968_v15 = vsub.f32 %v2960_v61, %v2966_v8 }
0x1703   :  { %v2971_v3 = vmul.f32 1.442695, %v2968_v15 }
0x1704   :  { %v2975_v60 = vpop.xlane.xlu0 %2974 }
0x1705   :  { %4452 = vpow2.f32 %v2971_v3 }
0x1706   :  { %4454 = vrcp.f32 %v2975_v60 }
0x1708   :  { %v2781_v6 = vpop.permute.xlu0 %2780 }
0x1709   :  { %4281 = vmatprep.subr.mxu1 %v2781_v6 }
0x170a   :  { %4282 = vmatpush3.msra.mxu1 %v2781_v6 }
0x1712   :  { %v4453_v26 = vpop.eup %4452 }
0x1713   :  { %v2976_v5 = vsel %vm509_vm3, %v4453_v26, 0.0  ;;  %v4455_v16 = vpop.eup %4454 }
0x1714   :  { %2977 = vadd.xlane.f32.xlu1 %v2976_v5  ;;  %v2980_v24 = vmul.f32 %v4455_v16, %v4447_v53  ;;  %v3195_v5 = vrot.slane %v5139_v39, %v5045_v20 }
0x1725   :  { %2985 = vrot.lane.b32.xlu1 %v5149_v2, %s4511_s26 }
0x1729   :  { %2983 = vrot.lane.b32.xlu1 %v5151_v37, %s4511_s26 }
0x172d   :  { %3072 = vrot.lane.b32.xlu1 %v5111_v7, %s4505_s22 }
0x179d   :  { %v4280_v17 = vpop.f32.mrf.mxu1  ;;  %v2978_v19 = vpop.xlane.xlu1 %2977 }
0x179e   :  { %4456 = vrcp.f32 %v2978_v19 }
0x179f   :  { %v2770_v23 = vpop.f32.mrf.mxu1 }
0x17a0   :  { %4283 = vmatprep.mubr.msk.f32.mxu1 %vm417_vm2, %v2770_v23 }
0x17a1   :  { %v2986_v25 = vpop.permute.xlu1 %2985  ;;  %4284 = vmatmul.mubr.msk.f32.vlgmr.msra.gmra.mxu1 %vm417_vm2, %v4280_v17 }
0x17a2   :  { %4293 = vmatprep.subr.msk.mxu1 %vm540_vm5, %v2986_v25  ;;  %4297 = vmatprep.mubr.msk.f32.mxu1 %vm505_vm4, %v2980_v24 }
0x17a3   :  { %4294 = vmatpush3.msk.msra.mxu1 %vm540_vm5, %v2986_v25  ;;  %v3835_v25 = vld [vmem:[%s5425_s8 + $0x78] sm:$0xff] }
0x17a5   :  { %v2984_v7 = vpop.permute.xlu1 %2983 }
0x17a6   :  { %4295 = vmatprep.subr.mxu1 %v2984_v7 }
0x17a7   :  { %4296 = vmatpush3.msra.mxu1 %v2984_v7  ;;  %v3834_v7 = vld [vmem:[%s5425_s8 + $0x70] sm:$0xff] }
0x17a9   :  { %v3073_v27 = vpop.permute.xlu1 %3072 }
0x17aa   :  { %4300 = vmatprep.subr.mxu1 %v3073_v27 }
0x17ab   :  { %v4457_v2 = vpop.eup %4456 }
0x17ac   :  { %v2982_v37 = vmul.f32 %v4457_v2, %v4453_v26  ;;  %v3833_v2 = vld [vmem:[%s5425_s8 + $0x68] sm:$0xff] }
0x17ae   :  { %4298 = vmatmul.mubr.msk.f32.vlgmr.msra.gmra.mxu1 %vm505_vm4, %v2982_v37  ;;  %v3832_v37 = vld [vmem:[%s5425_s8 + $0x60] sm:$0xff] }
0x17af   :  { %4301 = vmatpush3.msra.mxu1 %v3073_v27  ;;  %v3831_v27 = vld [vmem:[%s5425_s8 + $0x58] sm:$0xff] }
0x17b0   :  { %4316 = vmatprep.subr.mxu1 %v3835_v25 }
0x1861   :  { %v4285_v32 = vpop.f32.mrf.mxu1 }
0x1862   :  { %v2865_v34 = vadd.f32 %v4285_v32, %v2571_v29  ;;  %v3830_v29 = vld [vmem:[%s5425_s8 + $0x50] sm:$0xff]  ;;  %v3829_v32 = vld [vmem:[%s5425_s8 + $0x48] sm:$0xff] }
0x1863   :  { %v2855_v35 = vpop.f32.mrf.mxu1 }
0x1864   :  { %v2864_v44 = vadd.f32 %v2855_v35, %v2566_v42  ;;  %v3207_v35 = vrot.slane %v5139_v39, %v5081_v45 }
0x186e   :  { %v4299_v38 = vpop.f32.mrf.mxu1 }
0x1870   :  { %v3062_v4 = vpop.f32.mrf.mxu1 }
0x1871   :  { %4302 = vmatprep.mubr.msk.f32.mxu1 %vm417_vm2, %v3062_v4 }
0x1872   :  { %4303 = vmatmul.mubr.msk.f32.vlgmr.msra.gmra.mxu1 %vm417_vm2, %v4299_v38 }
0x1873   :  { %4317 = vmatpush3.msra.mxu1 %v3835_v25 }
0x1874   :  { %4318 = vmatprep.subr.mxu1 %v3834_v7 }
0x1875   :  { %4319 = vmatpush3.msra.mxu1 %v3834_v7 }
0x1876   :  { %4320 = vmatprep.subr.mxu1 %v3833_v2 }
0x1877   :  { %4321 = vmatpush3.msra.mxu1 %v3833_v2 }
0x1878   :  { %4322 = vmatprep.subr.mxu1 %v3832_v37 }
0x1879   :  { %4323 = vmatpush3.msra.mxu1 %v3832_v37 }
0x187a   :  { %4324 = vmatprep.subr.mxu1 %v3831_v27 }
0x187b   :  { %4325 = vmatpush3.msra.mxu1 %v3831_v27 }
0x187c   :  { %4326 = vmatprep.subr.mxu1 %v3830_v29 }
0x187d   :  { %4327 = vmatpush3.msra.mxu1 %v3830_v29 }
0x187e   :  { %4328 = vmatprep.subr.mxu1 %v3829_v32 }
0x187f   :  { %4329 = vmatpush3.msra.mxu1 %v3829_v32 }
0x1932   :  { %v4304_v43 = vpop.f32.mrf.mxu1 }
0x1933   :  { %v3157_v46 = vadd.f32 %v4304_v43, %v2865_v34  ;;  %v3828_v34 = vld [vmem:[%s5425_s8 + $0x40] sm:$0xff] }
0x1934   :  { %v3147_v10 = vpop.f32.mrf.mxu1  ;;  %4330 = vmatprep.subr.mxu1 %v3828_v34 }
0x1935   :  { %v3159_v21 = vadd.f32 %v3157_v46, %v5095_v56  ;;  %v3156_v33 = vadd.f32 %v3147_v10, %v2864_v44  ;;  %4331 = vmatpush3.msra.mxu1 %v3828_v34 }
0x1937   :  { %v3158_v47 = vadd.f32 %v3156_v33, %v5098_v31  ;;  %v3165_v54 = vadd.f32 %v3163_v9, %v3159_v21 }
0x1939   :  { %v5302_v55 = vadd.f32 %v3163_v9, %v3158_v47  ;;  %v3169_v30 = vsel %vm289_vm1, %v3165_v54, 0.0 }
0x193a   :  { %3170 = vadd.xlane.f32.xlu1 %v3169_v30 }
0x193b   :  { %v3166_v11 = vsel %vm285_vm0, %v5302_v55, 0.0 }
0x193c   :  { %3167 = vadd.xlane.f32.xlu0 %v3166_v11 }
0x19c3   :  { %v3171_v57 = vpop.xlane.xlu1 %3170 }
0x19c4   :  { %v3173_v41 = vmul.f32 0.03125, %v3171_v57 }
0x19c5   :  { %v3168_v59 = vpop.xlane.xlu0 %3167 }
0x19c6   :  { %v3172_v61 = vmul.f32 0.03125, %v3168_v59  ;;  %v3175_v18 = vsub.f32 %v3165_v54, %v3173_v41 }
0x19c8   :  { %v3174_v56 = vsub.f32 %v5302_v55, %v3172_v61  ;;  %v3177_v62 = vmul.f32 %v3175_v18, %v3175_v18 }
0x19ca   :  { %v3176_v53 = vmul.f32 %v3174_v56, %v3174_v56  ;;  %v3181_v49 = vsel %vm289_vm1, %v3177_v62, 0.0 }
0x19cc   :  { %v3178_v31 = vsel %vm285_vm0, %v3176_v53, 0.0 }
0x19cd   :  { %3179 = vadd.xlane.f32.xlu0 %v3178_v31 }
0x19d1   :  { %3182 = vadd.xlane.f32.xlu0 %v3181_v49 }
0x1a56   :  { %v3180_v12 = vpop.xlane.xlu0 %3179 }
0x1a57   :  { %v3184_v40 = vmul.f32 0.03125, %v3180_v12 }
0x1a59   :  { %v3186_v8 = vadd.f32 1e-06, %v3184_v40 }
0x1a5a   :  { %v3183_v15 = vpop.xlane.xlu0 %3182 }
0x1a5b   :  { %4458 = vrsqrt.f32 %v3186_v8  ;;  %v3185_v3 = vmul.f32 0.03125, %v3183_v15 }
0x1a5d   :  { %v3187_v26 = vadd.f32 1e-06, %v3185_v3 }
0x1a5f   :  { %4460 = vrsqrt.f32 %v3187_v26 }
0x1a68   :  { %v4459_v60 = vpop.eup %4458 }
0x1a69   :  { %v3190_v6 = vmul.f32 %v4459_v60, %v3174_v56 }
0x1a6b   :  { %v3196_v14 = vmul.f32 %v3195_v5, %v3190_v6 }
0x1a6c   :  { %v4461_v16 = vpop.eup %4460 }
0x1a6d   :  { %v3191_v17 = vmul.f32 %v4461_v16, %v3175_v18  ;;  %v3202_v19 = vadd.f32 %v3201_v13, %v3196_v14 }
0x1a6f   :  { %v3197_v23 = vmul.f32 %v3195_v5, %v3191_v17  ;;  %4313 = vmatprep.mubr.msk.f32.mxu0 %vm285_vm0, %v3202_v19 }
0x1a71   :  { %v3203_v24 = vadd.f32 %v3201_v13, %v3197_v23 }
0x1a73   :  { %4314 = vmatmul.mubr.msk.f32.vlgmr.msra.gmra.mxu0 %vm285_vm0, %v3203_v24 }
0x1b33   :  { %v4315_v38 = vpop.f32.mrf.mxu0 }
0x1b34   :  { %v3286_v4 = vadd.f32 %v4315_v38, %v3207_v35 }
0x1b35   :  { %v3280_v42 = vpop.f32.mrf.mxu0 }
0x1b36   :  { %v3292_v43 = vmul.f32 0.70710677, %v3286_v4  ;;  %v3281_v44 = vadd.f32 %v3280_v42, %v3207_v35  ;;  %v3290_v34 = vmul.f32 0.5, %v3286_v4  ;;  %v3453_v4 = vld [vmem:[%s5418_s1] sm:$0x3] }
0x1b38   :  { %v3298_v46 = vand.u32 2147483647, %v3292_v43  ;;  %v3291_v9 = vmul.f32 0.70710677, %v3281_v44  ;;  %vm3294_vm9 = vcmp.ge.f32.partialorder %v3292_v43, 0.0  ;;  %v3289_v29 = vmul.f32 0.5, %v3281_v44 }
0x1b39   :  { %v3296_v23 = vsel %vm3294_vm9, 1.0, %v4512_v36  ;;  %v3427_v43 = vrot.slane %v5139_v39, %v5090_v58  ;;  %v3455_v44 = vsel %vm3454_vm11, %v3453_v4, 0.0 }
0x1b3a   :  { %v3300_v10 = vmul.f32 0.3275911, %v3298_v46  ;;  %v3297_v21 = vand.u32 2147483647, %v3291_v9  ;;  %v3326_v30 = vsub.f32 0.0, %v3298_v46  ;;  %vm3293_vm10 = vcmp.ge.f32.partialorder %v3291_v9, 0.0 }
0x1b3b   :  { %v3295_v2 = vsel %vm3293_vm10, 1.0, %v4512_v36 }
0x1b3c   :  { %v3302_v33 = vadd.f32 1.0, %v3300_v10  ;;  %v3299_v47 = vmul.f32 0.3275911, %v3297_v21  ;;  %v3325_v11 = vsub.f32 0.0, %v3297_v21  ;;  %v3328_v57 = vmul.f32 %v3326_v30, %v3298_v46 }
0x1b3e   :  { %4462 = vrcp.f32 %v3302_v33  ;;  %v3301_v54 = vadd.f32 1.0, %v3299_v47  ;;  %v3327_v59 = vmul.f32 %v3325_v11, %v3297_v21  ;;  %v3331_v18 = vmul.f32 1.442695, %v3328_v57 }
0x1b3f   :  { %v3456_v21 = vrot.slane %v3455_v44, 4 }
0x1b40   :  { %4464 = vrcp.f32 %v3301_v54  ;;  %v3329_v62 = vmul.f32 1.442695, %v3327_v59 }
0x1b41   :  { %4466 = vpow2.f32 %v3331_v18  ;;  %v3457_v33 = vadd.f32 %v3456_v21, %v3455_v44 }
0x1b42   :  { %4468 = vpow2.f32 %v3329_v62 }
0x1b43   :  { %v3458_v47 = vrot.slane %v3457_v33, 2 }
0x1b45   :  { %v3459_v54 = vadd.f32 %v3458_v47, %v3457_v33 }
0x1b47   :  { %v3460_v30 = vrot.slane %v3459_v54, 1 }
0x1b49   :  { %v3461_v11 = vadd.f32 %v3460_v30, %v3459_v54 }
0x1b4b   :  { %v4463_v41 = vpop.eup %4462  ;;  %v3463_v39 = vmul.f32 0.5, %v3461_v11 }
0x1b4c   :  { %v3308_v61 = vmul.f32 1.0614054, %v4463_v41 }
0x1b4d   :  { %v4465_v56 = vpop.eup %4464  ;;  %v3464_v57 = vsub.f32 %v3453_v4, %v3463_v39 }
0x1b4e   :  { %v3310_v53 = vadd.f32 -1.4531521, %v3308_v61  ;;  %v3307_v31 = vmul.f32 1.0614054, %v4465_v56  ;;  %v4467_v6 = vpop.eup %4466 }
0x1b4f   :  { %v4469_v17 = vpop.eup %4468 }
0x1b50   :  { %v3312_v49 = vmul.f32 %v4463_v41, %v3310_v53  ;;  %v3309_v0 = vadd.f32 -1.4531521, %v3307_v31 }
0x1b52   :  { %v3314_v51 = vadd.f32 1.4214138, %v3312_v49  ;;  %v3311_v28 = vmul.f32 %v4465_v56, %v3309_v0 }
0x1b54   :  { %v3316_v1 = vmul.f32 %v4463_v41, %v3314_v51  ;;  %v3313_v12 = vadd.f32 1.4214138, %v3311_v28 }
0x1b56   :  { %v3318_v40 = vadd.f32 -0.28449672, %v3316_v1  ;;  %v3315_v8 = vmul.f32 %v4465_v56, %v3313_v12 }
0x1b58   :  { %v3320_v15 = vmul.f32 %v4463_v41, %v3318_v40  ;;  %v3317_v3 = vadd.f32 -0.28449672, %v3315_v8  ;;  %v5369_v40 = vld [vmem:[%s5428_s11] sm:$0xff] }
0x1b5a   :  { %v3322_v26 = vadd.f32 0.2548296, %v3320_v15  ;;  %v3319_v5 = vmul.f32 %v4465_v56, %v3317_v3  ;;  %v3480_v3 = vrot.slane %v5369_v40, %v5045_v20  ;;  %v3490_v20 = vld [vmem:[%s5426_s9 + $0x18] sm:$0xff] }
0x1b5c   :  { %v3324_v60 = vmul.f32 %v4463_v41, %v3322_v26  ;;  %v3321_v13 = vadd.f32 0.2548296, %v3319_v5  ;;  %v3465_v41 = vmul.f32 %v3464_v57, %v3464_v57  ;;  %v3485_v5 = vrot.slane %v5369_v40, %v5048_v22  ;;  %v3489_v22 = vld [vmem:[%s5426_s9 + $0x10] sm:$0xff] }
0x1b5e   :  { %v3334_v14 = vmul.f32 %v4467_v6, %v3324_v60  ;;  %v3323_v16 = vmul.f32 %v4465_v56, %v3321_v13  ;;  %v4513_v60 = vmov 0.0   ;;  %v3491_v6 = vld [vmem:[%s5426_s9 + $0x20] sm:$0x3f] }
0x1b5f   :  { %4335 = vmatprep.subr.mxu0 %v4513_v60  ;;  %4351 = vmatprep.subr.mxu1 %v4513_v60 }
0x1b60   :  { %v3336_v19 = vsub.f32 1.0, %v3334_v14  ;;  %v3333_v24 = vmul.f32 %v4469_v17, %v3323_v16  ;;  %4336 = vmatpush3.msk.msra.mxu0 %vm3496_vm12, %v3491_v6  ;;  %4337 = vmatprep.mubr.msk.f32.mxu0 %vm4514_vm13, %v4513_v60  ;;  %v3488_v14 = vld [vmem:[%s5426_s9 + $0x8] sm:$0xff]  ;;  %v3487_v16 = vld [vmem:[%s5426_s9] sm:$0xff] }
0x1b61   :  { %4340 = vmatprep.subr.mxu0 %v4513_v60 }
0x1b62   :  { %v3338_v25 = vmul.f32 %v3336_v19, %v3296_v23  ;;  %v3335_v7 = vsub.f32 1.0, %v3333_v24  ;;  %v3446_v24 = vrot.slane %v5369_v40, %v4846_v50  ;;  %v3680_v50 = vld [vmem:[%s5427_s10] sm:$0xff] }
0x1b64   :  { %v3337_v37 = vmul.f32 %v3335_v7, %v3295_v2  ;;  %v3340_v27 = vadd.f32 1.0, %v3338_v25  ;;  %v3451_v2 = vrot.slane %v5369_v40, %v4854_v52  ;;  %v3646_v52 = vrot.slane %v5369_v40, %v4863_v63 }
0x1b66   :  { %v3339_v32 = vadd.f32 1.0, %v3337_v37  ;;  %v3342_v38 = vmul.f32 %v3340_v27, %v3290_v34  ;;  %v3681_v34 = vld [vmem:[%s5427_s10 + $0x8] sm:$0x3]  ;;  %s4515_s10 = smov [#allocation2]  }
0x1b67   :  { %s3769_s19 = sshll.u32 %s4515_s10, 4  ;;  %s3770_s19 = int_to_ptr.vmem [resolvable:$true] %s3769_s19 }
0x1b68   :  { %v3341_v35 = vmul.f32 %v3339_v32, %v3289_v29  ;;  %s4478_s27 = scalar_lea.vmem %s3770_s19, 32  ;;  %p4483_p1 = scmp.lt.s32.totalorder %s3770_s19, %s3770_s19 }
0x1b69   :  { %p4479_p0 = scmp.ne.s32.totalorder %s3770_s19, %s4478_s27  ;;  %p4484_p2 = scmp.lt.s32.totalorder %s4478_s27, %s4478_s27 }
0x1b6a   :  { %4332 = vmatprep.mubr.msk.f32.mxu1 %vm1762_vm8, %v3341_v35 }
0x1b6b   :  { %4333 = vmatmul.mubr.msk.f32.vlgmr.msra.gmra.mxu1 %vm1762_vm8, %v3342_v38  ;;  %p4485_p3 = por %p4484_p2, %p4483_p1 }
0x1b6c   :  { %4355 = vmatprep.mubr.msk.f32.mxu1 %vm4514_vm13, %v4513_v60  ;;  %4352 = vmatpush3.msk.msra.mxu1 %vm540_vm5, %v3681_v34 }
0x1b6d   :  { %4353 = vmatprep.subr.mxu1 %v4513_v60  ;;  %p4486_p4 = pnand %p4485_p3, %p4479_p0 }
0x1b6e   :  { %4354 = vmatpush3.msra.mxu1 %v3680_v50 }
0x1c2b   :  { %v4334_v42 = vpop.f32.mrf.mxu1 }
0x1c2d   :  { %v3415_v46 = vpop.f32.mrf.mxu1 }
0x1c2e   :  { %v3423_v9 = vadd.f32 %v3415_v46, %v5302_v55  ;;  %v3466_v55 = vsel %vm3454_vm11, %v3465_v41, 0.0 }
0x1c2f   :  { %v3467_v59 = vrot.slane %v3466_v55, 4 }
0x1c30   :  { %v3428_v10 = vadd.f32 %v3427_v43, %v3423_v9 }
0x1c31   :  { %v3468_v61 = vadd.f32 %v3467_v59, %v3466_v55 }
0x1c32   :  { %v3430_v36 = vsel %vm289_vm1, %v3428_v10, 0.0 }
0x1c33   :  { %3431 = vadd.xlane.f32.xlu0 %v3430_v36  ;;  %v3469_v53 = vrot.slane %v3468_v61, 2 }
0x1c35   :  { %v3470_v62 = vadd.f32 %v3469_v53, %v3468_v61 }
0x1c37   :  { %v3471_v0 = vrot.slane %v3470_v62, 1 }
0x1c39   :  { %v3472_v28 = vadd.f32 %v3471_v0, %v3470_v62 }
0x1c3b   :  { %v3473_v1 = vmul.f32 0.5, %v3472_v28 }
0x1c3d   :  { %v3474_v12 = vadd.f32 1e-05, %v3473_v1 }
0x1c3f   :  { %4470 = vrsqrt.f32 %v3474_v12 }
0x1c4c   :  { %v4471_v8 = vpop.eup %4470 }
0x1c4d   :  { %v3476_v15 = vmul.f32 %v4471_v8, %v3464_v57 }
0x1c4f   :  { %v3481_v26 = vmul.f32 %v3480_v3, %v3476_v15 }
0x1c51   :  { %v3486_v13 = vadd.f32 %v3485_v5, %v3481_v26 }
0x1c53   :  { %4338 = vmatmul.mubr.msk.f32.vlgmr.msra.gmra.mxu0 %vm3492_vm14, %v3486_v13 }
0x1c54   :  { %4348 = vmatprep.mubr.msk.f32.mxu0 %vm4514_vm13, %v4513_v60  ;;  %4341 = vmatpush3.msra.mxu0 %v3490_v20 }
0x1c55   :  { %4342 = vmatprep.subr.mxu0 %v4513_v60 }
0x1c56   :  { %4343 = vmatpush3.msra.mxu0 %v3489_v22 }
0x1c57   :  { %4344 = vmatprep.subr.mxu0 %v4513_v60 }
0x1c58   :  { %4345 = vmatpush3.msra.mxu0 %v3488_v14 }
0x1c59   :  { %4346 = vmatprep.subr.mxu0 %v4513_v60 }
0x1c5a   :  { %4347 = vmatpush3.msra.mxu0 %v3487_v16 }
0x1cbc   :  { %v3432_v18 = vpop.xlane.xlu0 %3431 }
0x1cbd   :  { %v3433_v56 = vmul.f32 0.03125, %v3432_v18 }
0x1cbf   :  { %v3434_v31 = vsub.f32 %v3428_v10, %v3433_v56  ;;  %v3673_v56 = vrot.slane %v5369_v40, %v5013_v48 }
0x1cc1   :  { %v3435_v49 = vmul.f32 %v3434_v31, %v3434_v31 }
0x1cc3   :  { %v3436_v51 = vsel %vm289_vm1, %v3435_v49, 0.0 }
0x1cc4   :  { %3437 = vadd.xlane.f32.xlu1 %v3436_v51  ;;  %v3685_v51 = vrot.slane %v5369_v40, %v5090_v58 }
0x1d13   :  { %v3566_v29 = vpop.f32.mrf.mxu0 }
0x1d15   :  { %v4339_v32 = vpop.f32.mrf.mxu0 }
0x1d4d   :  { %v3438_v17 = vpop.xlane.xlu1 %3437 }
0x1d4e   :  { %v3439_v19 = vmul.f32 0.03125, %v3438_v17 }
0x1d50   :  { %v3440_v23 = vadd.f32 1e-06, %v3439_v19 }
0x1d52   :  { %4472 = vrsqrt.f32 %v3440_v23 }
0x1d5f   :  { %v4473_v25 = vpop.eup %4472 }
0x1d60   :  { %v3442_v7 = vmul.f32 %v4473_v25, %v3434_v31  ;;  %v3678_v31 = vrot.slane %v5369_v40, %v5081_v45 }
0x1d62   :  { %v3447_v37 = vmul.f32 %v3446_v24, %v3442_v7 }
0x1d64   :  { %v3452_v27 = vadd.f32 %v3451_v2, %v3447_v37 }
0x1d66   :  { %4349 = vmatmul.mubr.msk.f32.vlgmr.msra.gmra.mxu0 %vm285_vm0, %v3452_v27 }
0x1e26   :  { %v3639_v35 = vpop.f32.mrf.mxu0 }
0x1e27   :  { %v3640_v38 = vadd.f32 %v3639_v35, %v3566_v29 }
0x1e28   :  { %v4350_v42 = vpop.f32.mrf.mxu0 }
0x1e29   :  { %v3647_v43 = vadd.f32 %v3646_v52, %v3640_v38 }
0x1e2b   :  { %v3648_v46 = vmax.f32 %v3647_v43, 0.0 }
0x1e2d   :  { %v3649_v9 = vsel %vm509_vm3, %v3648_v46, 0.0 }
0x1e2e   :  { %v3650_v10 = vrot.slane %v3649_v9, 4 }
0x1e30   :  { %v3651_v36 = vadd.f32 %v3650_v10, %v3649_v9 }
0x1e32   :  { %v3652_v4 = vrot.slane %v3651_v36, 2 }
0x1e34   :  { %v3653_v44 = vadd.f32 %v3652_v4, %v3651_v36 }
0x1e36   :  { %v3654_v21 = vrot.slane %v3653_v44, 1 }
0x1e38   :  { %v3655_v33 = vadd.f32 %v3654_v21, %v3653_v44 }
0x1e3a   :  { %v3656_v47 = vmul.f32 0.5, %v3655_v33 }
0x1e3c   :  { %v3657_v54 = vsub.f32 %v3648_v46, %v3656_v47 }
0x1e3e   :  { %v3658_v30 = vmul.f32 %v3657_v54, %v3657_v54 }
0x1e40   :  { %v3659_v11 = vsel %vm509_vm3, %v3658_v30, 0.0 }
0x1e41   :  { %v3660_v39 = vrot.slane %v3659_v11, 4 }
0x1e43   :  { %v3661_v63 = vadd.f32 %v3660_v39, %v3659_v11 }
0x1e45   :  { %v3662_v57 = vrot.slane %v3661_v63, 2 }
0x1e47   :  { %v3663_v41 = vadd.f32 %v3662_v57, %v3661_v63 }
0x1e49   :  { %v3664_v55 = vrot.slane %v3663_v41, 1 }
0x1e4b   :  { %v3665_v59 = vadd.f32 %v3664_v55, %v3663_v41 }
0x1e4d   :  { %v3666_v61 = vmul.f32 0.5, %v3665_v59 }
0x1e4f   :  { %v3667_v18 = vadd.f32 1e-05, %v3666_v61 }
0x1e51   :  { %4474 = vrsqrt.f32 %v3667_v18 }
0x1e5e   :  { %v4475_v53 = vpop.eup %4474 }
0x1e5f   :  { %v3669_v62 = vmul.f32 %v4475_v53, %v3657_v54 }
0x1e61   :  { %v3674_v49 = vmul.f32 %v3673_v56, %v3669_v62 }
0x1e63   :  { %v3679_v0 = vadd.f32 %v3678_v31, %v3674_v49 }
0x1e65   :  { %4356 = vmatmul.mubr.msk.f32.vlgmr.msra.gmra.mxu1 %vm505_vm4, %v3679_v0 }
0x1f25   :  { %v3758_v28 = vpop.f32.mrf.mxu1 }
0x1f26   :  { %v3759_v1 = vadd.f32 %v3758_v28, %v3685_v51 }
0x1f27   :  { %v4357_v12 = vpop.f32.mrf.mxu1 }
0x1f28   :  { %3762 = vst.msk [vmem:[#allocation2] sm:$0x3] %vm509_vm3, %v3759_v1 }
0x1f29   :  { %4489 = shalt.err (!%p4486_p4)
}
0x1f2a   :  { %3772 = dma.vmem_to_hbm [thread:$0]  %s3770_s19, 32, %s5429_s12, [#allocation3]  }
0x1f2b   :  { %4498 = dma.done.wait [#allocation3], 32  }
0x1f2c   :  { %4499 = vsyncadd [#allocation3], 4294967264 }
0x1f2d   :  { %3776 = vsyncpa [#allocation3], 1 }

</bundles_post_ra>
